<compile_context>
chip_gen: v7x
topology: tpu7x:2x2x1
jax: 0.10.0
libtpu: 0.0.40
codegen_flags: <defaults>
</compile_context>

<pallas_src>
from math import ceil

import jax
import jax.numpy as jnp
from jax import lax
from jax.experimental import pallas as pl
from jax.experimental.pallas import tpu as pltpu

# Same padding formula as the PyTorch module.
_pad = lambda i, o, k, s: int(ceil((s * (o - 1) - i + k) / s))

_EPS = 1e-5                              # BatchNorm eps (PyTorch default)
_VMEM_LIMIT = 48 * 1024 * 1024           # fits v5e/v6e (128 MiB) and v7x (64 MiB)


def _round_up(x, m):
    return (x + m - 1) // m * m


def _active_bounds(size, K, s, p, out_size):
    """Output index range whose receptive field touches the real input, plus the
    effective (small) paddings needed to compute exactly that range."""
    lo = max(0, -((-(p - K + 1)) // s))              # ceil((p - K + 1) / s), clamped
    hi = min(out_size - 1, (size - 1 + p) // s)
    n_active = hi - lo + 1
    pad_lo = p - lo * s
    pad_hi = (n_active - 1) * s + K - pad_lo - size
    assert n_active >= 1 and pad_lo >= 0 and pad_hi >= 0
    return lo, n_active, pad_lo, pad_hi


# ---------------------------------------------------------------------------
# Generic Conv2d (+folded bias/BN + activation) kernel: fused-K im2col matmul.
# ---------------------------------------------------------------------------
def _make_conv_mxu_kernel(*, K, s, AOW, AOWp, toh, Cin, Cout, act):
    KK = K * K

    def kernel(x_ref, w_ref, sc_ref, sh_ref, o_ref, col_ref):
        # x_ref : (1, 1, RIN*s, Wph, Cin) bf16  row tile (halo incl., width phase split)
        # w_ref : (KK*Cin, Cout) bf16
        # sc/sh : (1, Cout) f32        folded bias / eval-BatchNorm
        # o_ref : (1, toh, AOW, Cout)
        # col_ref: (toh*AOWp, KK*Cin) bf16 im2col staging (single MXU contraction)
        #
        # Rows AOW..AOWp-1 of each toh-slab of col_ref are never initialised; they
        # only produce matmul rows that are never stored, so they are harmless.
        for i in range(toh):
            for kh in range(K):
                for kw in range(K):
                    t = kh * K + kw
                    row = (i * s + kh) * s + (kw % s)
                    col_ref[pl.ds(i * AOWp, AOW), pl.ds(t * Cin, Cin)] = (
                        x_ref[0, 0, row, pl.ds(kw // s, AOW), :])

        # One MXU matmul for all 16 taps and all toh output rows (no per-tap
        # f32 accumulator read-modify-write).
        res = jnp.dot(col_ref[...], w_ref[...],
                      preferred_element_type=jnp.float32)     # (toh*AOWp, Cout)
        z = res * sc_ref[...] + sh_ref[...]
        if act == "leaky":
            z = jnp.where(z >= 0, z, 0.2 * z)                 # LeakyReLU(0.2)
        else:
            z = 1.0 / (1.0 + jnp.exp(-z))                     # Sigmoid
        z = z.astype(o_ref.dtype)
        for i in range(toh):
            o_ref[0, i] = z[i * AOWp:i * AOWp + AOW, :]

    return kernel


def _conv_act_active(x, w, scale, shift, *, stride, pads, act, toh, out_dtype):
    """Conv + scale/shift + activation over the active window only.

    x: (N, H, W, Cin) NHWC; w: (K, K, Cin, Cout); pads = (top, bottom, left, right).
    Returns the active output block (N, AOH, AOW, Cout).
    """
    x = x.astype(jnp.bfloat16)
    N, H, W, Cin = x.shape
    K, Cout = w.shape[0], w.shape[3]
    s = stride
    pt, pb, pleft, pright = pads
    Hp, Wp = H + pt + pb, W + pleft + pright
    AOH = (Hp - K) // s + 1
    AOW = (Wp - K) // s + 1
    toh = min(toh, AOH)

    xp = jnp.pad(x, ((0, 0), (pt, pb), (pleft, pright), (0, 0)))
    if s > 1 and Wp % s:
        xp = jnp.pad(xp, ((0, 0), (0, 0), (0, s - Wp % s), (0, 0)))
        Wp += s - Wp % s
    Wph = Wp // s
    assert (K - 1) // s + AOW <= Wph

    # Width-phase split: xps[n, h, ph, j, c] = xp[n, h, j*s + ph, c] so every
    # in-kernel tap slice is a contiguous, statically-offset window.
    if s > 1:
        xps = xp.reshape(N, Hp, Wph, s, Cin).transpose(0, 1, 3, 2, 4)
    else:
        xps = xp.reshape(N, Hp, 1, Wp, Cin)

    # Small row-tile copy with (K - s)-row halo so each grid block is a plain,
    # non-overlapping BlockSpec tile (inputs are tiny after the active-window crop).
    nb = pl.cdiv(AOH, toh)
    RIN = toh * s + (K - s)
    row_idx = jnp.minimum(
        jnp.arange(nb, dtype=jnp.int32)[:, None] * (toh * s)
        + jnp.arange(RIN, dtype=jnp.int32)[None, :], Hp - 1).reshape(-1)
    xrt = jnp.take(xps, row_idx, axis=1, mode="clip")
    xrt = xrt.reshape(N, nb, RIN * s, Wph, Cin)

    AOWp = _round_up(AOW, 8)                       # sublane-aligned staging rows
    w_k = w.reshape(K * K * Cin, Cout).astype(jnp.bfloat16)
    sc = scale.reshape(1, Cout).astype(jnp.float32)
    sh = shift.reshape(1, Cout).astype(jnp.float32)

    kernel = _make_conv_mxu_kernel(K=K, s=s, AOW=AOW, AOWp=AOWp, toh=toh,
                                   Cin=Cin, Cout=Cout, act=act)
    out = pl.pallas_call(
        kernel,
        out_shape=jax.ShapeDtypeStruct((N, nb * toh, AOW, Cout), out_dtype),
        grid=(N, nb),
        in_specs=[
            pl.BlockSpec((1, 1, RIN * s, Wph, Cin), lambda n, b: (n, b, 0, 0, 0)),
            pl.BlockSpec((K * K * Cin, Cout), lambda n, b: (0, 0)),
            pl.BlockSpec((1, Cout), lambda n, b: (0, 0)),
            pl.BlockSpec((1, Cout), lambda n, b: (0, 0)),
        ],
        out_specs=pl.BlockSpec((1, toh, AOW, Cout), lambda n, b: (n, b, 0, 0)),
        scratch_shapes=[pltpu.VMEM((toh * AOWp, K * K * Cin), jnp.bfloat16)],
        compiler_params=pltpu.CompilerParams(
            dimension_semantics=("parallel", "parallel"),
            vmem_limit_bytes=_VMEM_LIMIT),
    )(xrt, w_k, sc, sh)
    return out[:, :AOH]


# ---------------------------------------------------------------------------
# Cout==1 (final) layer: MXU channel contraction + shifted spatial add,
# lane-dense (N, OH, OW) output, manual windowed DMA from HBM.
# ---------------------------------------------------------------------------
def _make_cout1_kernel(*, K, toh, RIN, AOW, Cin, Wlp):
    def kernel(x_hbm, w_ref, sc_ref, sh_ref, o_ref, xbuf, tbuf, sem):
        # x_hbm: (N, Hpe, Cin, Wlp) bf16 in HBM (memory_space=ANY)
        # w_ref: (K*K, Cin) bf16; sc/sh: (1, 1) f32
        # o_ref: (1, toh, AOW) f32 (AOW lane-dense)
        # xbuf : VMEM (RIN, Cin, Wlp) bf16; tbuf: VMEM (RIN, K*K, Wlp) f32
        n = pl.program_id(0)
        b = pl.program_id(1)
        row0 = b * toh
        cp = pltpu.make_async_copy(x_hbm.at[n, pl.ds(row0, RIN)], xbuf, sem)
        cp.start()
        cp.wait()
        # TODO(synk): single-buffered window DMA; a 2-deep buffer would overlap
        # the copy with the matmuls (layer is already MXU/HBM-light after crop).

        def mm(h, carry):
            # all 16 per-tap channel contractions of one input row on the MXU
            tbuf[h] = jnp.dot(w_ref[...], xbuf[h],
                              preferred_element_type=jnp.float32)   # (16, Wlp)
            return carry

        lax.fori_loop(0, RIN, mm, 0)

        # Shifted spatial combine: out[i, c] = sum_{kh,kw} T[i+kh, kh*K+kw, c+kw]
        acc = tbuf[pl.ds(0, toh), 0, pl.ds(0, AOW)]
        for kh in range(K):
            for kw in range(K):
                t = kh * K + kw
                if t == 0:
                    continue
                acc = acc + tbuf[pl.ds(kh, toh), t, pl.ds(kw, AOW)]
        z = acc * sc_ref[0, 0] + sh_ref[0, 0]
        o_ref[0] = 1.0 / (1.0 + jnp.exp(-z))                        # Sigmoid

    return kernel


def _conv_cout1_active(x, w, scale, shift, *, pads, toh):
    """Stride-1, Cout==1 conv + scale/shift + sigmoid over the active window.

    x: (N, H, W, Cin); w: (K, K, Cin, 1).  Returns (N, AOH, AOW) float32.
    """
    x = x.astype(jnp.bfloat16)
    N, H, W, Cin = x.shape
    K = w.shape[0]
    assert w.shape[3] == 1
    pt, pb, pleft, pright = pads
    AOH = H + pt + pb - K + 1
    AOW = W + pleft + pright - K + 1
    toh = toh if AOH > toh else AOH
    nb = pl.cdiv(AOH, toh)
    RIN = toh + K - 1
    Hpe = nb * toh + (K - 1)
    Wlp = _round_up(W + pleft + pright, 128)

    # Channels-on-sublanes / width-on-lanes layout: the per-row tap contraction
    # becomes a plain (16, Cin) @ (Cin, Wlp) MXU matmul and the output row stays
    # lane-dense.
    xt = jnp.transpose(x, (0, 1, 3, 2))                        # (N, H, Cin, W)
    xt = jnp.pad(xt, ((0, 0), (pt, Hpe - pt - H), (0, 0),
                      (pleft, Wlp - pleft - W)))

    w_k = w[..., 0].reshape(K * K, Cin).astype(jnp.bfloat16)
    sc = jnp.asarray(scale, jnp.float32).reshape(1, 1)
    sh = jnp.asarray(shift, jnp.float32).reshape(1, 1)

    kernel = _make_cout1_kernel(K=K, toh=toh, RIN=RIN, AOW=AOW, Cin=Cin, Wlp=Wlp)
    out = pl.pallas_call(
        kernel,
        out_shape=jax.ShapeDtypeStruct((N, nb * toh, AOW), jnp.float32),
        grid=(N, nb),
        in_specs=[
            pl.BlockSpec(memory_space=pl.ANY),                 # input stays in HBM
            pl.BlockSpec((K * K, Cin), lambda n, b: (0, 0)),
            pl.BlockSpec((1, 1), lambda n, b: (0, 0)),
            pl.BlockSpec((1, 1), lambda n, b: (0, 0)),
        ],
        out_specs=pl.BlockSpec((1, toh, AOW), lambda n, b: (n, b, 0)),
        scratch_shapes=[
            pltpu.VMEM((RIN, Cin, Wlp), jnp.bfloat16),
            pltpu.VMEM((RIN, K * K, Wlp), jnp.float32),
            pltpu.SemaphoreType.DMA,
        ],
        compiler_params=pltpu.CompilerParams(
            dimension_semantics=("parallel", "arbitrary"),
            vmem_limit_bytes=_VMEM_LIMIT),
    )(xt, w_k, sc, sh)
    return out[:, :AOH]


# ---------------------------------------------------------------------------
# One discriminator layer = Pallas kernel on the active window + constant fill.
# ---------------------------------------------------------------------------
def _layer_forward(x, prm, cfg, *, last):
    N, H, W, _ = x.shape
    K, s, p, Cout = cfg["k"], cfg["s"], cfg["p"], cfg["cout"]
    OH = (H + 2 * p - K) // s + 1
    OW = (W + 2 * p - K) // s + 1
    r_lo, AOH, ptop, pbot = _active_bounds(H, K, s, p, OH)
    c_lo, AOW, pleft, pright = _active_bounds(W, K, s, p, OW)
    w, scale, shift = prm["w"], prm["scale"], prm["shift"]

    if last:
        assert s == 1 and Cout == 1
        # toh=32 keeps the double-use VMEM well under v7x's 64 MiB; raise on
        # 128-MiB (v5e/v6e) parts for fewer grid steps / less halo re-read.
        act_blk = _conv_cout1_active(x, w, scale[0], shift[0],
                                     pads=(ptop, pbot, pleft, pright), toh=32)
        const = 1.0 / (1.0 + jnp.exp(-shift[0].astype(jnp.float32)))
        full = jnp.broadcast_to(const, (N, OH, OW)).astype(jnp.float32)
        return lax.dynamic_update_slice(full, act_blk, (0, r_lo, c_lo))

    act_blk = _conv_act_active(x, w, scale, shift, stride=s,
                               pads=(ptop, pbot, pleft, pright), act="leaky",
                               toh=8, out_dtype=jnp.bfloat16)
    constv = jnp.where(shift >= 0, shift, 0.2 * shift).astype(jnp.bfloat16)
    full = jnp.broadcast_to(constv, (N, OH, OW, Cout))
    return lax.dynamic_update_slice(full, act_blk, (0, r_lo, c_lo, 0))


# ---------------------------------------------------------------------------
# Discriminator definition (matches the PyTorch module)
# ---------------------------------------------------------------------------
def _layer_configs():
    return [
        dict(cin=1,   cout=64,  k=4, s=2, p=_pad(64, 32, 4, 2),   bn=False),
        dict(cin=64,  cout=128, k=4, s=2, p=_pad(64, 128, 4, 2),  bn=True),
        dict(cin=128, cout=256, k=4, s=2, p=_pad(128, 256, 4, 2), bn=True),
        dict(cin=256, cout=512, k=4, s=2, p=_pad(256, 512, 4, 2), bn=True),
        dict(cin=512, cout=1,   k=4, s=1, p=_pad(256, 512, 4, 2), bn=False),
    ]


def init_params(key):
    """Deterministic synthetic parameters (conv weight/bias, folded eval-BatchNorm)."""
    params = []
    for cfg in _layer_configs():
        key, kw_, kb_, kg_, kbe, kme, kva = jax.random.split(key, 7)
        w = 0.02 * jax.random.normal(
            kw_, (cfg["k"], cfg["k"], cfg["cin"], cfg["cout"]), jnp.float32)
        b = 0.02 * jax.random.normal(kb_, (cfg["cout"],), jnp.float32)
        if cfg["bn"]:
            gamma = 1.0 + 0.02 * jax.random.normal(kg_, (cfg["cout"],), jnp.float32)
            beta = 0.02 * jax.random.normal(kbe, (cfg["cout"],), jnp.float32)
            r_mean = 0.02 * jax.random.normal(kme, (cfg["cout"],), jnp.float32)
            r_var = 1.0 + 0.1 * jnp.abs(jax.random.normal(kva, (cfg["cout"],), jnp.float32))
            scl = gamma / jnp.sqrt(r_var + _EPS)
            scale, shift = scl, (b - r_mean) * scl + beta
        else:
            scale, shift = jnp.ones((cfg["cout"],), jnp.float32), b
        params.append(dict(w=w, scale=scale, shift=shift))
    return params


@jax.jit
def discriminator_forward(x_nchw, params):
    # TODO(synk): nn.Dropout(0.3) layers are eval-mode identities here (train-mode
    # masking would use pltpu.prng_seed/prng_random_bits); BatchNorm2d is applied in
    # eval mode (running stats folded into per-channel scale/shift).
    x = jnp.transpose(x_nchw, (0, 2, 3, 1)).astype(jnp.bfloat16)   # NCHW -> NHWC
    cfgs = _layer_configs()
    for i, (cfg, prm) in enumerate(zip(cfgs, params)):
        x = _layer_forward(x, prm, cfg, last=(i == len(cfgs) - 1))
    return x[:, None, :, :].astype(jnp.float32)                    # (N, 1, OH, OW)


# ---------------------------------------------------------------------------
if __name__ == "__main__":
    root = jax.random.PRNGKey(0)
    pkey, xkey, k1, k2, k3 = jax.random.split(root, 5)

    # --- unit checks of both conv paths (incl. the big-pad active/constant
    #     decomposition) against lax.conv_general_dilated ---
    def _ref_layer(xr, wr, scale, shift, stride, padding, act):
        y = lax.conv_general_dilated(
            xr, wr, window_strides=(stride, stride),
            padding=[(padding, padding)] * 2,
            dimension_numbers=("NHWC", "HWIO", "NHWC"),
            precision=lax.Precision.HIGHEST)
        y = y * scale.reshape(1, 1, 1, -1) + shift.reshape(1, 1, 1, -1)
        if act == "leaky":
            return jnp.where(y >= 0, y, 0.2 * y)
        return 1.0 / (1.0 + jnp.exp(-y))

    def _check(key, cin, cout, hw, stride, padding, act):
        kx, kw_, kb_ = jax.random.split(key, 3)
        x = jax.random.normal(kx, (1, hw, hw, cin), jnp.float32)
        w = 0.1 * jax.random.normal(kw_, (4, 4, cin, cout), jnp.float32)
        b = 0.1 * jax.random.normal(kb_, (cout,), jnp.float32)
        cfg = dict(k=4, s=stride, p=padding, cout=cout)
        prm = dict(w=w, scale=jnp.ones((cout,), jnp.float32), shift=b)
        got = _layer_forward(x, prm, cfg, last=(act == "sigmoid")).astype(jnp.float32)
        xq = x.astype(jnp.bfloat16).astype(jnp.float32)
        wq = w.astype(jnp.bfloat16).astype(jnp.float32)
        ref = _ref_layer(xq, wq, jnp.ones((cout,), jnp.float32), b,
                         stride, padding, act)
        if act == "sigmoid":
            ref = ref[..., 0]
        assert got.shape == ref.shape, (got.shape, ref.shape)
        err = float(jnp.max(jnp.abs(got - ref)))
        tol = 2e-2 * (1.0 + float(jnp.max(jnp.abs(ref))))
        assert err < tol, f"conv check failed (cin={cin}, cout={cout}, p={padding}): {err} >= {tol}"

    _check(k1, 32, 64, 18, 2, 9, "leaky")     # general MXU path, p > K (crop + fill)
    _check(k2, 1, 16, 10, 2, 1, "leaky")      # Cin == 1 (first-layer path)
    _check(k3, 16, 1, 12, 1, 6, "sigmoid")    # Cout == 1 MXU + manual-DMA path, p > K

    # --- full Discriminator forward ---
    params = init_params(pkey)
    x = jax.random.normal(xkey, (1, 1, 8, 8), jnp.float32)   # NCHW, 1 input channel

    out = jax.block_until_ready(discriminator_forward(x, params))

    # Expected output shape per PyTorch Conv2d arithmetic.
    h = x.shape[2]
    for cfg in _layer_configs():
        h = (h + 2 * cfg["p"] - cfg["k"]) // cfg["s"] + 1
    assert out.shape == (x.shape[0], 1, h, h), out.shape
    assert out.dtype == jnp.float32
    assert bool(jnp.all(jnp.isfinite(out)))
    assert bool(jnp.all((out >= 0.0) & (out <= 1.0)))        # sigmoid range
    # Far-field outputs see only zero padding -> exactly sigmoid(conv bias).
    corner = float(out[0, 0, 0, 0])
    expect = float(1.0 / (1.0 + jnp.exp(-params[-1]["shift"][0])))
    assert abs(corner - expect) < 1e-5, (corner, expect)

    print("KERNEL_OK")
</pallas_src>

<mosaic_0001>
module attributes {stable_mosaic.version = 11 : i64} {
  func.func @kernel(%arg0: i32, %arg1: i32, %arg2: memref<1x1x36x12x32xbf16, #tpu.memory_space<vmem>>, %arg3: memref<512x64xbf16, #tpu.memory_space<vmem>>, %arg4: memref<1x64xf32, #tpu.memory_space<vmem>>, %arg5: memref<1x64xf32, #tpu.memory_space<vmem>>, %arg6: memref<1x8x11x64xbf16, #tpu.memory_space<vmem>>, %arg7: memref<128x512xbf16, #tpu.memory_space<vmem>>) attributes {dimension_semantics = [#tpu.dimension_semantics<parallel>, #tpu.dimension_semantics<parallel>], iteration_bounds = array<i64: 1, 2>, scalar_prefetch = 0 : i64, scratch_operands = 1 : i64, tpu.core_type = #tpu.core_type<tc>, window_params = [{transform_indices = @transform_0, window_bounds = array<i64: 1, 1, 36, 12, 32>}, {pipeline_mode = #tpu.pipeline_mode<synchronous>, transform_indices = @transform_1, window_bounds = array<i64: 512, 64>}, {pipeline_mode = #tpu.pipeline_mode<synchronous>, transform_indices = @transform_2, window_bounds = array<i64: 1, 64>}, {pipeline_mode = #tpu.pipeline_mode<synchronous>, transform_indices = @transform_3, window_bounds = array<i64: 1, 64>}, {transform_indices = @transform_4, window_bounds = array<i64: 1, 8, 11, 64>}]} {
    %c0 = arith.constant 0 : index
    %c0_0 = arith.constant 0 : index
    %c0_1 = arith.constant 0 : index
    %c0_2 = arith.constant 0 : index
    %c0_3 = arith.constant 0 : index
    %0 = vector.load %arg2[%c0, %c0_0, %c0_1, %c0_2, %c0_3] : memref<1x1x36x12x32xbf16, #tpu.memory_space<vmem>>, vector<1x1x1x11x32xbf16>
    %1 = vector.shape_cast %0 : vector<1x1x1x11x32xbf16> to vector<11x32xbf16>
    %c0_4 = arith.constant 0 : index
    %c0_5 = arith.constant 0 : index
    %2 = vector.load %arg7[%c0_4, %c0_5] : memref<128x512xbf16, #tpu.memory_space<vmem>>, vector<11x32xbf16>
    tpu.vector_store %arg7[%c0_4, %c0_5], %1 {strides = array<i32>} : memref<128x512xbf16, #tpu.memory_space<vmem>>, vector<11x32xbf16>,
    %c0_6 = arith.constant 0 : index
    %c0_7 = arith.constant 0 : index
    %c1 = arith.constant 1 : index
    %c0_8 = arith.constant 0 : index
    %c0_9 = arith.constant 0 : index
    %3 = vector.load %arg2[%c0_6, %c0_7, %c1, %c0_8, %c0_9] : memref<1x1x36x12x32xbf16, #tpu.memory_space<vmem>>, vector<1x1x1x11x32xbf16>
    %4 = vector.shape_cast %3 : vector<1x1x1x11x32xbf16> to vector<11x32xbf16>
    %c0_10 = arith.constant 0 : index
    %c32 = arith.constant 32 : index
    %5 = vector.load %arg7[%c0_10, %c32] : memref<128x512xbf16, #tpu.memory_space<vmem>>, vector<11x32xbf16>
    tpu.vector_store %arg7[%c0_10, %c32], %4 {strides = array<i32>} : memref<128x512xbf16, #tpu.memory_space<vmem>>, vector<11x32xbf16>,
    %c0_11 = arith.constant 0 : index
    %c0_12 = arith.constant 0 : index
    %c0_13 = arith.constant 0 : index
    %c1_14 = arith.constant 1 : index
    %c0_15 = arith.constant 0 : index
    %6 = vector.load %arg2[%c0_11, %c0_12, %c0_13, %c1_14, %c0_15] : memref<1x1x36x12x32xbf16, #tpu.memory_space<vmem>>, vector<1x1x1x11x32xbf16>
    %7 = vector.shape_cast %6 : vector<1x1x1x11x32xbf16> to vector<11x32xbf16>
    %c0_16 = arith.constant 0 : index
    %c64 = arith.constant 64 : index
    %8 = vector.load %arg7[%c0_16, %c64] : memref<128x512xbf16, #tpu.memory_space<vmem>>, vector<11x32xbf16>
    tpu.vector_store %arg7[%c0_16, %c64], %7 {strides = array<i32>} : memref<128x512xbf16, #tpu.memory_space<vmem>>, vector<11x32xbf16>,
    %c0_17 = arith.constant 0 : index
    %c0_18 = arith.constant 0 : index
    %c1_19 = arith.constant 1 : index
    %c1_20 = arith.constant 1 : index
    %c0_21 = arith.constant 0 : index
    %9 = vector.load %arg2[%c0_17, %c0_18, %c1_19, %c1_20, %c0_21] : memref<1x1x36x12x32xbf16, #tpu.memory_space<vmem>>, vector<1x1x1x11x32xbf16>
    %10 = vector.shape_cast %9 : vector<1x1x1x11x32xbf16> to vector<11x32xbf16>
    %c0_22 = arith.constant 0 : index
    %c96 = arith.constant 96 : index
    %11 = vector.load %arg7[%c0_22, %c96] : memref<128x512xbf16, #tpu.memory_space<vmem>>, vector<11x32xbf16>
    tpu.vector_store %arg7[%c0_22, %c96], %10 {strides = array<i32>} : memref<128x512xbf16, #tpu.memory_space<vmem>>, vector<11x32xbf16>,
    %c0_23 = arith.constant 0 : index
    %c0_24 = arith.constant 0 : index
    %c2 = arith.constant 2 : index
    %c0_25 = arith.constant 0 : index
    %c0_26 = arith.constant 0 : index
    %12 = vector.load %arg2[%c0_23, %c0_24, %c2, %c0_25, %c0_26] : memref<1x1x36x12x32xbf16, #tpu.memory_space<vmem>>, vector<1x1x1x11x32xbf16>
    %13 = vector.shape_cast %12 : vector<1x1x1x11x32xbf16> to vector<11x32xbf16>
    %c0_27 = arith.constant 0 : index
    %c128 = arith.constant 128 : index
    %14 = vector.load %arg7[%c0_27, %c128] : memref<128x512xbf16, #tpu.memory_space<vmem>>, vector<11x32xbf16>
    tpu.vector_store %arg7[%c0_27, %c128], %13 {strides = array<i32>} : memref<128x512xbf16, #tpu.memory_space<vmem>>, vector<11x32xbf16>,
    %c0_28 = arith.constant 0 : index
    %c0_29 = arith.constant 0 : index
    %c3 = arith.constant 3 : index
    %c0_30 = arith.constant 0 : index
    %c0_31 = arith.constant 0 : index
    %15 = vector.load %arg2[%c0_28, %c0_29, %c3, %c0_30, %c0_31] : memref<1x1x36x12x32xbf16, #tpu.memory_space<vmem>>, vector<1x1x1x11x32xbf16>
    %16 = vector.shape_cast %15 : vector<1x1x1x11x32xbf16> to vector<11x32xbf16>
    %c0_32 = arith.constant 0 : index
    %c160 = arith.constant 160 : index
    %17 = vector.load %arg7[%c0_32, %c160] : memref<128x512xbf16, #tpu.memory_space<vmem>>, vector<11x32xbf16>
    tpu.vector_store %arg7[%c0_32, %c160], %16 {strides = array<i32>} : memref<128x512xbf16, #tpu.memory_space<vmem>>, vector<11x32xbf16>,
    %c0_33 = arith.constant 0 : index
    %c0_34 = arith.constant 0 : index
    %c2_35 = arith.constant 2 : index
    %c1_36 = arith.constant 1 : index
    %c0_37 = arith.constant 0 : index
    %18 = vector.load %arg2[%c0_33, %c0_34, %c2_35, %c1_36, %c0_37] : memref<1x1x36x12x32xbf16, #tpu.memory_space<vmem>>, vector<1x1x1x11x32xbf16>
    %19 = vector.shape_cast %18 : vector<1x1x1x11x32xbf16> to vector<11x32xbf16>
    %c0_38 = arith.constant 0 : index
    %c192 = arith.constant 192 : index
    %20 = vector.load %arg7[%c0_38, %c192] : memref<128x512xbf16, #tpu.memory_space<vmem>>, vector<11x32xbf16>
    tpu.vector_store %arg7[%c0_38, %c192], %19 {strides = array<i32>} : memref<128x512xbf16, #tpu.memory_space<vmem>>, vector<11x32xbf16>,
    %c0_39 = arith.constant 0 : index
    %c0_40 = arith.constant 0 : index
    %c3_41 = arith.constant 3 : index
    %c1_42 = arith.constant 1 : index
    %c0_43 = arith.constant 0 : index
    %21 = vector.load %arg2[%c0_39, %c0_40, %c3_41, %c1_42, %c0_43] : memref<1x1x36x12x32xbf16, #tpu.memory_space<vmem>>, vector<1x1x1x11x32xbf16>
    %22 = vector.shape_cast %21 : vector<1x1x1x11x32xbf16> to vector<11x32xbf16>
    %c0_44 = arith.constant 0 : index
    %c224 = arith.constant 224 : index
    %23 = vector.load %arg7[%c0_44, %c224] : memref<128x512xbf16, #tpu.memory_space<vmem>>, vector<11x32xbf16>
    tpu.vector_store %arg7[%c0_44, %c224], %22 {strides = array<i32>} : memref<128x512xbf16, #tpu.memory_space<vmem>>, vector<11x32xbf16>,
    %c0_45 = arith.constant 0 : index
    %c0_46 = arith.constant 0 : index
    %c4 = arith.constant 4 : index
    %c0_47 = arith.constant 0 : index
    %c0_48 = arith.constant 0 : index
    %24 = vector.load %arg2[%c0_45, %c0_46, %c4, %c0_47, %c0_48] : memref<1x1x36x12x32xbf16, #tpu.memory_space<vmem>>, vector<1x1x1x11x32xbf16>
    %25 = vector.shape_cast %24 : vector<1x1x1x11x32xbf16> to vector<11x32xbf16>
    %c0_49 = arith.constant 0 : index
    %c256 = arith.constant 256 : index
    %26 = vector.load %arg7[%c0_49, %c256] : memref<128x512xbf16, #tpu.memory_space<vmem>>, vector<11x32xbf16>
    tpu.vector_store %arg7[%c0_49, %c256], %25 {strides = array<i32>} : memref<128x512xbf16, #tpu.memory_space<vmem>>, vector<11x32xbf16>,
    %c0_50 = arith.constant 0 : index
    %c0_51 = arith.constant 0 : index
    %c5 = arith.constant 5 : index
    %c0_52 = arith.constant 0 : index
    %c0_53 = arith.constant 0 : index
    %27 = vector.load %arg2[%c0_50, %c0_51, %c5, %c0_52, %c0_53] : memref<1x1x36x12x32xbf16, #tpu.memory_space<vmem>>, vector<1x1x1x11x32xbf16>
    %28 = vector.shape_cast %27 : vector<1x1x1x11x32xbf16> to vector<11x32xbf16>
    %c0_54 = arith.constant 0 : index
    %c288 = arith.constant 288 : index
    %29 = vector.load %arg7[%c0_54, %c288] : memref<128x512xbf16, #tpu.memory_space<vmem>>, vector<11x32xbf16>
    tpu.vector_store %arg7[%c0_54, %c288], %28 {strides = array<i32>} : memref<128x512xbf16, #tpu.memory_space<vmem>>, vector<11x32xbf16>,
    %c0_55 = arith.constant 0 : index
    %c0_56 = arith.constant 0 : index
    %c4_57 = arith.constant 4 : index
    %c1_58 = arith.constant 1 : index
    %c0_59 = arith.constant 0 : index
    %30 = vector.load %arg2[%c0_55, %c0_56, %c4_57, %c1_58, %c0_59] : memref<1x1x36x12x32xbf16, #tpu.memory_space<vmem>>, vector<1x1x1x11x32xbf16>
    %31 = vector.shape_cast %30 : vector<1x1x1x11x32xbf16> to vector<11x32xbf16>
    %c0_60 = arith.constant 0 : index
    %c320 = arith.constant 320 : index
    %32 = vector.load %arg7[%c0_60, %c320] : memref<128x512xbf16, #tpu.memory_space<vmem>>, vector<11x32xbf16>
    tpu.vector_store %arg7[%c0_60, %c320], %31 {strides = array<i32>} : memref<128x512xbf16, #tpu.memory_space<vmem>>, vector<11x32xbf16>,
    %c0_61 = arith.constant 0 : index
    %c0_62 = arith.constant 0 : index
    %c5_63 = arith.constant 5 : index
    %c1_64 = arith.constant 1 : index
    %c0_65 = arith.constant 0 : index
    %33 = vector.load %arg2[%c0_61, %c0_62, %c5_63, %c1_64, %c0_65] : memref<1x1x36x12x32xbf16, #tpu.memory_space<vmem>>, vector<1x1x1x11x32xbf16>
    %34 = vector.shape_cast %33 : vector<1x1x1x11x32xbf16> to vector<11x32xbf16>
    %c0_66 = arith.constant 0 : index
    %c352 = arith.constant 352 : index
    %35 = vector.load %arg7[%c0_66, %c352] : memref<128x512xbf16, #tpu.memory_space<vmem>>, vector<11x32xbf16>
    tpu.vector_store %arg7[%c0_66, %c352], %34 {strides = array<i32>} : memref<128x512xbf16, #tpu.memory_space<vmem>>, vector<11x32xbf16>,
    %c0_67 = arith.constant 0 : index
    %c0_68 = arith.constant 0 : index
    %c6 = arith.constant 6 : index
    %c0_69 = arith.constant 0 : index
    %c0_70 = arith.constant 0 : index
    %36 = vector.load %arg2[%c0_67, %c0_68, %c6, %c0_69, %c0_70] : memref<1x1x36x12x32xbf16, #tpu.memory_space<vmem>>, vector<1x1x1x11x32xbf16>
    %37 = vector.shape_cast %36 : vector<1x1x1x11x32xbf16> to vector<11x32xbf16>
    %c0_71 = arith.constant 0 : index
    %c384 = arith.constant 384 : index
    %38 = vector.load %arg7[%c0_71, %c384] : memref<128x512xbf16, #tpu.memory_space<vmem>>, vector<11x32xbf16>
    tpu.vector_store %arg7[%c0_71, %c384], %37 {strides = array<i32>} : memref<128x512xbf16, #tpu.memory_space<vmem>>, vector<11x32xbf16>,
    %c0_72 = arith.constant 0 : index
    %c0_73 = arith.constant 0 : index
    %c7 = arith.constant 7 : index
    %c0_74 = arith.constant 0 : index
    %c0_75 = arith.constant 0 : index
    %39 = vector.load %arg2[%c0_72, %c0_73, %c7, %c0_74, %c0_75] : memref<1x1x36x12x32xbf16, #tpu.memory_space<vmem>>, vector<1x1x1x11x32xbf16>
    %40 = vector.shape_cast %39 : vector<1x1x1x11x32xbf16> to vector<11x32xbf16>
    %c0_76 = arith.constant 0 : index
    %c416 = arith.constant 416 : index
    %41 = vector.load %arg7[%c0_76, %c416] : memref<128x512xbf16, #tpu.memory_space<vmem>>, vector<11x32xbf16>
    tpu.vector_store %arg7[%c0_76, %c416], %40 {strides = array<i32>} : memref<128x512xbf16, #tpu.memory_space<vmem>>, vector<11x32xbf16>,
    %c0_77 = arith.constant 0 : index
    %c0_78 = arith.constant 0 : index
    %c6_79 = arith.constant 6 : index
    %c1_80 = arith.constant 1 : index
    %c0_81 = arith.constant 0 : index
    %42 = vector.load %arg2[%c0_77, %c0_78, %c6_79, %c1_80, %c0_81] : memref<1x1x36x12x32xbf16, #tpu.memory_space<vmem>>, vector<1x1x1x11x32xbf16>
    %43 = vector.shape_cast %42 : vector<1x1x1x11x32xbf16> to vector<11x32xbf16>
    %c0_82 = arith.constant 0 : index
    %c448 = arith.constant 448 : index
    %44 = vector.load %arg7[%c0_82, %c448] : memref<128x512xbf16, #tpu.memory_space<vmem>>, vector<11x32xbf16>
    tpu.vector_store %arg7[%c0_82, %c448], %43 {strides = array<i32>} : memref<128x512xbf16, #tpu.memory_space<vmem>>, vector<11x32xbf16>,
    %c0_83 = arith.constant 0 : index
    %c0_84 = arith.constant 0 : index
    %c7_85 = arith.constant 7 : index
    %c1_86 = arith.constant 1 : index
    %c0_87 = arith.constant 0 : index
    %45 = vector.load %arg2[%c0_83, %c0_84, %c7_85, %c1_86, %c0_87] : memref<1x1x36x12x32xbf16, #tpu.memory_space<vmem>>, vector<1x1x1x11x32xbf16>
    %46 = vector.shape_cast %45 : vector<1x1x1x11x32xbf16> to vector<11x32xbf16>
    %c0_88 = arith.constant 0 : index
    %c480 = arith.constant 480 : index
    %47 = vector.load %arg7[%c0_88, %c480] : memref<128x512xbf16, #tpu.memory_space<vmem>>, vector<11x32xbf16>
    tpu.vector_store %arg7[%c0_88, %c480], %46 {strides = array<i32>} : memref<128x512xbf16, #tpu.memory_space<vmem>>, vector<11x32xbf16>,
    %c0_89 = arith.constant 0 : index
    %c0_90 = arith.constant 0 : index
    %c4_91 = arith.constant 4 : index
    %c0_92 = arith.constant 0 : index
    %c0_93 = arith.constant 0 : index
    %48 = vector.load %arg2[%c0_89, %c0_90, %c4_91, %c0_92, %c0_93] : memref<1x1x36x12x32xbf16, #tpu.memory_space<vmem>>, vector<1x1x1x11x32xbf16>
    %49 = vector.shape_cast %48 : vector<1x1x1x11x32xbf16> to vector<11x32xbf16>
    %c16 = arith.constant 16 : index
    %c0_94 = arith.constant 0 : index
    %50 = vector.load %arg7[%c16, %c0_94] : memref<128x512xbf16, #tpu.memory_space<vmem>>, vector<11x32xbf16>
    tpu.vector_store %arg7[%c16, %c0_94], %49 {strides = array<i32>} : memref<128x512xbf16, #tpu.memory_space<vmem>>, vector<11x32xbf16>,
    %c0_95 = arith.constant 0 : index
    %c0_96 = arith.constant 0 : index
    %c5_97 = arith.constant 5 : index
    %c0_98 = arith.constant 0 : index
    %c0_99 = arith.constant 0 : index
    %51 = vector.load %arg2[%c0_95, %c0_96, %c5_97, %c0_98, %c0_99] : memref<1x1x36x12x32xbf16, #tpu.memory_space<vmem>>, vector<1x1x1x11x32xbf16>
    %52 = vector.shape_cast %51 : vector<1x1x1x11x32xbf16> to vector<11x32xbf16>
    %c16_100 = arith.constant 16 : index
    %c32_101 = arith.constant 32 : index
    %53 = vector.load %arg7[%c16_100, %c32_101] : memref<128x512xbf16, #tpu.memory_space<vmem>>, vector<11x32xbf16>
    tpu.vector_store %arg7[%c16_100, %c32_101], %52 {strides = array<i32>} : memref<128x512xbf16, #tpu.memory_space<vmem>>, vector<11x32xbf16>,
    %c0_102 = arith.constant 0 : index
    %c0_103 = arith.constant 0 : index
    %c4_104 = arith.constant 4 : index
    %c1_105 = arith.constant 1 : index
    %c0_106 = arith.constant 0 : index
    %54 = vector.load %arg2[%c0_102, %c0_103, %c4_104, %c1_105, %c0_106] : memref<1x1x36x12x32xbf16, #tpu.memory_space<vmem>>, vector<1x1x1x11x32xbf16>
    %55 = vector.shape_cast %54 : vector<1x1x1x11x32xbf16> to vector<11x32xbf16>
    %c16_107 = arith.constant 16 : index
    %c64_108 = arith.constant 64 : index
    %56 = vector.load %arg7[%c16_107, %c64_108] : memref<128x512xbf16, #tpu.memory_space<vmem>>, vector<11x32xbf16>
    tpu.vector_store %arg7[%c16_107, %c64_108], %55 {strides = array<i32>} : memref<128x512xbf16, #tpu.memory_space<vmem>>, vector<11x32xbf16>,
    %c0_109 = arith.constant 0 : index
    %c0_110 = arith.constant 0 : index
    %c5_111 = arith.constant 5 : index
    %c1_112 = arith.constant 1 : index
    %c0_113 = arith.constant 0 : index
    %57 = vector.load %arg2[%c0_109, %c0_110, %c5_111, %c1_112, %c0_113] : memref<1x1x36x12x32xbf16, #tpu.memory_space<vmem>>, vector<1x1x1x11x32xbf16>
    %58 = vector.shape_cast %57 : vector<1x1x1x11x32xbf16> to vector<11x32xbf16>
    %c16_114 = arith.constant 16 : index
    %c96_115 = arith.constant 96 : index
    %59 = vector.load %arg7[%c16_114, %c96_115] : memref<128x512xbf16, #tpu.memory_space<vmem>>, vector<11x32xbf16>
    tpu.vector_store %arg7[%c16_114, %c96_115], %58 {strides = array<i32>} : memref<128x512xbf16, #tpu.memory_space<vmem>>, vector<11x32xbf16>,
    %c0_116 = arith.constant 0 : index
    %c0_117 = arith.constant 0 : index
    %c6_118 = arith.constant 6 : index
    %c0_119 = arith.constant 0 : index
    %c0_120 = arith.constant 0 : index
    %60 = vector.load %arg2[%c0_116, %c0_117, %c6_118, %c0_119, %c0_120] : memref<1x1x36x12x32xbf16, #tpu.memory_space<vmem>>, vector<1x1x1x11x32xbf16>
    %61 = vector.shape_cast %60 : vector<1x1x1x11x32xbf16> to vector<11x32xbf16>
    %c16_121 = arith.constant 16 : index
    %c128_122 = arith.constant 128 : index
    %62 = vector.load %arg7[%c16_121, %c128_122] : memref<128x512xbf16, #tpu.memory_space<vmem>>, vector<11x32xbf16>
    tpu.vector_store %arg7[%c16_121, %c128_122], %61 {strides = array<i32>} : memref<128x512xbf16, #tpu.memory_space<vmem>>, vector<11x32xbf16>,
    %c0_123 = arith.constant 0 : index
    %c0_124 = arith.constant 0 : index
    %c7_125 = arith.constant 7 : index
    %c0_126 = arith.constant 0 : index
    %c0_127 = arith.constant 0 : index
    %63 = vector.load %arg2[%c0_123, %c0_124, %c7_125, %c0_126, %c0_127] : memref<1x1x36x12x32xbf16, #tpu.memory_space<vmem>>, vector<1x1x1x11x32xbf16>
    %64 = vector.shape_cast %63 : vector<1x1x1x11x32xbf16> to vector<11x32xbf16>
    %c16_128 = arith.constant 16 : index
    %c160_129 = arith.constant 160 : index
    %65 = vector.load %arg7[%c16_128, %c160_129] : memref<128x512xbf16, #tpu.memory_space<vmem>>, vector<11x32xbf16>
    tpu.vector_store %arg7[%c16_128, %c160_129], %64 {strides = array<i32>} : memref<128x512xbf16, #tpu.memory_space<vmem>>, vector<11x32xbf16>,
    %c0_130 = arith.constant 0 : index
    %c0_131 = arith.constant 0 : index
    %c6_132 = arith.constant 6 : index
    %c1_133 = arith.constant 1 : index
    %c0_134 = arith.constant 0 : index
    %66 = vector.load %arg2[%c0_130, %c0_131, %c6_132, %c1_133, %c0_134] : memref<1x1x36x12x32xbf16, #tpu.memory_space<vmem>>, vector<1x1x1x11x32xbf16>
    %67 = vector.shape_cast %66 : vector<1x1x1x11x32xbf16> to vector<11x32xbf16>
    %c16_135 = arith.constant 16 : index
    %c192_136 = arith.constant 192 : index
    %68 = vector.load %arg7[%c16_135, %c192_136] : memref<128x512xbf16, #tpu.memory_space<vmem>>, vector<11x32xbf16>
    tpu.vector_store %arg7[%c16_135, %c192_136], %67 {strides = array<i32>} : memref<128x512xbf16, #tpu.memory_space<vmem>>, vector<11x32xbf16>,
    %c0_137 = arith.constant 0 : index
    %c0_138 = arith.constant 0 : index
    %c7_139 = arith.constant 7 : index
    %c1_140 = arith.constant 1 : index
    %c0_141 = arith.constant 0 : index
    %69 = vector.load %arg2[%c0_137, %c0_138, %c7_139, %c1_140, %c0_141] : memref<1x1x36x12x32xbf16, #tpu.memory_space<vmem>>, vector<1x1x1x11x32xbf16>
    %70 = vector.shape_cast %69 : vector<1x1x1x11x32xbf16> to vector<11x32xbf16>
    %c16_142 = arith.constant 16 : index
    %c224_143 = arith.constant 224 : index
    %71 = vector.load %arg7[%c16_142, %c224_143] : memref<128x512xbf16, #tpu.memory_space<vmem>>, vector<11x32xbf16>
    tpu.vector_store %arg7[%c16_142, %c224_143], %70 {strides = array<i32>} : memref<128x512xbf16, #tpu.memory_space<vmem>>, vector<11x32xbf16>,
    %c0_144 = arith.constant 0 : index
    %c0_145 = arith.constant 0 : index
    %c8 = arith.constant 8 : index
    %c0_146 = arith.constant 0 : index
    %c0_147 = arith.constant 0 : index
    %72 = vector.load %arg2[%c0_144, %c0_145, %c8, %c0_146, %c0_147] : memref<1x1x36x12x32xbf16, #tpu.memory_space<vmem>>, vector<1x1x1x11x32xbf16>
    %73 = vector.shape_cast %72 : vector<1x1x1x11x32xbf16> to vector<11x32xbf16>
    %c16_148 = arith.constant 16 : index
    %c256_149 = arith.constant 256 : index
    %74 = vector.load %arg7[%c16_148, %c256_149] : memref<128x512xbf16, #tpu.memory_space<vmem>>, vector<11x32xbf16>
    tpu.vector_store %arg7[%c16_148, %c256_149], %73 {strides = array<i32>} : memref<128x512xbf16, #tpu.memory_space<vmem>>, vector<11x32xbf16>,
    %c0_150 = arith.constant 0 : index
    %c0_151 = arith.constant 0 : index
    %c9 = arith.constant 9 : index
    %c0_152 = arith.constant 0 : index
    %c0_153 = arith.constant 0 : index
    %75 = vector.load %arg2[%c0_150, %c0_151, %c9, %c0_152, %c0_153] : memref<1x1x36x12x32xbf16, #tpu.memory_space<vmem>>, vector<1x1x1x11x32xbf16>
    %76 = vector.shape_cast %75 : vector<1x1x1x11x32xbf16> to vector<11x32xbf16>
    %c16_154 = arith.constant 16 : index
    %c288_155 = arith.constant 288 : index
    %77 = vector.load %arg7[%c16_154, %c288_155] : memref<128x512xbf16, #tpu.memory_space<vmem>>, vector<11x32xbf16>
    tpu.vector_store %arg7[%c16_154, %c288_155], %76 {strides = array<i32>} : memref<128x512xbf16, #tpu.memory_space<vmem>>, vector<11x32xbf16>,
    %c0_156 = arith.constant 0 : index
    %c0_157 = arith.constant 0 : index
    %c8_158 = arith.constant 8 : index
    %c1_159 = arith.constant 1 : index
    %c0_160 = arith.constant 0 : index
    %78 = vector.load %arg2[%c0_156, %c0_157, %c8_158, %c1_159, %c0_160] : memref<1x1x36x12x32xbf16, #tpu.memory_space<vmem>>, vector<1x1x1x11x32xbf16>
    %79 = vector.shape_cast %78 : vector<1x1x1x11x32xbf16> to vector<11x32xbf16>
    %c16_161 = arith.constant 16 : index
    %c320_162 = arith.constant 320 : index
    %80 = vector.load %arg7[%c16_161, %c320_162] : memref<128x512xbf16, #tpu.memory_space<vmem>>, vector<11x32xbf16>
    tpu.vector_store %arg7[%c16_161, %c320_162], %79 {strides = array<i32>} : memref<128x512xbf16, #tpu.memory_space<vmem>>, vector<11x32xbf16>,
    %c0_163 = arith.constant 0 : index
    %c0_164 = arith.constant 0 : index
    %c9_165 = arith.constant 9 : index
    %c1_166 = arith.constant 1 : index
    %c0_167 = arith.constant 0 : index
    %81 = vector.load %arg2[%c0_163, %c0_164, %c9_165, %c1_166, %c0_167] : memref<1x1x36x12x32xbf16, #tpu.memory_space<vmem>>, vector<1x1x1x11x32xbf16>
    %82 = vector.shape_cast %81 : vector<1x1x1x11x32xbf16> to vector<11x32xbf16>
    %c16_168 = arith.constant 16 : index
    %c352_169 = arith.constant 352 : index
    %83 = vector.load %arg7[%c16_168, %c352_169] : memref<128x512xbf16, #tpu.memory_space<vmem>>, vector<11x32xbf16>
    tpu.vector_store %arg7[%c16_168, %c352_169], %82 {strides = array<i32>} : memref<128x512xbf16, #tpu.memory_space<vmem>>, vector<11x32xbf16>,
    %c0_170 = arith.constant 0 : index
    %c0_171 = arith.constant 0 : index
    %c10 = arith.constant 10 : index
    %c0_172 = arith.constant 0 : index
    %c0_173 = arith.constant 0 : index
    %84 = vector.load %arg2[%c0_170, %c0_171, %c10, %c0_172, %c0_173] : memref<1x1x36x12x32xbf16, #tpu.memory_space<vmem>>, vector<1x1x1x11x32xbf16>
    %85 = vector.shape_cast %84 : vector<1x1x1x11x32xbf16> to vector<11x32xbf16>
    %c16_174 = arith.constant 16 : index
    %c384_175 = arith.constant 384 : index
    %86 = vector.load %arg7[%c16_174, %c384_175] : memref<128x512xbf16, #tpu.memory_space<vmem>>, vector<11x32xbf16>
    tpu.vector_store %arg7[%c16_174, %c384_175], %85 {strides = array<i32>} : memref<128x512xbf16, #tpu.memory_space<vmem>>, vector<11x32xbf16>,
    %c0_176 = arith.constant 0 : index
    %c0_177 = arith.constant 0 : index
    %c11 = arith.constant 11 : index
    %c0_178 = arith.constant 0 : index
    %c0_179 = arith.constant 0 : index
    %87 = vector.load %arg2[%c0_176, %c0_177, %c11, %c0_178, %c0_179] : memref<1x1x36x12x32xbf16, #tpu.memory_space<vmem>>, vector<1x1x1x11x32xbf16>
    %88 = vector.shape_cast %87 : vector<1x1x1x11x32xbf16> to vector<11x32xbf16>
    %c16_180 = arith.constant 16 : index
    %c416_181 = arith.constant 416 : index
    %89 = vector.load %arg7[%c16_180, %c416_181] : memref<128x512xbf16, #tpu.memory_space<vmem>>, vector<11x32xbf16>
    tpu.vector_store %arg7[%c16_180, %c416_181], %88 {strides = array<i32>} : memref<128x512xbf16, #tpu.memory_space<vmem>>, vector<11x32xbf16>,
    %c0_182 = arith.constant 0 : index
    %c0_183 = arith.constant 0 : index
    %c10_184 = arith.constant 10 : index
    %c1_185 = arith.constant 1 : index
    %c0_186 = arith.constant 0 : index
    %90 = vector.load %arg2[%c0_182, %c0_183, %c10_184, %c1_185, %c0_186] : memref<1x1x36x12x32xbf16, #tpu.memory_space<vmem>>, vector<1x1x1x11x32xbf16>
    %91 = vector.shape_cast %90 : vector<1x1x1x11x32xbf16> to vector<11x32xbf16>
    %c16_187 = arith.constant 16 : index
    %c448_188 = arith.constant 448 : index
    %92 = vector.load %arg7[%c16_187, %c448_188] : memref<128x512xbf16, #tpu.memory_space<vmem>>, vector<11x32xbf16>
    tpu.vector_store %arg7[%c16_187, %c448_188], %91 {strides = array<i32>} : memref<128x512xbf16, #tpu.memory_space<vmem>>, vector<11x32xbf16>,
    %c0_189 = arith.constant 0 : index
    %c0_190 = arith.constant 0 : index
    %c11_191 = arith.constant 11 : index
    %c1_192 = arith.constant 1 : index
    %c0_193 = arith.constant 0 : index
    %93 = vector.load %arg2[%c0_189, %c0_190, %c11_191, %c1_192, %c0_193] : memref<1x1x36x12x32xbf16, #tpu.memory_space<vmem>>, vector<1x1x1x11x32xbf16>
    %94 = vector.shape_cast %93 : vector<1x1x1x11x32xbf16> to vector<11x32xbf16>
    %c16_194 = arith.constant 16 : index
    %c480_195 = arith.constant 480 : index
    %95 = vector.load %arg7[%c16_194, %c480_195] : memref<128x512xbf16, #tpu.memory_space<vmem>>, vector<11x32xbf16>
    tpu.vector_store %arg7[%c16_194, %c480_195], %94 {strides = array<i32>} : memref<128x512xbf16, #tpu.memory_space<vmem>>, vector<11x32xbf16>,
    %c0_196 = arith.constant 0 : index
    %c0_197 = arith.constant 0 : index
    %c8_198 = arith.constant 8 : index
    %c0_199 = arith.constant 0 : index
    %c0_200 = arith.constant 0 : index
    %96 = vector.load %arg2[%c0_196, %c0_197, %c8_198, %c0_199, %c0_200] : memref<1x1x36x12x32xbf16, #tpu.memory_space<vmem>>, vector<1x1x1x11x32xbf16>
    %97 = vector.shape_cast %96 : vector<1x1x1x11x32xbf16> to vector<11x32xbf16>
    %c32_201 = arith.constant 32 : index
    %c0_202 = arith.constant 0 : index
    %98 = vector.load %arg7[%c32_201, %c0_202] : memref<128x512xbf16, #tpu.memory_space<vmem>>, vector<11x32xbf16>
    tpu.vector_store %arg7[%c32_201, %c0_202], %97 {strides = array<i32>} : memref<128x512xbf16, #tpu.memory_space<vmem>>, vector<11x32xbf16>,
    %c0_203 = arith.constant 0 : index
    %c0_204 = arith.constant 0 : index
    %c9_205 = arith.constant 9 : index
    %c0_206 = arith.constant 0 : index
    %c0_207 = arith.constant 0 : index
    %99 = vector.load %arg2[%c0_203, %c0_204, %c9_205, %c0_206, %c0_207] : memref<1x1x36x12x32xbf16, #tpu.memory_space<vmem>>, vector<1x1x1x11x32xbf16>
    %100 = vector.shape_cast %99 : vector<1x1x1x11x32xbf16> to vector<11x32xbf16>
    %c32_208 = arith.constant 32 : index
    %c32_209 = arith.constant 32 : index
    %101 = vector.load %arg7[%c32_208, %c32_209] : memref<128x512xbf16, #tpu.memory_space<vmem>>, vector<11x32xbf16>
    tpu.vector_store %arg7[%c32_208, %c32_209], %100 {strides = array<i32>} : memref<128x512xbf16, #tpu.memory_space<vmem>>, vector<11x32xbf16>,
    %c0_210 = arith.constant 0 : index
    %c0_211 = arith.constant 0 : index
    %c8_212 = arith.constant 8 : index
    %c1_213 = arith.constant 1 : index
    %c0_214 = arith.constant 0 : index
    %102 = vector.load %arg2[%c0_210, %c0_211, %c8_212, %c1_213, %c0_214] : memref<1x1x36x12x32xbf16, #tpu.memory_space<vmem>>, vector<1x1x1x11x32xbf16>
    %103 = vector.shape_cast %102 : vector<1x1x1x11x32xbf16> to vector<11x32xbf16>
    %c32_215 = arith.constant 32 : index
    %c64_216 = arith.constant 64 : index
    %104 = vector.load %arg7[%c32_215, %c64_216] : memref<128x512xbf16, #tpu.memory_space<vmem>>, vector<11x32xbf16>
    tpu.vector_store %arg7[%c32_215, %c64_216], %103 {strides = array<i32>} : memref<128x512xbf16, #tpu.memory_space<vmem>>, vector<11x32xbf16>,
    %c0_217 = arith.constant 0 : index
    %c0_218 = arith.constant 0 : index
    %c9_219 = arith.constant 9 : index
    %c1_220 = arith.constant 1 : index
    %c0_221 = arith.constant 0 : index
    %105 = vector.load %arg2[%c0_217, %c0_218, %c9_219, %c1_220, %c0_221] : memref<1x1x36x12x32xbf16, #tpu.memory_space<vmem>>, vector<1x1x1x11x32xbf16>
    %106 = vector.shape_cast %105 : vector<1x1x1x11x32xbf16> to vector<11x32xbf16>
    %c32_222 = arith.constant 32 : index
    %c96_223 = arith.constant 96 : index
    %107 = vector.load %arg7[%c32_222, %c96_223] : memref<128x512xbf16, #tpu.memory_space<vmem>>, vector<11x32xbf16>
    tpu.vector_store %arg7[%c32_222, %c96_223], %106 {strides = array<i32>} : memref<128x512xbf16, #tpu.memory_space<vmem>>, vector<11x32xbf16>,
    %c0_224 = arith.constant 0 : index
    %c0_225 = arith.constant 0 : index
    %c10_226 = arith.constant 10 : index
    %c0_227 = arith.constant 0 : index
    %c0_228 = arith.constant 0 : index
    %108 = vector.load %arg2[%c0_224, %c0_225, %c10_226, %c0_227, %c0_228] : memref<1x1x36x12x32xbf16, #tpu.memory_space<vmem>>, vector<1x1x1x11x32xbf16>
    %109 = vector.shape_cast %108 : vector<1x1x1x11x32xbf16> to vector<11x32xbf16>
    %c32_229 = arith.constant 32 : index
    %c128_230 = arith.constant 128 : index
    %110 = vector.load %arg7[%c32_229, %c128_230] : memref<128x512xbf16, #tpu.memory_space<vmem>>, vector<11x32xbf16>
    tpu.vector_store %arg7[%c32_229, %c128_230], %109 {strides = array<i32>} : memref<128x512xbf16, #tpu.memory_space<vmem>>, vector<11x32xbf16>,
    %c0_231 = arith.constant 0 : index
    %c0_232 = arith.constant 0 : index
    %c11_233 = arith.constant 11 : index
    %c0_234 = arith.constant 0 : index
    %c0_235 = arith.constant 0 : index
    %111 = vector.load %arg2[%c0_231, %c0_232, %c11_233, %c0_234, %c0_235] : memref<1x1x36x12x32xbf16, #tpu.memory_space<vmem>>, vector<1x1x1x11x32xbf16>
    %112 = vector.shape_cast %111 : vector<1x1x1x11x32xbf16> to vector<11x32xbf16>
    %c32_236 = arith.constant 32 : index
    %c160_237 = arith.constant 160 : index
    %113 = vector.load %arg7[%c32_236, %c160_237] : memref<128x512xbf16, #tpu.memory_space<vmem>>, vector<11x32xbf16>
    tpu.vector_store %arg7[%c32_236, %c160_237], %112 {strides = array<i32>} : memref<128x512xbf16, #tpu.memory_space<vmem>>, vector<11x32xbf16>,
    %c0_238 = arith.constant 0 : index
    %c0_239 = arith.constant 0 : index
    %c10_240 = arith.constant 10 : index
    %c1_241 = arith.constant 1 : index
    %c0_242 = arith.constant 0 : index
    %114 = vector.load %arg2[%c0_238, %c0_239, %c10_240, %c1_241, %c0_242] : memref<1x1x36x12x32xbf16, #tpu.memory_space<vmem>>, vector<1x1x1x11x32xbf16>
    %115 = vector.shape_cast %114 : vector<1x1x1x11x32xbf16> to vector<11x32xbf16>
    %c32_243 = arith.constant 32 : index
    %c192_244 = arith.constant 192 : index
    %116 = vector.load %arg7[%c32_243, %c192_244] : memref<128x512xbf16, #tpu.memory_space<vmem>>, vector<11x32xbf16>
    tpu.vector_store %arg7[%c32_243, %c192_244], %115 {strides = array<i32>} : memref<128x512xbf16, #tpu.memory_space<vmem>>, vector<11x32xbf16>,
    %c0_245 = arith.constant 0 : index
    %c0_246 = arith.constant 0 : index
    %c11_247 = arith.constant 11 : index
    %c1_248 = arith.constant 1 : index
    %c0_249 = arith.constant 0 : index
    %117 = vector.load %arg2[%c0_245, %c0_246, %c11_247, %c1_248, %c0_249] : memref<1x1x36x12x32xbf16, #tpu.memory_space<vmem>>, vector<1x1x1x11x32xbf16>
    %118 = vector.shape_cast %117 : vector<1x1x1x11x32xbf16> to vector<11x32xbf16>
    %c32_250 = arith.constant 32 : index
    %c224_251 = arith.constant 224 : index
    %119 = vector.load %arg7[%c32_250, %c224_251] : memref<128x512xbf16, #tpu.memory_space<vmem>>, vector<11x32xbf16>
    tpu.vector_store %arg7[%c32_250, %c224_251], %118 {strides = array<i32>} : memref<128x512xbf16, #tpu.memory_space<vmem>>, vector<11x32xbf16>,
    %c0_252 = arith.constant 0 : index
    %c0_253 = arith.constant 0 : index
    %c12 = arith.constant 12 : index
    %c0_254 = arith.constant 0 : index
    %c0_255 = arith.constant 0 : index
    %120 = vector.load %arg2[%c0_252, %c0_253, %c12, %c0_254, %c0_255] : memref<1x1x36x12x32xbf16, #tpu.memory_space<vmem>>, vector<1x1x1x11x32xbf16>
    %121 = vector.shape_cast %120 : vector<1x1x1x11x32xbf16> to vector<11x32xbf16>
    %c32_256 = arith.constant 32 : index
    %c256_257 = arith.constant 256 : index
    %122 = vector.load %arg7[%c32_256, %c256_257] : memref<128x512xbf16, #tpu.memory_space<vmem>>, vector<11x32xbf16>
    tpu.vector_store %arg7[%c32_256, %c256_257], %121 {strides = array<i32>} : memref<128x512xbf16, #tpu.memory_space<vmem>>, vector<11x32xbf16>,
    %c0_258 = arith.constant 0 : index
    %c0_259 = arith.constant 0 : index
    %c13 = arith.constant 13 : index
    %c0_260 = arith.constant 0 : index
    %c0_261 = arith.constant 0 : index
    %123 = vector.load %arg2[%c0_258, %c0_259, %c13, %c0_260, %c0_261] : memref<1x1x36x12x32xbf16, #tpu.memory_space<vmem>>, vector<1x1x1x11x32xbf16>
    %124 = vector.shape_cast %123 : vector<1x1x1x11x32xbf16> to vector<11x32xbf16>
    %c32_262 = arith.constant 32 : index
    %c288_263 = arith.constant 288 : index
    %125 = vector.load %arg7[%c32_262, %c288_263] : memref<128x512xbf16, #tpu.memory_space<vmem>>, vector<11x32xbf16>
    tpu.vector_store %arg7[%c32_262, %c288_263], %124 {strides = array<i32>} : memref<128x512xbf16, #tpu.memory_space<vmem>>, vector<11x32xbf16>,
    %c0_264 = arith.constant 0 : index
    %c0_265 = arith.constant 0 : index
    %c12_266 = arith.constant 12 : index
    %c1_267 = arith.constant 1 : index
    %c0_268 = arith.constant 0 : index
    %126 = vector.load %arg2[%c0_264, %c0_265, %c12_266, %c1_267, %c0_268] : memref<1x1x36x12x32xbf16, #tpu.memory_space<vmem>>, vector<1x1x1x11x32xbf16>
    %127 = vector.shape_cast %126 : vector<1x1x1x11x32xbf16> to vector<11x32xbf16>
    %c32_269 = arith.constant 32 : index
    %c320_270 = arith.constant 320 : index
    %128 = vector.load %arg7[%c32_269, %c320_270] : memref<128x512xbf16, #tpu.memory_space<vmem>>, vector<11x32xbf16>
    tpu.vector_store %arg7[%c32_269, %c320_270], %127 {strides = array<i32>} : memref<128x512xbf16, #tpu.memory_space<vmem>>, vector<11x32xbf16>,
    %c0_271 = arith.constant 0 : index
    %c0_272 = arith.constant 0 : index
    %c13_273 = arith.constant 13 : index
    %c1_274 = arith.constant 1 : index
    %c0_275 = arith.constant 0 : index
    %129 = vector.load %arg2[%c0_271, %c0_272, %c13_273, %c1_274, %c0_275] : memref<1x1x36x12x32xbf16, #tpu.memory_space<vmem>>, vector<1x1x1x11x32xbf16>
    %130 = vector.shape_cast %129 : vector<1x1x1x11x32xbf16> to vector<11x32xbf16>
    %c32_276 = arith.constant 32 : index
    %c352_277 = arith.constant 352 : index
    %131 = vector.load %arg7[%c32_276, %c352_277] : memref<128x512xbf16, #tpu.memory_space<vmem>>, vector<11x32xbf16>
    tpu.vector_store %arg7[%c32_276, %c352_277], %130 {strides = array<i32>} : memref<128x512xbf16, #tpu.memory_space<vmem>>, vector<11x32xbf16>,
    %c0_278 = arith.constant 0 : index
    %c0_279 = arith.constant 0 : index
    %c14 = arith.constant 14 : index
    %c0_280 = arith.constant 0 : index
    %c0_281 = arith.constant 0 : index
    %132 = vector.load %arg2[%c0_278, %c0_279, %c14, %c0_280, %c0_281] : memref<1x1x36x12x32xbf16, #tpu.memory_space<vmem>>, vector<1x1x1x11x32xbf16>
    %133 = vector.shape_cast %132 : vector<1x1x1x11x32xbf16> to vector<11x32xbf16>
    %c32_282 = arith.constant 32 : index
    %c384_283 = arith.constant 384 : index
    %134 = vector.load %arg7[%c32_282, %c384_283] : memref<128x512xbf16, #tpu.memory_space<vmem>>, vector<11x32xbf16>
    tpu.vector_store %arg7[%c32_282, %c384_283], %133 {strides = array<i32>} : memref<128x512xbf16, #tpu.memory_space<vmem>>, vector<11x32xbf16>,
    %c0_284 = arith.constant 0 : index
    %c0_285 = arith.constant 0 : index
    %c15 = arith.constant 15 : index
    %c0_286 = arith.constant 0 : index
    %c0_287 = arith.constant 0 : index
    %135 = vector.load %arg2[%c0_284, %c0_285, %c15, %c0_286, %c0_287] : memref<1x1x36x12x32xbf16, #tpu.memory_space<vmem>>, vector<1x1x1x11x32xbf16>
    %136 = vector.shape_cast %135 : vector<1x1x1x11x32xbf16> to vector<11x32xbf16>
    %c32_288 = arith.constant 32 : index
    %c416_289 = arith.constant 416 : index
    %137 = vector.load %arg7[%c32_288, %c416_289] : memref<128x512xbf16, #tpu.memory_space<vmem>>, vector<11x32xbf16>
    tpu.vector_store %arg7[%c32_288, %c416_289], %136 {strides = array<i32>} : memref<128x512xbf16, #tpu.memory_space<vmem>>, vector<11x32xbf16>,
    %c0_290 = arith.constant 0 : index
    %c0_291 = arith.constant 0 : index
    %c14_292 = arith.constant 14 : index
    %c1_293 = arith.constant 1 : index
    %c0_294 = arith.constant 0 : index
    %138 = vector.load %arg2[%c0_290, %c0_291, %c14_292, %c1_293, %c0_294] : memref<1x1x36x12x32xbf16, #tpu.memory_space<vmem>>, vector<1x1x1x11x32xbf16>
    %139 = vector.shape_cast %138 : vector<1x1x1x11x32xbf16> to vector<11x32xbf16>
    %c32_295 = arith.constant 32 : index
    %c448_296 = arith.constant 448 : index
    %140 = vector.load %arg7[%c32_295, %c448_296] : memref<128x512xbf16, #tpu.memory_space<vmem>>, vector<11x32xbf16>
    tpu.vector_store %arg7[%c32_295, %c448_296], %139 {strides = array<i32>} : memref<128x512xbf16, #tpu.memory_space<vmem>>, vector<11x32xbf16>,
    %c0_297 = arith.constant 0 : index
    %c0_298 = arith.constant 0 : index
    %c15_299 = arith.constant 15 : index
    %c1_300 = arith.constant 1 : index
    %c0_301 = arith.constant 0 : index
    %141 = vector.load %arg2[%c0_297, %c0_298, %c15_299, %c1_300, %c0_301] : memref<1x1x36x12x32xbf16, #tpu.memory_space<vmem>>, vector<1x1x1x11x32xbf16>
    %142 = vector.shape_cast %141 : vector<1x1x1x11x32xbf16> to vector<11x32xbf16>
    %c32_302 = arith.constant 32 : index
    %c480_303 = arith.constant 480 : index
    %143 = vector.load %arg7[%c32_302, %c480_303] : memref<128x512xbf16, #tpu.memory_space<vmem>>, vector<11x32xbf16>
    tpu.vector_store %arg7[%c32_302, %c480_303], %142 {strides = array<i32>} : memref<128x512xbf16, #tpu.memory_space<vmem>>, vector<11x32xbf16>,
    %c0_304 = arith.constant 0 : index
    %c0_305 = arith.constant 0 : index
    %c12_306 = arith.constant 12 : index
    %c0_307 = arith.constant 0 : index
    %c0_308 = arith.constant 0 : index
    %144 = vector.load %arg2[%c0_304, %c0_305, %c12_306, %c0_307, %c0_308] : memref<1x1x36x12x32xbf16, #tpu.memory_space<vmem>>, vector<1x1x1x11x32xbf16>
    %145 = vector.shape_cast %144 : vector<1x1x1x11x32xbf16> to vector<11x32xbf16>
    %c48 = arith.constant 48 : index
    %c0_309 = arith.constant 0 : index
    %146 = vector.load %arg7[%c48, %c0_309] : memref<128x512xbf16, #tpu.memory_space<vmem>>, vector<11x32xbf16>
    tpu.vector_store %arg7[%c48, %c0_309], %145 {strides = array<i32>} : memref<128x512xbf16, #tpu.memory_space<vmem>>, vector<11x32xbf16>,
    %c0_310 = arith.constant 0 : index
    %c0_311 = arith.constant 0 : index
    %c13_312 = arith.constant 13 : index
    %c0_313 = arith.constant 0 : index
    %c0_314 = arith.constant 0 : index
    %147 = vector.load %arg2[%c0_310, %c0_311, %c13_312, %c0_313, %c0_314] : memref<1x1x36x12x32xbf16, #tpu.memory_space<vmem>>, vector<1x1x1x11x32xbf16>
    %148 = vector.shape_cast %147 : vector<1x1x1x11x32xbf16> to vector<11x32xbf16>
    %c48_315 = arith.constant 48 : index
    %c32_316 = arith.constant 32 : index
    %149 = vector.load %arg7[%c48_315, %c32_316] : memref<128x512xbf16, #tpu.memory_space<vmem>>, vector<11x32xbf16>
    tpu.vector_store %arg7[%c48_315, %c32_316], %148 {strides = array<i32>} : memref<128x512xbf16, #tpu.memory_space<vmem>>, vector<11x32xbf16>,
    %c0_317 = arith.constant 0 : index
    %c0_318 = arith.constant 0 : index
    %c12_319 = arith.constant 12 : index
    %c1_320 = arith.constant 1 : index
    %c0_321 = arith.constant 0 : index
    %150 = vector.load %arg2[%c0_317, %c0_318, %c12_319, %c1_320, %c0_321] : memref<1x1x36x12x32xbf16, #tpu.memory_space<vmem>>, vector<1x1x1x11x32xbf16>
    %151 = vector.shape_cast %150 : vector<1x1x1x11x32xbf16> to vector<11x32xbf16>
    %c48_322 = arith.constant 48 : index
    %c64_323 = arith.constant 64 : index
    %152 = vector.load %arg7[%c48_322, %c64_323] : memref<128x512xbf16, #tpu.memory_space<vmem>>, vector<11x32xbf16>
    tpu.vector_store %arg7[%c48_322, %c64_323], %151 {strides = array<i32>} : memref<128x512xbf16, #tpu.memory_space<vmem>>, vector<11x32xbf16>,
    %c0_324 = arith.constant 0 : index
    %c0_325 = arith.constant 0 : index
    %c13_326 = arith.constant 13 : index
    %c1_327 = arith.constant 1 : index
    %c0_328 = arith.constant 0 : index
    %153 = vector.load %arg2[%c0_324, %c0_325, %c13_326, %c1_327, %c0_328] : memref<1x1x36x12x32xbf16, #tpu.memory_space<vmem>>, vector<1x1x1x11x32xbf16>
    %154 = vector.shape_cast %153 : vector<1x1x1x11x32xbf16> to vector<11x32xbf16>
    %c48_329 = arith.constant 48 : index
    %c96_330 = arith.constant 96 : index
    %155 = vector.load %arg7[%c48_329, %c96_330] : memref<128x512xbf16, #tpu.memory_space<vmem>>, vector<11x32xbf16>
    tpu.vector_store %arg7[%c48_329, %c96_330], %154 {strides = array<i32>} : memref<128x512xbf16, #tpu.memory_space<vmem>>, vector<11x32xbf16>,
    %c0_331 = arith.constant 0 : index
    %c0_332 = arith.constant 0 : index
    %c14_333 = arith.constant 14 : index
    %c0_334 = arith.constant 0 : index
    %c0_335 = arith.constant 0 : index
    %156 = vector.load %arg2[%c0_331, %c0_332, %c14_333, %c0_334, %c0_335] : memref<1x1x36x12x32xbf16, #tpu.memory_space<vmem>>, vector<1x1x1x11x32xbf16>
    %157 = vector.shape_cast %156 : vector<1x1x1x11x32xbf16> to vector<11x32xbf16>
    %c48_336 = arith.constant 48 : index
    %c128_337 = arith.constant 128 : index
    %158 = vector.load %arg7[%c48_336, %c128_337] : memref<128x512xbf16, #tpu.memory_space<vmem>>, vector<11x32xbf16>
    tpu.vector_store %arg7[%c48_336, %c128_337], %157 {strides = array<i32>} : memref<128x512xbf16, #tpu.memory_space<vmem>>, vector<11x32xbf16>,
    %c0_338 = arith.constant 0 : index
    %c0_339 = arith.constant 0 : index
    %c15_340 = arith.constant 15 : index
    %c0_341 = arith.constant 0 : index
    %c0_342 = arith.constant 0 : index
    %159 = vector.load %arg2[%c0_338, %c0_339, %c15_340, %c0_341, %c0_342] : memref<1x1x36x12x32xbf16, #tpu.memory_space<vmem>>, vector<1x1x1x11x32xbf16>
    %160 = vector.shape_cast %159 : vector<1x1x1x11x32xbf16> to vector<11x32xbf16>
    %c48_343 = arith.constant 48 : index
    %c160_344 = arith.constant 160 : index
    %161 = vector.load %arg7[%c48_343, %c160_344] : memref<128x512xbf16, #tpu.memory_space<vmem>>, vector<11x32xbf16>
    tpu.vector_store %arg7[%c48_343, %c160_344], %160 {strides = array<i32>} : memref<128x512xbf16, #tpu.memory_space<vmem>>, vector<11x32xbf16>,
    %c0_345 = arith.constant 0 : index
    %c0_346 = arith.constant 0 : index
    %c14_347 = arith.constant 14 : index
    %c1_348 = arith.constant 1 : index
    %c0_349 = arith.constant 0 : index
    %162 = vector.load %arg2[%c0_345, %c0_346, %c14_347, %c1_348, %c0_349] : memref<1x1x36x12x32xbf16, #tpu.memory_space<vmem>>, vector<1x1x1x11x32xbf16>
    %163 = vector.shape_cast %162 : vector<1x1x1x11x32xbf16> to vector<11x32xbf16>
    %c48_350 = arith.constant 48 : index
    %c192_351 = arith.constant 192 : index
    %164 = vector.load %arg7[%c48_350, %c192_351] : memref<128x512xbf16, #tpu.memory_space<vmem>>, vector<11x32xbf16>
    tpu.vector_store %arg7[%c48_350, %c192_351], %163 {strides = array<i32>} : memref<128x512xbf16, #tpu.memory_space<vmem>>, vector<11x32xbf16>,
    %c0_352 = arith.constant 0 : index
    %c0_353 = arith.constant 0 : index
    %c15_354 = arith.constant 15 : index
    %c1_355 = arith.constant 1 : index
    %c0_356 = arith.constant 0 : index
    %165 = vector.load %arg2[%c0_352, %c0_353, %c15_354, %c1_355, %c0_356] : memref<1x1x36x12x32xbf16, #tpu.memory_space<vmem>>, vector<1x1x1x11x32xbf16>
    %166 = vector.shape_cast %165 : vector<1x1x1x11x32xbf16> to vector<11x32xbf16>
    %c48_357 = arith.constant 48 : index
    %c224_358 = arith.constant 224 : index
    %167 = vector.load %arg7[%c48_357, %c224_358] : memref<128x512xbf16, #tpu.memory_space<vmem>>, vector<11x32xbf16>
    tpu.vector_store %arg7[%c48_357, %c224_358], %166 {strides = array<i32>} : memref<128x512xbf16, #tpu.memory_space<vmem>>, vector<11x32xbf16>,
    %c0_359 = arith.constant 0 : index
    %c0_360 = arith.constant 0 : index
    %c16_361 = arith.constant 16 : index
    %c0_362 = arith.constant 0 : index
    %c0_363 = arith.constant 0 : index
    %168 = vector.load %arg2[%c0_359, %c0_360, %c16_361, %c0_362, %c0_363] : memref<1x1x36x12x32xbf16, #tpu.memory_space<vmem>>, vector<1x1x1x11x32xbf16>
    %169 = vector.shape_cast %168 : vector<1x1x1x11x32xbf16> to vector<11x32xbf16>
    %c48_364 = arith.constant 48 : index
    %c256_365 = arith.constant 256 : index
    %170 = vector.load %arg7[%c48_364, %c256_365] : memref<128x512xbf16, #tpu.memory_space<vmem>>, vector<11x32xbf16>
    tpu.vector_store %arg7[%c48_364, %c256_365], %169 {strides = array<i32>} : memref<128x512xbf16, #tpu.memory_space<vmem>>, vector<11x32xbf16>,
    %c0_366 = arith.constant 0 : index
    %c0_367 = arith.constant 0 : index
    %c17 = arith.constant 17 : index
    %c0_368 = arith.constant 0 : index
    %c0_369 = arith.constant 0 : index
    %171 = vector.load %arg2[%c0_366, %c0_367, %c17, %c0_368, %c0_369] : memref<1x1x36x12x32xbf16, #tpu.memory_space<vmem>>, vector<1x1x1x11x32xbf16>
    %172 = vector.shape_cast %171 : vector<1x1x1x11x32xbf16> to vector<11x32xbf16>
    %c48_370 = arith.constant 48 : index
    %c288_371 = arith.constant 288 : index
    %173 = vector.load %arg7[%c48_370, %c288_371] : memref<128x512xbf16, #tpu.memory_space<vmem>>, vector<11x32xbf16>
    tpu.vector_store %arg7[%c48_370, %c288_371], %172 {strides = array<i32>} : memref<128x512xbf16, #tpu.memory_space<vmem>>, vector<11x32xbf16>,
    %c0_372 = arith.constant 0 : index
    %c0_373 = arith.constant 0 : index
    %c16_374 = arith.constant 16 : index
    %c1_375 = arith.constant 1 : index
    %c0_376 = arith.constant 0 : index
    %174 = vector.load %arg2[%c0_372, %c0_373, %c16_374, %c1_375, %c0_376] : memref<1x1x36x12x32xbf16, #tpu.memory_space<vmem>>, vector<1x1x1x11x32xbf16>
    %175 = vector.shape_cast %174 : vector<1x1x1x11x32xbf16> to vector<11x32xbf16>
    %c48_377 = arith.constant 48 : index
    %c320_378 = arith.constant 320 : index
    %176 = vector.load %arg7[%c48_377, %c320_378] : memref<128x512xbf16, #tpu.memory_space<vmem>>, vector<11x32xbf16>
    tpu.vector_store %arg7[%c48_377, %c320_378], %175 {strides = array<i32>} : memref<128x512xbf16, #tpu.memory_space<vmem>>, vector<11x32xbf16>,
    %c0_379 = arith.constant 0 : index
    %c0_380 = arith.constant 0 : index
    %c17_381 = arith.constant 17 : index
    %c1_382 = arith.constant 1 : index
    %c0_383 = arith.constant 0 : index
    %177 = vector.load %arg2[%c0_379, %c0_380, %c17_381, %c1_382, %c0_383] : memref<1x1x36x12x32xbf16, #tpu.memory_space<vmem>>, vector<1x1x1x11x32xbf16>
    %178 = vector.shape_cast %177 : vector<1x1x1x11x32xbf16> to vector<11x32xbf16>
    %c48_384 = arith.constant 48 : index
    %c352_385 = arith.constant 352 : index
    %179 = vector.load %arg7[%c48_384, %c352_385] : memref<128x512xbf16, #tpu.memory_space<vmem>>, vector<11x32xbf16>
    tpu.vector_store %arg7[%c48_384, %c352_385], %178 {strides = array<i32>} : memref<128x512xbf16, #tpu.memory_space<vmem>>, vector<11x32xbf16>,
    %c0_386 = arith.constant 0 : index
    %c0_387 = arith.constant 0 : index
    %c18 = arith.constant 18 : index
    %c0_388 = arith.constant 0 : index
    %c0_389 = arith.constant 0 : index
    %180 = vector.load %arg2[%c0_386, %c0_387, %c18, %c0_388, %c0_389] : memref<1x1x36x12x32xbf16, #tpu.memory_space<vmem>>, vector<1x1x1x11x32xbf16>
    %181 = vector.shape_cast %180 : vector<1x1x1x11x32xbf16> to vector<11x32xbf16>
    %c48_390 = arith.constant 48 : index
    %c384_391 = arith.constant 384 : index
    %182 = vector.load %arg7[%c48_390, %c384_391] : memref<128x512xbf16, #tpu.memory_space<vmem>>, vector<11x32xbf16>
    tpu.vector_store %arg7[%c48_390, %c384_391], %181 {strides = array<i32>} : memref<128x512xbf16, #tpu.memory_space<vmem>>, vector<11x32xbf16>,
    %c0_392 = arith.constant 0 : index
    %c0_393 = arith.constant 0 : index
    %c19 = arith.constant 19 : index
    %c0_394 = arith.constant 0 : index
    %c0_395 = arith.constant 0 : index
    %183 = vector.load %arg2[%c0_392, %c0_393, %c19, %c0_394, %c0_395] : memref<1x1x36x12x32xbf16, #tpu.memory_space<vmem>>, vector<1x1x1x11x32xbf16>
    %184 = vector.shape_cast %183 : vector<1x1x1x11x32xbf16> to vector<11x32xbf16>
    %c48_396 = arith.constant 48 : index
    %c416_397 = arith.constant 416 : index
    %185 = vector.load %arg7[%c48_396, %c416_397] : memref<128x512xbf16, #tpu.memory_space<vmem>>, vector<11x32xbf16>
    tpu.vector_store %arg7[%c48_396, %c416_397], %184 {strides = array<i32>} : memref<128x512xbf16, #tpu.memory_space<vmem>>, vector<11x32xbf16>,
    %c0_398 = arith.constant 0 : index
    %c0_399 = arith.constant 0 : index
    %c18_400 = arith.constant 18 : index
    %c1_401 = arith.constant 1 : index
    %c0_402 = arith.constant 0 : index
    %186 = vector.load %arg2[%c0_398, %c0_399, %c18_400, %c1_401, %c0_402] : memref<1x1x36x12x32xbf16, #tpu.memory_space<vmem>>, vector<1x1x1x11x32xbf16>
    %187 = vector.shape_cast %186 : vector<1x1x1x11x32xbf16> to vector<11x32xbf16>
    %c48_403 = arith.constant 48 : index
    %c448_404 = arith.constant 448 : index
    %188 = vector.load %arg7[%c48_403, %c448_404] : memref<128x512xbf16, #tpu.memory_space<vmem>>, vector<11x32xbf16>
    tpu.vector_store %arg7[%c48_403, %c448_404], %187 {strides = array<i32>} : memref<128x512xbf16, #tpu.memory_space<vmem>>, vector<11x32xbf16>,
    %c0_405 = arith.constant 0 : index
    %c0_406 = arith.constant 0 : index
    %c19_407 = arith.constant 19 : index
    %c1_408 = arith.constant 1 : index
    %c0_409 = arith.constant 0 : index
    %189 = vector.load %arg2[%c0_405, %c0_406, %c19_407, %c1_408, %c0_409] : memref<1x1x36x12x32xbf16, #tpu.memory_space<vmem>>, vector<1x1x1x11x32xbf16>
    %190 = vector.shape_cast %189 : vector<1x1x1x11x32xbf16> to vector<11x32xbf16>
    %c48_410 = arith.constant 48 : index
    %c480_411 = arith.constant 480 : index
    %191 = vector.load %arg7[%c48_410, %c480_411] : memref<128x512xbf16, #tpu.memory_space<vmem>>, vector<11x32xbf16>
    tpu.vector_store %arg7[%c48_410, %c480_411], %190 {strides = array<i32>} : memref<128x512xbf16, #tpu.memory_space<vmem>>, vector<11x32xbf16>,
    %c0_412 = arith.constant 0 : index
    %c0_413 = arith.constant 0 : index
    %c16_414 = arith.constant 16 : index
    %c0_415 = arith.constant 0 : index
    %c0_416 = arith.constant 0 : index
    %192 = vector.load %arg2[%c0_412, %c0_413, %c16_414, %c0_415, %c0_416] : memref<1x1x36x12x32xbf16, #tpu.memory_space<vmem>>, vector<1x1x1x11x32xbf16>
    %193 = vector.shape_cast %192 : vector<1x1x1x11x32xbf16> to vector<11x32xbf16>
    %c64_417 = arith.constant 64 : index
    %c0_418 = arith.constant 0 : index
    %194 = vector.load %arg7[%c64_417, %c0_418] : memref<128x512xbf16, #tpu.memory_space<vmem>>, vector<11x32xbf16>
    tpu.vector_store %arg7[%c64_417, %c0_418], %193 {strides = array<i32>} : memref<128x512xbf16, #tpu.memory_space<vmem>>, vector<11x32xbf16>,
    %c0_419 = arith.constant 0 : index
    %c0_420 = arith.constant 0 : index
    %c17_421 = arith.constant 17 : index
    %c0_422 = arith.constant 0 : index
    %c0_423 = arith.constant 0 : index
    %195 = vector.load %arg2[%c0_419, %c0_420, %c17_421, %c0_422, %c0_423] : memref<1x1x36x12x32xbf16, #tpu.memory_space<vmem>>, vector<1x1x1x11x32xbf16>
    %196 = vector.shape_cast %195 : vector<1x1x1x11x32xbf16> to vector<11x32xbf16>
    %c64_424 = arith.constant 64 : index
    %c32_425 = arith.constant 32 : index
    %197 = vector.load %arg7[%c64_424, %c32_425] : memref<128x512xbf16, #tpu.memory_space<vmem>>, vector<11x32xbf16>
    tpu.vector_store %arg7[%c64_424, %c32_425], %196 {strides = array<i32>} : memref<128x512xbf16, #tpu.memory_space<vmem>>, vector<11x32xbf16>,
    %c0_426 = arith.constant 0 : index
    %c0_427 = arith.constant 0 : index
    %c16_428 = arith.constant 16 : index
    %c1_429 = arith.constant 1 : index
    %c0_430 = arith.constant 0 : index
    %198 = vector.load %arg2[%c0_426, %c0_427, %c16_428, %c1_429, %c0_430] : memref<1x1x36x12x32xbf16, #tpu.memory_space<vmem>>, vector<1x1x1x11x32xbf16>
    %199 = vector.shape_cast %198 : vector<1x1x1x11x32xbf16> to vector<11x32xbf16>
    %c64_431 = arith.constant 64 : index
    %c64_432 = arith.constant 64 : index
    %200 = vector.load %arg7[%c64_431, %c64_432] : memref<128x512xbf16, #tpu.memory_space<vmem>>, vector<11x32xbf16>
    tpu.vector_store %arg7[%c64_431, %c64_432], %199 {strides = array<i32>} : memref<128x512xbf16, #tpu.memory_space<vmem>>, vector<11x32xbf16>,
    %c0_433 = arith.constant 0 : index
    %c0_434 = arith.constant 0 : index
    %c17_435 = arith.constant 17 : index
    %c1_436 = arith.constant 1 : index
    %c0_437 = arith.constant 0 : index
    %201 = vector.load %arg2[%c0_433, %c0_434, %c17_435, %c1_436, %c0_437] : memref<1x1x36x12x32xbf16, #tpu.memory_space<vmem>>, vector<1x1x1x11x32xbf16>
    %202 = vector.shape_cast %201 : vector<1x1x1x11x32xbf16> to vector<11x32xbf16>
    %c64_438 = arith.constant 64 : index
    %c96_439 = arith.constant 96 : index
    %203 = vector.load %arg7[%c64_438, %c96_439] : memref<128x512xbf16, #tpu.memory_space<vmem>>, vector<11x32xbf16>
    tpu.vector_store %arg7[%c64_438, %c96_439], %202 {strides = array<i32>} : memref<128x512xbf16, #tpu.memory_space<vmem>>, vector<11x32xbf16>,
    %c0_440 = arith.constant 0 : index
    %c0_441 = arith.constant 0 : index
    %c18_442 = arith.constant 18 : index
    %c0_443 = arith.constant 0 : index
    %c0_444 = arith.constant 0 : index
    %204 = vector.load %arg2[%c0_440, %c0_441, %c18_442, %c0_443, %c0_444] : memref<1x1x36x12x32xbf16, #tpu.memory_space<vmem>>, vector<1x1x1x11x32xbf16>
    %205 = vector.shape_cast %204 : vector<1x1x1x11x32xbf16> to vector<11x32xbf16>
    %c64_445 = arith.constant 64 : index
    %c128_446 = arith.constant 128 : index
    %206 = vector.load %arg7[%c64_445, %c128_446] : memref<128x512xbf16, #tpu.memory_space<vmem>>, vector<11x32xbf16>
    tpu.vector_store %arg7[%c64_445, %c128_446], %205 {strides = array<i32>} : memref<128x512xbf16, #tpu.memory_space<vmem>>, vector<11x32xbf16>,
    %c0_447 = arith.constant 0 : index
    %c0_448 = arith.constant 0 : index
    %c19_449 = arith.constant 19 : index
    %c0_450 = arith.constant 0 : index
    %c0_451 = arith.constant 0 : index
    %207 = vector.load %arg2[%c0_447, %c0_448, %c19_449, %c0_450, %c0_451] : memref<1x1x36x12x32xbf16, #tpu.memory_space<vmem>>, vector<1x1x1x11x32xbf16>
    %208 = vector.shape_cast %207 : vector<1x1x1x11x32xbf16> to vector<11x32xbf16>
    %c64_452 = arith.constant 64 : index
    %c160_453 = arith.constant 160 : index
    %209 = vector.load %arg7[%c64_452, %c160_453] : memref<128x512xbf16, #tpu.memory_space<vmem>>, vector<11x32xbf16>
    tpu.vector_store %arg7[%c64_452, %c160_453], %208 {strides = array<i32>} : memref<128x512xbf16, #tpu.memory_space<vmem>>, vector<11x32xbf16>,
    %c0_454 = arith.constant 0 : index
    %c0_455 = arith.constant 0 : index
    %c18_456 = arith.constant 18 : index
    %c1_457 = arith.constant 1 : index
    %c0_458 = arith.constant 0 : index
    %210 = vector.load %arg2[%c0_454, %c0_455, %c18_456, %c1_457, %c0_458] : memref<1x1x36x12x32xbf16, #tpu.memory_space<vmem>>, vector<1x1x1x11x32xbf16>
    %211 = vector.shape_cast %210 : vector<1x1x1x11x32xbf16> to vector<11x32xbf16>
    %c64_459 = arith.constant 64 : index
    %c192_460 = arith.constant 192 : index
    %212 = vector.load %arg7[%c64_459, %c192_460] : memref<128x512xbf16, #tpu.memory_space<vmem>>, vector<11x32xbf16>
    tpu.vector_store %arg7[%c64_459, %c192_460], %211 {strides = array<i32>} : memref<128x512xbf16, #tpu.memory_space<vmem>>, vector<11x32xbf16>,
    %c0_461 = arith.constant 0 : index
    %c0_462 = arith.constant 0 : index
    %c19_463 = arith.constant 19 : index
    %c1_464 = arith.constant 1 : index
    %c0_465 = arith.constant 0 : index
    %213 = vector.load %arg2[%c0_461, %c0_462, %c19_463, %c1_464, %c0_465] : memref<1x1x36x12x32xbf16, #tpu.memory_space<vmem>>, vector<1x1x1x11x32xbf16>
    %214 = vector.shape_cast %213 : vector<1x1x1x11x32xbf16> to vector<11x32xbf16>
    %c64_466 = arith.constant 64 : index
    %c224_467 = arith.constant 224 : index
    %215 = vector.load %arg7[%c64_466, %c224_467] : memref<128x512xbf16, #tpu.memory_space<vmem>>, vector<11x32xbf16>
    tpu.vector_store %arg7[%c64_466, %c224_467], %214 {strides = array<i32>} : memref<128x512xbf16, #tpu.memory_space<vmem>>, vector<11x32xbf16>,
    %c0_468 = arith.constant 0 : index
    %c0_469 = arith.constant 0 : index
    %c20 = arith.constant 20 : index
    %c0_470 = arith.constant 0 : index
    %c0_471 = arith.constant 0 : index
    %216 = vector.load %arg2[%c0_468, %c0_469, %c20, %c0_470, %c0_471] : memref<1x1x36x12x32xbf16, #tpu.memory_space<vmem>>, vector<1x1x1x11x32xbf16>
    %217 = vector.shape_cast %216 : vector<1x1x1x11x32xbf16> to vector<11x32xbf16>
    %c64_472 = arith.constant 64 : index
    %c256_473 = arith.constant 256 : index
    %218 = vector.load %arg7[%c64_472, %c256_473] : memref<128x512xbf16, #tpu.memory_space<vmem>>, vector<11x32xbf16>
    tpu.vector_store %arg7[%c64_472, %c256_473], %217 {strides = array<i32>} : memref<128x512xbf16, #tpu.memory_space<vmem>>, vector<11x32xbf16>,
    %c0_474 = arith.constant 0 : index
    %c0_475 = arith.constant 0 : index
    %c21 = arith.constant 21 : index
    %c0_476 = arith.constant 0 : index
    %c0_477 = arith.constant 0 : index
    %219 = vector.load %arg2[%c0_474, %c0_475, %c21, %c0_476, %c0_477] : memref<1x1x36x12x32xbf16, #tpu.memory_space<vmem>>, vector<1x1x1x11x32xbf16>
    %220 = vector.shape_cast %219 : vector<1x1x1x11x32xbf16> to vector<11x32xbf16>
    %c64_478 = arith.constant 64 : index
    %c288_479 = arith.constant 288 : index
    %221 = vector.load %arg7[%c64_478, %c288_479] : memref<128x512xbf16, #tpu.memory_space<vmem>>, vector<11x32xbf16>
    tpu.vector_store %arg7[%c64_478, %c288_479], %220 {strides = array<i32>} : memref<128x512xbf16, #tpu.memory_space<vmem>>, vector<11x32xbf16>,
    %c0_480 = arith.constant 0 : index
    %c0_481 = arith.constant 0 : index
    %c20_482 = arith.constant 20 : index
    %c1_483 = arith.constant 1 : index
    %c0_484 = arith.constant 0 : index
    %222 = vector.load %arg2[%c0_480, %c0_481, %c20_482, %c1_483, %c0_484] : memref<1x1x36x12x32xbf16, #tpu.memory_space<vmem>>, vector<1x1x1x11x32xbf16>
    %223 = vector.shape_cast %222 : vector<1x1x1x11x32xbf16> to vector<11x32xbf16>
    %c64_485 = arith.constant 64 : index
    %c320_486 = arith.constant 320 : index
    %224 = vector.load %arg7[%c64_485, %c320_486] : memref<128x512xbf16, #tpu.memory_space<vmem>>, vector<11x32xbf16>
    tpu.vector_store %arg7[%c64_485, %c320_486], %223 {strides = array<i32>} : memref<128x512xbf16, #tpu.memory_space<vmem>>, vector<11x32xbf16>,
    %c0_487 = arith.constant 0 : index
    %c0_488 = arith.constant 0 : index
    %c21_489 = arith.constant 21 : index
    %c1_490 = arith.constant 1 : index
    %c0_491 = arith.constant 0 : index
    %225 = vector.load %arg2[%c0_487, %c0_488, %c21_489, %c1_490, %c0_491] : memref<1x1x36x12x32xbf16, #tpu.memory_space<vmem>>, vector<1x1x1x11x32xbf16>
    %226 = vector.shape_cast %225 : vector<1x1x1x11x32xbf16> to vector<11x32xbf16>
    %c64_492 = arith.constant 64 : index
    %c352_493 = arith.constant 352 : index
    %227 = vector.load %arg7[%c64_492, %c352_493] : memref<128x512xbf16, #tpu.memory_space<vmem>>, vector<11x32xbf16>
    tpu.vector_store %arg7[%c64_492, %c352_493], %226 {strides = array<i32>} : memref<128x512xbf16, #tpu.memory_space<vmem>>, vector<11x32xbf16>,
    %c0_494 = arith.constant 0 : index
    %c0_495 = arith.constant 0 : index
    %c22 = arith.constant 22 : index
    %c0_496 = arith.constant 0 : index
    %c0_497 = arith.constant 0 : index
    %228 = vector.load %arg2[%c0_494, %c0_495, %c22, %c0_496, %c0_497] : memref<1x1x36x12x32xbf16, #tpu.memory_space<vmem>>, vector<1x1x1x11x32xbf16>
    %229 = vector.shape_cast %228 : vector<1x1x1x11x32xbf16> to vector<11x32xbf16>
    %c64_498 = arith.constant 64 : index
    %c384_499 = arith.constant 384 : index
    %230 = vector.load %arg7[%c64_498, %c384_499] : memref<128x512xbf16, #tpu.memory_space<vmem>>, vector<11x32xbf16>
    tpu.vector_store %arg7[%c64_498, %c384_499], %229 {strides = array<i32>} : memref<128x512xbf16, #tpu.memory_space<vmem>>, vector<11x32xbf16>,
    %c0_500 = arith.constant 0 : index
    %c0_501 = arith.constant 0 : index
    %c23 = arith.constant 23 : index
    %c0_502 = arith.constant 0 : index
    %c0_503 = arith.constant 0 : index
    %231 = vector.load %arg2[%c0_500, %c0_501, %c23, %c0_502, %c0_503] : memref<1x1x36x12x32xbf16, #tpu.memory_space<vmem>>, vector<1x1x1x11x32xbf16>
    %232 = vector.shape_cast %231 : vector<1x1x1x11x32xbf16> to vector<11x32xbf16>
    %c64_504 = arith.constant 64 : index
    %c416_505 = arith.constant 416 : index
    %233 = vector.load %arg7[%c64_504, %c416_505] : memref<128x512xbf16, #tpu.memory_space<vmem>>, vector<11x32xbf16>
    tpu.vector_store %arg7[%c64_504, %c416_505], %232 {strides = array<i32>} : memref<128x512xbf16, #tpu.memory_space<vmem>>, vector<11x32xbf16>,
    %c0_506 = arith.constant 0 : index
    %c0_507 = arith.constant 0 : index
    %c22_508 = arith.constant 22 : index
    %c1_509 = arith.constant 1 : index
    %c0_510 = arith.constant 0 : index
    %234 = vector.load %arg2[%c0_506, %c0_507, %c22_508, %c1_509, %c0_510] : memref<1x1x36x12x32xbf16, #tpu.memory_space<vmem>>, vector<1x1x1x11x32xbf16>
    %235 = vector.shape_cast %234 : vector<1x1x1x11x32xbf16> to vector<11x32xbf16>
    %c64_511 = arith.constant 64 : index
    %c448_512 = arith.constant 448 : index
    %236 = vector.load %arg7[%c64_511, %c448_512] : memref<128x512xbf16, #tpu.memory_space<vmem>>, vector<11x32xbf16>
    tpu.vector_store %arg7[%c64_511, %c448_512], %235 {strides = array<i32>} : memref<128x512xbf16, #tpu.memory_space<vmem>>, vector<11x32xbf16>,
    %c0_513 = arith.constant 0 : index
    %c0_514 = arith.constant 0 : index
    %c23_515 = arith.constant 23 : index
    %c1_516 = arith.constant 1 : index
    %c0_517 = arith.constant 0 : index
    %237 = vector.load %arg2[%c0_513, %c0_514, %c23_515, %c1_516, %c0_517] : memref<1x1x36x12x32xbf16, #tpu.memory_space<vmem>>, vector<1x1x1x11x32xbf16>
    %238 = vector.shape_cast %237 : vector<1x1x1x11x32xbf16> to vector<11x32xbf16>
    %c64_518 = arith.constant 64 : index
    %c480_519 = arith.constant 480 : index
    %239 = vector.load %arg7[%c64_518, %c480_519] : memref<128x512xbf16, #tpu.memory_space<vmem>>, vector<11x32xbf16>
    tpu.vector_store %arg7[%c64_518, %c480_519], %238 {strides = array<i32>} : memref<128x512xbf16, #tpu.memory_space<vmem>>, vector<11x32xbf16>,
    %c0_520 = arith.constant 0 : index
    %c0_521 = arith.constant 0 : index
    %c20_522 = arith.constant 20 : index
    %c0_523 = arith.constant 0 : index
    %c0_524 = arith.constant 0 : index
    %240 = vector.load %arg2[%c0_520, %c0_521, %c20_522, %c0_523, %c0_524] : memref<1x1x36x12x32xbf16, #tpu.memory_space<vmem>>, vector<1x1x1x11x32xbf16>
    %241 = vector.shape_cast %240 : vector<1x1x1x11x32xbf16> to vector<11x32xbf16>
    %c80 = arith.constant 80 : index
    %c0_525 = arith.constant 0 : index
    %242 = vector.load %arg7[%c80, %c0_525] : memref<128x512xbf16, #tpu.memory_space<vmem>>, vector<11x32xbf16>
    tpu.vector_store %arg7[%c80, %c0_525], %241 {strides = array<i32>} : memref<128x512xbf16, #tpu.memory_space<vmem>>, vector<11x32xbf16>,
    %c0_526 = arith.constant 0 : index
    %c0_527 = arith.constant 0 : index
    %c21_528 = arith.constant 21 : index
    %c0_529 = arith.constant 0 : index
    %c0_530 = arith.constant 0 : index
    %243 = vector.load %arg2[%c0_526, %c0_527, %c21_528, %c0_529, %c0_530] : memref<1x1x36x12x32xbf16, #tpu.memory_space<vmem>>, vector<1x1x1x11x32xbf16>
    %244 = vector.shape_cast %243 : vector<1x1x1x11x32xbf16> to vector<11x32xbf16>
    %c80_531 = arith.constant 80 : index
    %c32_532 = arith.constant 32 : index
    %245 = vector.load %arg7[%c80_531, %c32_532] : memref<128x512xbf16, #tpu.memory_space<vmem>>, vector<11x32xbf16>
    tpu.vector_store %arg7[%c80_531, %c32_532], %244 {strides = array<i32>} : memref<128x512xbf16, #tpu.memory_space<vmem>>, vector<11x32xbf16>,
    %c0_533 = arith.constant 0 : index
    %c0_534 = arith.constant 0 : index
    %c20_535 = arith.constant 20 : index
    %c1_536 = arith.constant 1 : index
    %c0_537 = arith.constant 0 : index
    %246 = vector.load %arg2[%c0_533, %c0_534, %c20_535, %c1_536, %c0_537] : memref<1x1x36x12x32xbf16, #tpu.memory_space<vmem>>, vector<1x1x1x11x32xbf16>
    %247 = vector.shape_cast %246 : vector<1x1x1x11x32xbf16> to vector<11x32xbf16>
    %c80_538 = arith.constant 80 : index
    %c64_539 = arith.constant 64 : index
    %248 = vector.load %arg7[%c80_538, %c64_539] : memref<128x512xbf16, #tpu.memory_space<vmem>>, vector<11x32xbf16>
    tpu.vector_store %arg7[%c80_538, %c64_539], %247 {strides = array<i32>} : memref<128x512xbf16, #tpu.memory_space<vmem>>, vector<11x32xbf16>,
    %c0_540 = arith.constant 0 : index
    %c0_541 = arith.constant 0 : index
    %c21_542 = arith.constant 21 : index
    %c1_543 = arith.constant 1 : index
    %c0_544 = arith.constant 0 : index
    %249 = vector.load %arg2[%c0_540, %c0_541, %c21_542, %c1_543, %c0_544] : memref<1x1x36x12x32xbf16, #tpu.memory_space<vmem>>, vector<1x1x1x11x32xbf16>
    %250 = vector.shape_cast %249 : vector<1x1x1x11x32xbf16> to vector<11x32xbf16>
    %c80_545 = arith.constant 80 : index
    %c96_546 = arith.constant 96 : index
    %251 = vector.load %arg7[%c80_545, %c96_546] : memref<128x512xbf16, #tpu.memory_space<vmem>>, vector<11x32xbf16>
    tpu.vector_store %arg7[%c80_545, %c96_546], %250 {strides = array<i32>} : memref<128x512xbf16, #tpu.memory_space<vmem>>, vector<11x32xbf16>,
    %c0_547 = arith.constant 0 : index
    %c0_548 = arith.constant 0 : index
    %c22_549 = arith.constant 22 : index
    %c0_550 = arith.constant 0 : index
    %c0_551 = arith.constant 0 : index
    %252 = vector.load %arg2[%c0_547, %c0_548, %c22_549, %c0_550, %c0_551] : memref<1x1x36x12x32xbf16, #tpu.memory_space<vmem>>, vector<1x1x1x11x32xbf16>
    %253 = vector.shape_cast %252 : vector<1x1x1x11x32xbf16> to vector<11x32xbf16>
    %c80_552 = arith.constant 80 : index
    %c128_553 = arith.constant 128 : index
    %254 = vector.load %arg7[%c80_552, %c128_553] : memref<128x512xbf16, #tpu.memory_space<vmem>>, vector<11x32xbf16>
    tpu.vector_store %arg7[%c80_552, %c128_553], %253 {strides = array<i32>} : memref<128x512xbf16, #tpu.memory_space<vmem>>, vector<11x32xbf16>,
    %c0_554 = arith.constant 0 : index
    %c0_555 = arith.constant 0 : index
    %c23_556 = arith.constant 23 : index
    %c0_557 = arith.constant 0 : index
    %c0_558 = arith.constant 0 : index
    %255 = vector.load %arg2[%c0_554, %c0_555, %c23_556, %c0_557, %c0_558] : memref<1x1x36x12x32xbf16, #tpu.memory_space<vmem>>, vector<1x1x1x11x32xbf16>
    %256 = vector.shape_cast %255 : vector<1x1x1x11x32xbf16> to vector<11x32xbf16>
    %c80_559 = arith.constant 80 : index
    %c160_560 = arith.constant 160 : index
    %257 = vector.load %arg7[%c80_559, %c160_560] : memref<128x512xbf16, #tpu.memory_space<vmem>>, vector<11x32xbf16>
    tpu.vector_store %arg7[%c80_559, %c160_560], %256 {strides = array<i32>} : memref<128x512xbf16, #tpu.memory_space<vmem>>, vector<11x32xbf16>,
    %c0_561 = arith.constant 0 : index
    %c0_562 = arith.constant 0 : index
    %c22_563 = arith.constant 22 : index
    %c1_564 = arith.constant 1 : index
    %c0_565 = arith.constant 0 : index
    %258 = vector.load %arg2[%c0_561, %c0_562, %c22_563, %c1_564, %c0_565] : memref<1x1x36x12x32xbf16, #tpu.memory_space<vmem>>, vector<1x1x1x11x32xbf16>
    %259 = vector.shape_cast %258 : vector<1x1x1x11x32xbf16> to vector<11x32xbf16>
    %c80_566 = arith.constant 80 : index
    %c192_567 = arith.constant 192 : index
    %260 = vector.load %arg7[%c80_566, %c192_567] : memref<128x512xbf16, #tpu.memory_space<vmem>>, vector<11x32xbf16>
    tpu.vector_store %arg7[%c80_566, %c192_567], %259 {strides = array<i32>} : memref<128x512xbf16, #tpu.memory_space<vmem>>, vector<11x32xbf16>,
    %c0_568 = arith.constant 0 : index
    %c0_569 = arith.constant 0 : index
    %c23_570 = arith.constant 23 : index
    %c1_571 = arith.constant 1 : index
    %c0_572 = arith.constant 0 : index
    %261 = vector.load %arg2[%c0_568, %c0_569, %c23_570, %c1_571, %c0_572] : memref<1x1x36x12x32xbf16, #tpu.memory_space<vmem>>, vector<1x1x1x11x32xbf16>
    %262 = vector.shape_cast %261 : vector<1x1x1x11x32xbf16> to vector<11x32xbf16>
    %c80_573 = arith.constant 80 : index
    %c224_574 = arith.constant 224 : index
    %263 = vector.load %arg7[%c80_573, %c224_574] : memref<128x512xbf16, #tpu.memory_space<vmem>>, vector<11x32xbf16>
    tpu.vector_store %arg7[%c80_573, %c224_574], %262 {strides = array<i32>} : memref<128x512xbf16, #tpu.memory_space<vmem>>, vector<11x32xbf16>,
    %c0_575 = arith.constant 0 : index
    %c0_576 = arith.constant 0 : index
    %c24 = arith.constant 24 : index
    %c0_577 = arith.constant 0 : index
    %c0_578 = arith.constant 0 : index
    %264 = vector.load %arg2[%c0_575, %c0_576, %c24, %c0_577, %c0_578] : memref<1x1x36x12x32xbf16, #tpu.memory_space<vmem>>, vector<1x1x1x11x32xbf16>
    %265 = vector.shape_cast %264 : vector<1x1x1x11x32xbf16> to vector<11x32xbf16>
    %c80_579 = arith.constant 80 : index
    %c256_580 = arith.constant 256 : index
    %266 = vector.load %arg7[%c80_579, %c256_580] : memref<128x512xbf16, #tpu.memory_space<vmem>>, vector<11x32xbf16>
    tpu.vector_store %arg7[%c80_579, %c256_580], %265 {strides = array<i32>} : memref<128x512xbf16, #tpu.memory_space<vmem>>, vector<11x32xbf16>,
    %c0_581 = arith.constant 0 : index
    %c0_582 = arith.constant 0 : index
    %c25 = arith.constant 25 : index
    %c0_583 = arith.constant 0 : index
    %c0_584 = arith.constant 0 : index
    %267 = vector.load %arg2[%c0_581, %c0_582, %c25, %c0_583, %c0_584] : memref<1x1x36x12x32xbf16, #tpu.memory_space<vmem>>, vector<1x1x1x11x32xbf16>
    %268 = vector.shape_cast %267 : vector<1x1x1x11x32xbf16> to vector<11x32xbf16>
    %c80_585 = arith.constant 80 : index
    %c288_586 = arith.constant 288 : index
    %269 = vector.load %arg7[%c80_585, %c288_586] : memref<128x512xbf16, #tpu.memory_space<vmem>>, vector<11x32xbf16>
    tpu.vector_store %arg7[%c80_585, %c288_586], %268 {strides = array<i32>} : memref<128x512xbf16, #tpu.memory_space<vmem>>, vector<11x32xbf16>,
    %c0_587 = arith.constant 0 : index
    %c0_588 = arith.constant 0 : index
    %c24_589 = arith.constant 24 : index
    %c1_590 = arith.constant 1 : index
    %c0_591 = arith.constant 0 : index
    %270 = vector.load %arg2[%c0_587, %c0_588, %c24_589, %c1_590, %c0_591] : memref<1x1x36x12x32xbf16, #tpu.memory_space<vmem>>, vector<1x1x1x11x32xbf16>
    %271 = vector.shape_cast %270 : vector<1x1x1x11x32xbf16> to vector<11x32xbf16>
    %c80_592 = arith.constant 80 : index
    %c320_593 = arith.constant 320 : index
    %272 = vector.load %arg7[%c80_592, %c320_593] : memref<128x512xbf16, #tpu.memory_space<vmem>>, vector<11x32xbf16>
    tpu.vector_store %arg7[%c80_592, %c320_593], %271 {strides = array<i32>} : memref<128x512xbf16, #tpu.memory_space<vmem>>, vector<11x32xbf16>,
    %c0_594 = arith.constant 0 : index
    %c0_595 = arith.constant 0 : index
    %c25_596 = arith.constant 25 : index
    %c1_597 = arith.constant 1 : index
    %c0_598 = arith.constant 0 : index
    %273 = vector.load %arg2[%c0_594, %c0_595, %c25_596, %c1_597, %c0_598] : memref<1x1x36x12x32xbf16, #tpu.memory_space<vmem>>, vector<1x1x1x11x32xbf16>
    %274 = vector.shape_cast %273 : vector<1x1x1x11x32xbf16> to vector<11x32xbf16>
    %c80_599 = arith.constant 80 : index
    %c352_600 = arith.constant 352 : index
    %275 = vector.load %arg7[%c80_599, %c352_600] : memref<128x512xbf16, #tpu.memory_space<vmem>>, vector<11x32xbf16>
    tpu.vector_store %arg7[%c80_599, %c352_600], %274 {strides = array<i32>} : memref<128x512xbf16, #tpu.memory_space<vmem>>, vector<11x32xbf16>,
    %c0_601 = arith.constant 0 : index
    %c0_602 = arith.constant 0 : index
    %c26 = arith.constant 26 : index
    %c0_603 = arith.constant 0 : index
    %c0_604 = arith.constant 0 : index
    %276 = vector.load %arg2[%c0_601, %c0_602, %c26, %c0_603, %c0_604] : memref<1x1x36x12x32xbf16, #tpu.memory_space<vmem>>, vector<1x1x1x11x32xbf16>
    %277 = vector.shape_cast %276 : vector<1x1x1x11x32xbf16> to vector<11x32xbf16>
    %c80_605 = arith.constant 80 : index
    %c384_606 = arith.constant 384 : index
    %278 = vector.load %arg7[%c80_605, %c384_606] : memref<128x512xbf16, #tpu.memory_space<vmem>>, vector<11x32xbf16>
    tpu.vector_store %arg7[%c80_605, %c384_606], %277 {strides = array<i32>} : memref<128x512xbf16, #tpu.memory_space<vmem>>, vector<11x32xbf16>,
    %c0_607 = arith.constant 0 : index
    %c0_608 = arith.constant 0 : index
    %c27 = arith.constant 27 : index
    %c0_609 = arith.constant 0 : index
    %c0_610 = arith.constant 0 : index
    %279 = vector.load %arg2[%c0_607, %c0_608, %c27, %c0_609, %c0_610] : memref<1x1x36x12x32xbf16, #tpu.memory_space<vmem>>, vector<1x1x1x11x32xbf16>
    %280 = vector.shape_cast %279 : vector<1x1x1x11x32xbf16> to vector<11x32xbf16>
    %c80_611 = arith.constant 80 : index
    %c416_612 = arith.constant 416 : index
    %281 = vector.load %arg7[%c80_611, %c416_612] : memref<128x512xbf16, #tpu.memory_space<vmem>>, vector<11x32xbf16>
    tpu.vector_store %arg7[%c80_611, %c416_612], %280 {strides = array<i32>} : memref<128x512xbf16, #tpu.memory_space<vmem>>, vector<11x32xbf16>,
    %c0_613 = arith.constant 0 : index
    %c0_614 = arith.constant 0 : index
    %c26_615 = arith.constant 26 : index
    %c1_616 = arith.constant 1 : index
    %c0_617 = arith.constant 0 : index
    %282 = vector.load %arg2[%c0_613, %c0_614, %c26_615, %c1_616, %c0_617] : memref<1x1x36x12x32xbf16, #tpu.memory_space<vmem>>, vector<1x1x1x11x32xbf16>
    %283 = vector.shape_cast %282 : vector<1x1x1x11x32xbf16> to vector<11x32xbf16>
    %c80_618 = arith.constant 80 : index
    %c448_619 = arith.constant 448 : index
    %284 = vector.load %arg7[%c80_618, %c448_619] : memref<128x512xbf16, #tpu.memory_space<vmem>>, vector<11x32xbf16>
    tpu.vector_store %arg7[%c80_618, %c448_619], %283 {strides = array<i32>} : memref<128x512xbf16, #tpu.memory_space<vmem>>, vector<11x32xbf16>,
    %c0_620 = arith.constant 0 : index
    %c0_621 = arith.constant 0 : index
    %c27_622 = arith.constant 27 : index
    %c1_623 = arith.constant 1 : index
    %c0_624 = arith.constant 0 : index
    %285 = vector.load %arg2[%c0_620, %c0_621, %c27_622, %c1_623, %c0_624] : memref<1x1x36x12x32xbf16, #tpu.memory_space<vmem>>, vector<1x1x1x11x32xbf16>
    %286 = vector.shape_cast %285 : vector<1x1x1x11x32xbf16> to vector<11x32xbf16>
    %c80_625 = arith.constant 80 : index
    %c480_626 = arith.constant 480 : index
    %287 = vector.load %arg7[%c80_625, %c480_626] : memref<128x512xbf16, #tpu.memory_space<vmem>>, vector<11x32xbf16>
    tpu.vector_store %arg7[%c80_625, %c480_626], %286 {strides = array<i32>} : memref<128x512xbf16, #tpu.memory_space<vmem>>, vector<11x32xbf16>,
    %c0_627 = arith.constant 0 : index
    %c0_628 = arith.constant 0 : index
    %c24_629 = arith.constant 24 : index
    %c0_630 = arith.constant 0 : index
    %c0_631 = arith.constant 0 : index
    %288 = vector.load %arg2[%c0_627, %c0_628, %c24_629, %c0_630, %c0_631] : memref<1x1x36x12x32xbf16, #tpu.memory_space<vmem>>, vector<1x1x1x11x32xbf16>
    %289 = vector.shape_cast %288 : vector<1x1x1x11x32xbf16> to vector<11x32xbf16>
    %c96_632 = arith.constant 96 : index
    %c0_633 = arith.constant 0 : index
    %290 = vector.load %arg7[%c96_632, %c0_633] : memref<128x512xbf16, #tpu.memory_space<vmem>>, vector<11x32xbf16>
    tpu.vector_store %arg7[%c96_632, %c0_633], %289 {strides = array<i32>} : memref<128x512xbf16, #tpu.memory_space<vmem>>, vector<11x32xbf16>,
    %c0_634 = arith.constant 0 : index
    %c0_635 = arith.constant 0 : index
    %c25_636 = arith.constant 25 : index
    %c0_637 = arith.constant 0 : index
    %c0_638 = arith.constant 0 : index
    %291 = vector.load %arg2[%c0_634, %c0_635, %c25_636, %c0_637, %c0_638] : memref<1x1x36x12x32xbf16, #tpu.memory_space<vmem>>, vector<1x1x1x11x32xbf16>
    %292 = vector.shape_cast %291 : vector<1x1x1x11x32xbf16> to vector<11x32xbf16>
    %c96_639 = arith.constant 96 : index
    %c32_640 = arith.constant 32 : index
    %293 = vector.load %arg7[%c96_639, %c32_640] : memref<128x512xbf16, #tpu.memory_space<vmem>>, vector<11x32xbf16>
    tpu.vector_store %arg7[%c96_639, %c32_640], %292 {strides = array<i32>} : memref<128x512xbf16, #tpu.memory_space<vmem>>, vector<11x32xbf16>,
    %c0_641 = arith.constant 0 : index
    %c0_642 = arith.constant 0 : index
    %c24_643 = arith.constant 24 : index
    %c1_644 = arith.constant 1 : index
    %c0_645 = arith.constant 0 : index
    %294 = vector.load %arg2[%c0_641, %c0_642, %c24_643, %c1_644, %c0_645] : memref<1x1x36x12x32xbf16, #tpu.memory_space<vmem>>, vector<1x1x1x11x32xbf16>
    %295 = vector.shape_cast %294 : vector<1x1x1x11x32xbf16> to vector<11x32xbf16>
    %c96_646 = arith.constant 96 : index
    %c64_647 = arith.constant 64 : index
    %296 = vector.load %arg7[%c96_646, %c64_647] : memref<128x512xbf16, #tpu.memory_space<vmem>>, vector<11x32xbf16>
    tpu.vector_store %arg7[%c96_646, %c64_647], %295 {strides = array<i32>} : memref<128x512xbf16, #tpu.memory_space<vmem>>, vector<11x32xbf16>,
    %c0_648 = arith.constant 0 : index
    %c0_649 = arith.constant 0 : index
    %c25_650 = arith.constant 25 : index
    %c1_651 = arith.constant 1 : index
    %c0_652 = arith.constant 0 : index
    %297 = vector.load %arg2[%c0_648, %c0_649, %c25_650, %c1_651, %c0_652] : memref<1x1x36x12x32xbf16, #tpu.memory_space<vmem>>, vector<1x1x1x11x32xbf16>
    %298 = vector.shape_cast %297 : vector<1x1x1x11x32xbf16> to vector<11x32xbf16>
    %c96_653 = arith.constant 96 : index
    %c96_654 = arith.constant 96 : index
    %299 = vector.load %arg7[%c96_653, %c96_654] : memref<128x512xbf16, #tpu.memory_space<vmem>>, vector<11x32xbf16>
    tpu.vector_store %arg7[%c96_653, %c96_654], %298 {strides = array<i32>} : memref<128x512xbf16, #tpu.memory_space<vmem>>, vector<11x32xbf16>,
    %c0_655 = arith.constant 0 : index
    %c0_656 = arith.constant 0 : index
    %c26_657 = arith.constant 26 : index
    %c0_658 = arith.constant 0 : index
    %c0_659 = arith.constant 0 : index
    %300 = vector.load %arg2[%c0_655, %c0_656, %c26_657, %c0_658, %c0_659] : memref<1x1x36x12x32xbf16, #tpu.memory_space<vmem>>, vector<1x1x1x11x32xbf16>
    %301 = vector.shape_cast %300 : vector<1x1x1x11x32xbf16> to vector<11x32xbf16>
    %c96_660 = arith.constant 96 : index
    %c128_661 = arith.constant 128 : index
    %302 = vector.load %arg7[%c96_660, %c128_661] : memref<128x512xbf16, #tpu.memory_space<vmem>>, vector<11x32xbf16>
    tpu.vector_store %arg7[%c96_660, %c128_661], %301 {strides = array<i32>} : memref<128x512xbf16, #tpu.memory_space<vmem>>, vector<11x32xbf16>,
    %c0_662 = arith.constant 0 : index
    %c0_663 = arith.constant 0 : index
    %c27_664 = arith.constant 27 : index
    %c0_665 = arith.constant 0 : index
    %c0_666 = arith.constant 0 : index
    %303 = vector.load %arg2[%c0_662, %c0_663, %c27_664, %c0_665, %c0_666] : memref<1x1x36x12x32xbf16, #tpu.memory_space<vmem>>, vector<1x1x1x11x32xbf16>
    %304 = vector.shape_cast %303 : vector<1x1x1x11x32xbf16> to vector<11x32xbf16>
    %c96_667 = arith.constant 96 : index
    %c160_668 = arith.constant 160 : index
    %305 = vector.load %arg7[%c96_667, %c160_668] : memref<128x512xbf16, #tpu.memory_space<vmem>>, vector<11x32xbf16>
    tpu.vector_store %arg7[%c96_667, %c160_668], %304 {strides = array<i32>} : memref<128x512xbf16, #tpu.memory_space<vmem>>, vector<11x32xbf16>,
    %c0_669 = arith.constant 0 : index
    %c0_670 = arith.constant 0 : index
    %c26_671 = arith.constant 26 : index
    %c1_672 = arith.constant 1 : index
    %c0_673 = arith.constant 0 : index
    %306 = vector.load %arg2[%c0_669, %c0_670, %c26_671, %c1_672, %c0_673] : memref<1x1x36x12x32xbf16, #tpu.memory_space<vmem>>, vector<1x1x1x11x32xbf16>
    %307 = vector.shape_cast %306 : vector<1x1x1x11x32xbf16> to vector<11x32xbf16>
    %c96_674 = arith.constant 96 : index
    %c192_675 = arith.constant 192 : index
    %308 = vector.load %arg7[%c96_674, %c192_675] : memref<128x512xbf16, #tpu.memory_space<vmem>>, vector<11x32xbf16>
    tpu.vector_store %arg7[%c96_674, %c192_675], %307 {strides = array<i32>} : memref<128x512xbf16, #tpu.memory_space<vmem>>, vector<11x32xbf16>,
    %c0_676 = arith.constant 0 : index
    %c0_677 = arith.constant 0 : index
    %c27_678 = arith.constant 27 : index
    %c1_679 = arith.constant 1 : index
    %c0_680 = arith.constant 0 : index
    %309 = vector.load %arg2[%c0_676, %c0_677, %c27_678, %c1_679, %c0_680] : memref<1x1x36x12x32xbf16, #tpu.memory_space<vmem>>, vector<1x1x1x11x32xbf16>
    %310 = vector.shape_cast %309 : vector<1x1x1x11x32xbf16> to vector<11x32xbf16>
    %c96_681 = arith.constant 96 : index
    %c224_682 = arith.constant 224 : index
    %311 = vector.load %arg7[%c96_681, %c224_682] : memref<128x512xbf16, #tpu.memory_space<vmem>>, vector<11x32xbf16>
    tpu.vector_store %arg7[%c96_681, %c224_682], %310 {strides = array<i32>} : memref<128x512xbf16, #tpu.memory_space<vmem>>, vector<11x32xbf16>,
    %c0_683 = arith.constant 0 : index
    %c0_684 = arith.constant 0 : index
    %c28 = arith.constant 28 : index
    %c0_685 = arith.constant 0 : index
    %c0_686 = arith.constant 0 : index
    %312 = vector.load %arg2[%c0_683, %c0_684, %c28, %c0_685, %c0_686] : memref<1x1x36x12x32xbf16, #tpu.memory_space<vmem>>, vector<1x1x1x11x32xbf16>
    %313 = vector.shape_cast %312 : vector<1x1x1x11x32xbf16> to vector<11x32xbf16>
    %c96_687 = arith.constant 96 : index
    %c256_688 = arith.constant 256 : index
    %314 = vector.load %arg7[%c96_687, %c256_688] : memref<128x512xbf16, #tpu.memory_space<vmem>>, vector<11x32xbf16>
    tpu.vector_store %arg7[%c96_687, %c256_688], %313 {strides = array<i32>} : memref<128x512xbf16, #tpu.memory_space<vmem>>, vector<11x32xbf16>,
    %c0_689 = arith.constant 0 : index
    %c0_690 = arith.constant 0 : index
    %c29 = arith.constant 29 : index
    %c0_691 = arith.constant 0 : index
    %c0_692 = arith.constant 0 : index
    %315 = vector.load %arg2[%c0_689, %c0_690, %c29, %c0_691, %c0_692] : memref<1x1x36x12x32xbf16, #tpu.memory_space<vmem>>, vector<1x1x1x11x32xbf16>
    %316 = vector.shape_cast %315 : vector<1x1x1x11x32xbf16> to vector<11x32xbf16>
    %c96_693 = arith.constant 96 : index
    %c288_694 = arith.constant 288 : index
    %317 = vector.load %arg7[%c96_693, %c288_694] : memref<128x512xbf16, #tpu.memory_space<vmem>>, vector<11x32xbf16>
    tpu.vector_store %arg7[%c96_693, %c288_694], %316 {strides = array<i32>} : memref<128x512xbf16, #tpu.memory_space<vmem>>, vector<11x32xbf16>,
    %c0_695 = arith.constant 0 : index
    %c0_696 = arith.constant 0 : index
    %c28_697 = arith.constant 28 : index
    %c1_698 = arith.constant 1 : index
    %c0_699 = arith.constant 0 : index
    %318 = vector.load %arg2[%c0_695, %c0_696, %c28_697, %c1_698, %c0_699] : memref<1x1x36x12x32xbf16, #tpu.memory_space<vmem>>, vector<1x1x1x11x32xbf16>
    %319 = vector.shape_cast %318 : vector<1x1x1x11x32xbf16> to vector<11x32xbf16>
    %c96_700 = arith.constant 96 : index
    %c320_701 = arith.constant 320 : index
    %320 = vector.load %arg7[%c96_700, %c320_701] : memref<128x512xbf16, #tpu.memory_space<vmem>>, vector<11x32xbf16>
    tpu.vector_store %arg7[%c96_700, %c320_701], %319 {strides = array<i32>} : memref<128x512xbf16, #tpu.memory_space<vmem>>, vector<11x32xbf16>,
    %c0_702 = arith.constant 0 : index
    %c0_703 = arith.constant 0 : index
    %c29_704 = arith.constant 29 : index
    %c1_705 = arith.constant 1 : index
    %c0_706 = arith.constant 0 : index
    %321 = vector.load %arg2[%c0_702, %c0_703, %c29_704, %c1_705, %c0_706] : memref<1x1x36x12x32xbf16, #tpu.memory_space<vmem>>, vector<1x1x1x11x32xbf16>
    %322 = vector.shape_cast %321 : vector<1x1x1x11x32xbf16> to vector<11x32xbf16>
    %c96_707 = arith.constant 96 : index
    %c352_708 = arith.constant 352 : index
    %323 = vector.load %arg7[%c96_707, %c352_708] : memref<128x512xbf16, #tpu.memory_space<vmem>>, vector<11x32xbf16>
    tpu.vector_store %arg7[%c96_707, %c352_708], %322 {strides = array<i32>} : memref<128x512xbf16, #tpu.memory_space<vmem>>, vector<11x32xbf16>,
    %c0_709 = arith.constant 0 : index
    %c0_710 = arith.constant 0 : index
    %c30 = arith.constant 30 : index
    %c0_711 = arith.constant 0 : index
    %c0_712 = arith.constant 0 : index
    %324 = vector.load %arg2[%c0_709, %c0_710, %c30, %c0_711, %c0_712] : memref<1x1x36x12x32xbf16, #tpu.memory_space<vmem>>, vector<1x1x1x11x32xbf16>
    %325 = vector.shape_cast %324 : vector<1x1x1x11x32xbf16> to vector<11x32xbf16>
    %c96_713 = arith.constant 96 : index
    %c384_714 = arith.constant 384 : index
    %326 = vector.load %arg7[%c96_713, %c384_714] : memref<128x512xbf16, #tpu.memory_space<vmem>>, vector<11x32xbf16>
    tpu.vector_store %arg7[%c96_713, %c384_714], %325 {strides = array<i32>} : memref<128x512xbf16, #tpu.memory_space<vmem>>, vector<11x32xbf16>,
    %c0_715 = arith.constant 0 : index
    %c0_716 = arith.constant 0 : index
    %c31 = arith.constant 31 : index
    %c0_717 = arith.constant 0 : index
    %c0_718 = arith.constant 0 : index
    %327 = vector.load %arg2[%c0_715, %c0_716, %c31, %c0_717, %c0_718] : memref<1x1x36x12x32xbf16, #tpu.memory_space<vmem>>, vector<1x1x1x11x32xbf16>
    %328 = vector.shape_cast %327 : vector<1x1x1x11x32xbf16> to vector<11x32xbf16>
    %c96_719 = arith.constant 96 : index
    %c416_720 = arith.constant 416 : index
    %329 = vector.load %arg7[%c96_719, %c416_720] : memref<128x512xbf16, #tpu.memory_space<vmem>>, vector<11x32xbf16>
    tpu.vector_store %arg7[%c96_719, %c416_720], %328 {strides = array<i32>} : memref<128x512xbf16, #tpu.memory_space<vmem>>, vector<11x32xbf16>,
    %c0_721 = arith.constant 0 : index
    %c0_722 = arith.constant 0 : index
    %c30_723 = arith.constant 30 : index
    %c1_724 = arith.constant 1 : index
    %c0_725 = arith.constant 0 : index
    %330 = vector.load %arg2[%c0_721, %c0_722, %c30_723, %c1_724, %c0_725] : memref<1x1x36x12x32xbf16, #tpu.memory_space<vmem>>, vector<1x1x1x11x32xbf16>
    %331 = vector.shape_cast %330 : vector<1x1x1x11x32xbf16> to vector<11x32xbf16>
    %c96_726 = arith.constant 96 : index
    %c448_727 = arith.constant 448 : index
    %332 = vector.load %arg7[%c96_726, %c448_727] : memref<128x512xbf16, #tpu.memory_space<vmem>>, vector<11x32xbf16>
    tpu.vector_store %arg7[%c96_726, %c448_727], %331 {strides = array<i32>} : memref<128x512xbf16, #tpu.memory_space<vmem>>, vector<11x32xbf16>,
    %c0_728 = arith.constant 0 : index
    %c0_729 = arith.constant 0 : index
    %c31_730 = arith.constant 31 : index
    %c1_731 = arith.constant 1 : index
    %c0_732 = arith.constant 0 : index
    %333 = vector.load %arg2[%c0_728, %c0_729, %c31_730, %c1_731, %c0_732] : memref<1x1x36x12x32xbf16, #tpu.memory_space<vmem>>, vector<1x1x1x11x32xbf16>
    %334 = vector.shape_cast %333 : vector<1x1x1x11x32xbf16> to vector<11x32xbf16>
    %c96_733 = arith.constant 96 : index
    %c480_734 = arith.constant 480 : index
    %335 = vector.load %arg7[%c96_733, %c480_734] : memref<128x512xbf16, #tpu.memory_space<vmem>>, vector<11x32xbf16>
    tpu.vector_store %arg7[%c96_733, %c480_734], %334 {strides = array<i32>} : memref<128x512xbf16, #tpu.memory_space<vmem>>, vector<11x32xbf16>,
    %c0_735 = arith.constant 0 : index
    %c0_736 = arith.constant 0 : index
    %c28_737 = arith.constant 28 : index
    %c0_738 = arith.constant 0 : index
    %c0_739 = arith.constant 0 : index
    %336 = vector.load %arg2[%c0_735, %c0_736, %c28_737, %c0_738, %c0_739] : memref<1x1x36x12x32xbf16, #tpu.memory_space<vmem>>, vector<1x1x1x11x32xbf16>
    %337 = vector.shape_cast %336 : vector<1x1x1x11x32xbf16> to vector<11x32xbf16>
    %c112 = arith.constant 112 : index
    %c0_740 = arith.constant 0 : index
    %338 = vector.load %arg7[%c112, %c0_740] : memref<128x512xbf16, #tpu.memory_space<vmem>>, vector<11x32xbf16>
    tpu.vector_store %arg7[%c112, %c0_740], %337 {strides = array<i32>} : memref<128x512xbf16, #tpu.memory_space<vmem>>, vector<11x32xbf16>,
    %c0_741 = arith.constant 0 : index
    %c0_742 = arith.constant 0 : index
    %c29_743 = arith.constant 29 : index
    %c0_744 = arith.constant 0 : index
    %c0_745 = arith.constant 0 : index
    %339 = vector.load %arg2[%c0_741, %c0_742, %c29_743, %c0_744, %c0_745] : memref<1x1x36x12x32xbf16, #tpu.memory_space<vmem>>, vector<1x1x1x11x32xbf16>
    %340 = vector.shape_cast %339 : vector<1x1x1x11x32xbf16> to vector<11x32xbf16>
    %c112_746 = arith.constant 112 : index
    %c32_747 = arith.constant 32 : index
    %341 = vector.load %arg7[%c112_746, %c32_747] : memref<128x512xbf16, #tpu.memory_space<vmem>>, vector<11x32xbf16>
    tpu.vector_store %arg7[%c112_746, %c32_747], %340 {strides = array<i32>} : memref<128x512xbf16, #tpu.memory_space<vmem>>, vector<11x32xbf16>,
    %c0_748 = arith.constant 0 : index
    %c0_749 = arith.constant 0 : index
    %c28_750 = arith.constant 28 : index
    %c1_751 = arith.constant 1 : index
    %c0_752 = arith.constant 0 : index
    %342 = vector.load %arg2[%c0_748, %c0_749, %c28_750, %c1_751, %c0_752] : memref<1x1x36x12x32xbf16, #tpu.memory_space<vmem>>, vector<1x1x1x11x32xbf16>
    %343 = vector.shape_cast %342 : vector<1x1x1x11x32xbf16> to vector<11x32xbf16>
    %c112_753 = arith.constant 112 : index
    %c64_754 = arith.constant 64 : index
    %344 = vector.load %arg7[%c112_753, %c64_754] : memref<128x512xbf16, #tpu.memory_space<vmem>>, vector<11x32xbf16>
    tpu.vector_store %arg7[%c112_753, %c64_754], %343 {strides = array<i32>} : memref<128x512xbf16, #tpu.memory_space<vmem>>, vector<11x32xbf16>,
    %c0_755 = arith.constant 0 : index
    %c0_756 = arith.constant 0 : index
    %c29_757 = arith.constant 29 : index
    %c1_758 = arith.constant 1 : index
    %c0_759 = arith.constant 0 : index
    %345 = vector.load %arg2[%c0_755, %c0_756, %c29_757, %c1_758, %c0_759] : memref<1x1x36x12x32xbf16, #tpu.memory_space<vmem>>, vector<1x1x1x11x32xbf16>
    %346 = vector.shape_cast %345 : vector<1x1x1x11x32xbf16> to vector<11x32xbf16>
    %c112_760 = arith.constant 112 : index
    %c96_761 = arith.constant 96 : index
    %347 = vector.load %arg7[%c112_760, %c96_761] : memref<128x512xbf16, #tpu.memory_space<vmem>>, vector<11x32xbf16>
    tpu.vector_store %arg7[%c112_760, %c96_761], %346 {strides = array<i32>} : memref<128x512xbf16, #tpu.memory_space<vmem>>, vector<11x32xbf16>,
    %c0_762 = arith.constant 0 : index
    %c0_763 = arith.constant 0 : index
    %c30_764 = arith.constant 30 : index
    %c0_765 = arith.constant 0 : index
    %c0_766 = arith.constant 0 : index
    %348 = vector.load %arg2[%c0_762, %c0_763, %c30_764, %c0_765, %c0_766] : memref<1x1x36x12x32xbf16, #tpu.memory_space<vmem>>, vector<1x1x1x11x32xbf16>
    %349 = vector.shape_cast %348 : vector<1x1x1x11x32xbf16> to vector<11x32xbf16>
    %c112_767 = arith.constant 112 : index
    %c128_768 = arith.constant 128 : index
    %350 = vector.load %arg7[%c112_767, %c128_768] : memref<128x512xbf16, #tpu.memory_space<vmem>>, vector<11x32xbf16>
    tpu.vector_store %arg7[%c112_767, %c128_768], %349 {strides = array<i32>} : memref<128x512xbf16, #tpu.memory_space<vmem>>, vector<11x32xbf16>,
    %c0_769 = arith.constant 0 : index
    %c0_770 = arith.constant 0 : index
    %c31_771 = arith.constant 31 : index
    %c0_772 = arith.constant 0 : index
    %c0_773 = arith.constant 0 : index
    %351 = vector.load %arg2[%c0_769, %c0_770, %c31_771, %c0_772, %c0_773] : memref<1x1x36x12x32xbf16, #tpu.memory_space<vmem>>, vector<1x1x1x11x32xbf16>
    %352 = vector.shape_cast %351 : vector<1x1x1x11x32xbf16> to vector<11x32xbf16>
    %c112_774 = arith.constant 112 : index
    %c160_775 = arith.constant 160 : index
    %353 = vector.load %arg7[%c112_774, %c160_775] : memref<128x512xbf16, #tpu.memory_space<vmem>>, vector<11x32xbf16>
    tpu.vector_store %arg7[%c112_774, %c160_775], %352 {strides = array<i32>} : memref<128x512xbf16, #tpu.memory_space<vmem>>, vector<11x32xbf16>,
    %c0_776 = arith.constant 0 : index
    %c0_777 = arith.constant 0 : index
    %c30_778 = arith.constant 30 : index
    %c1_779 = arith.constant 1 : index
    %c0_780 = arith.constant 0 : index
    %354 = vector.load %arg2[%c0_776, %c0_777, %c30_778, %c1_779, %c0_780] : memref<1x1x36x12x32xbf16, #tpu.memory_space<vmem>>, vector<1x1x1x11x32xbf16>
    %355 = vector.shape_cast %354 : vector<1x1x1x11x32xbf16> to vector<11x32xbf16>
    %c112_781 = arith.constant 112 : index
    %c192_782 = arith.constant 192 : index
    %356 = vector.load %arg7[%c112_781, %c192_782] : memref<128x512xbf16, #tpu.memory_space<vmem>>, vector<11x32xbf16>
    tpu.vector_store %arg7[%c112_781, %c192_782], %355 {strides = array<i32>} : memref<128x512xbf16, #tpu.memory_space<vmem>>, vector<11x32xbf16>,
    %c0_783 = arith.constant 0 : index
    %c0_784 = arith.constant 0 : index
    %c31_785 = arith.constant 31 : index
    %c1_786 = arith.constant 1 : index
    %c0_787 = arith.constant 0 : index
    %357 = vector.load %arg2[%c0_783, %c0_784, %c31_785, %c1_786, %c0_787] : memref<1x1x36x12x32xbf16, #tpu.memory_space<vmem>>, vector<1x1x1x11x32xbf16>
    %358 = vector.shape_cast %357 : vector<1x1x1x11x32xbf16> to vector<11x32xbf16>
    %c112_788 = arith.constant 112 : index
    %c224_789 = arith.constant 224 : index
    %359 = vector.load %arg7[%c112_788, %c224_789] : memref<128x512xbf16, #tpu.memory_space<vmem>>, vector<11x32xbf16>
    tpu.vector_store %arg7[%c112_788, %c224_789], %358 {strides = array<i32>} : memref<128x512xbf16, #tpu.memory_space<vmem>>, vector<11x32xbf16>,
    %c0_790 = arith.constant 0 : index
    %c0_791 = arith.constant 0 : index
    %c32_792 = arith.constant 32 : index
    %c0_793 = arith.constant 0 : index
    %c0_794 = arith.constant 0 : index
    %360 = vector.load %arg2[%c0_790, %c0_791, %c32_792, %c0_793, %c0_794] : memref<1x1x36x12x32xbf16, #tpu.memory_space<vmem>>, vector<1x1x1x11x32xbf16>
    %361 = vector.shape_cast %360 : vector<1x1x1x11x32xbf16> to vector<11x32xbf16>
    %c112_795 = arith.constant 112 : index
    %c256_796 = arith.constant 256 : index
    %362 = vector.load %arg7[%c112_795, %c256_796] : memref<128x512xbf16, #tpu.memory_space<vmem>>, vector<11x32xbf16>
    tpu.vector_store %arg7[%c112_795, %c256_796], %361 {strides = array<i32>} : memref<128x512xbf16, #tpu.memory_space<vmem>>, vector<11x32xbf16>,
    %c0_797 = arith.constant 0 : index
    %c0_798 = arith.constant 0 : index
    %c33 = arith.constant 33 : index
    %c0_799 = arith.constant 0 : index
    %c0_800 = arith.constant 0 : index
    %363 = vector.load %arg2[%c0_797, %c0_798, %c33, %c0_799, %c0_800] : memref<1x1x36x12x32xbf16, #tpu.memory_space<vmem>>, vector<1x1x1x11x32xbf16>
    %364 = vector.shape_cast %363 : vector<1x1x1x11x32xbf16> to vector<11x32xbf16>
    %c112_801 = arith.constant 112 : index
    %c288_802 = arith.constant 288 : index
    %365 = vector.load %arg7[%c112_801, %c288_802] : memref<128x512xbf16, #tpu.memory_space<vmem>>, vector<11x32xbf16>
    tpu.vector_store %arg7[%c112_801, %c288_802], %364 {strides = array<i32>} : memref<128x512xbf16, #tpu.memory_space<vmem>>, vector<11x32xbf16>,
    %c0_803 = arith.constant 0 : index
    %c0_804 = arith.constant 0 : index
    %c32_805 = arith.constant 32 : index
    %c1_806 = arith.constant 1 : index
    %c0_807 = arith.constant 0 : index
    %366 = vector.load %arg2[%c0_803, %c0_804, %c32_805, %c1_806, %c0_807] : memref<1x1x36x12x32xbf16, #tpu.memory_space<vmem>>, vector<1x1x1x11x32xbf16>
    %367 = vector.shape_cast %366 : vector<1x1x1x11x32xbf16> to vector<11x32xbf16>
    %c112_808 = arith.constant 112 : index
    %c320_809 = arith.constant 320 : index
    %368 = vector.load %arg7[%c112_808, %c320_809] : memref<128x512xbf16, #tpu.memory_space<vmem>>, vector<11x32xbf16>
    tpu.vector_store %arg7[%c112_808, %c320_809], %367 {strides = array<i32>} : memref<128x512xbf16, #tpu.memory_space<vmem>>, vector<11x32xbf16>,
    %c0_810 = arith.constant 0 : index
    %c0_811 = arith.constant 0 : index
    %c33_812 = arith.constant 33 : index
    %c1_813 = arith.constant 1 : index
    %c0_814 = arith.constant 0 : index
    %369 = vector.load %arg2[%c0_810, %c0_811, %c33_812, %c1_813, %c0_814] : memref<1x1x36x12x32xbf16, #tpu.memory_space<vmem>>, vector<1x1x1x11x32xbf16>
    %370 = vector.shape_cast %369 : vector<1x1x1x11x32xbf16> to vector<11x32xbf16>
    %c112_815 = arith.constant 112 : index
    %c352_816 = arith.constant 352 : index
    %371 = vector.load %arg7[%c112_815, %c352_816] : memref<128x512xbf16, #tpu.memory_space<vmem>>, vector<11x32xbf16>
    tpu.vector_store %arg7[%c112_815, %c352_816], %370 {strides = array<i32>} : memref<128x512xbf16, #tpu.memory_space<vmem>>, vector<11x32xbf16>,
    %c0_817 = arith.constant 0 : index
    %c0_818 = arith.constant 0 : index
    %c34 = arith.constant 34 : index
    %c0_819 = arith.constant 0 : index
    %c0_820 = arith.constant 0 : index
    %372 = vector.load %arg2[%c0_817, %c0_818, %c34, %c0_819, %c0_820] : memref<1x1x36x12x32xbf16, #tpu.memory_space<vmem>>, vector<1x1x1x11x32xbf16>
    %373 = vector.shape_cast %372 : vector<1x1x1x11x32xbf16> to vector<11x32xbf16>
    %c112_821 = arith.constant 112 : index
    %c384_822 = arith.constant 384 : index
    %374 = vector.load %arg7[%c112_821, %c384_822] : memref<128x512xbf16, #tpu.memory_space<vmem>>, vector<11x32xbf16>
    tpu.vector_store %arg7[%c112_821, %c384_822], %373 {strides = array<i32>} : memref<128x512xbf16, #tpu.memory_space<vmem>>, vector<11x32xbf16>,
    %c0_823 = arith.constant 0 : index
    %c0_824 = arith.constant 0 : index
    %c35 = arith.constant 35 : index
    %c0_825 = arith.constant 0 : index
    %c0_826 = arith.constant 0 : index
    %375 = vector.load %arg2[%c0_823, %c0_824, %c35, %c0_825, %c0_826] : memref<1x1x36x12x32xbf16, #tpu.memory_space<vmem>>, vector<1x1x1x11x32xbf16>
    %376 = vector.shape_cast %375 : vector<1x1x1x11x32xbf16> to vector<11x32xbf16>
    %c112_827 = arith.constant 112 : index
    %c416_828 = arith.constant 416 : index
    %377 = vector.load %arg7[%c112_827, %c416_828] : memref<128x512xbf16, #tpu.memory_space<vmem>>, vector<11x32xbf16>
    tpu.vector_store %arg7[%c112_827, %c416_828], %376 {strides = array<i32>} : memref<128x512xbf16, #tpu.memory_space<vmem>>, vector<11x32xbf16>,
    %c0_829 = arith.constant 0 : index
    %c0_830 = arith.constant 0 : index
    %c34_831 = arith.constant 34 : index
    %c1_832 = arith.constant 1 : index
    %c0_833 = arith.constant 0 : index
    %378 = vector.load %arg2[%c0_829, %c0_830, %c34_831, %c1_832, %c0_833] : memref<1x1x36x12x32xbf16, #tpu.memory_space<vmem>>, vector<1x1x1x11x32xbf16>
    %379 = vector.shape_cast %378 : vector<1x1x1x11x32xbf16> to vector<11x32xbf16>
    %c112_834 = arith.constant 112 : index
    %c448_835 = arith.constant 448 : index
    %380 = vector.load %arg7[%c112_834, %c448_835] : memref<128x512xbf16, #tpu.memory_space<vmem>>, vector<11x32xbf16>
    tpu.vector_store %arg7[%c112_834, %c448_835], %379 {strides = array<i32>} : memref<128x512xbf16, #tpu.memory_space<vmem>>, vector<11x32xbf16>,
    %c0_836 = arith.constant 0 : index
    %c0_837 = arith.constant 0 : index
    %c35_838 = arith.constant 35 : index
    %c1_839 = arith.constant 1 : index
    %c0_840 = arith.constant 0 : index
    %381 = vector.load %arg2[%c0_836, %c0_837, %c35_838, %c1_839, %c0_840] : memref<1x1x36x12x32xbf16, #tpu.memory_space<vmem>>, vector<1x1x1x11x32xbf16>
    %382 = vector.shape_cast %381 : vector<1x1x1x11x32xbf16> to vector<11x32xbf16>
    %c112_841 = arith.constant 112 : index
    %c480_842 = arith.constant 480 : index
    %383 = vector.load %arg7[%c112_841, %c480_842] : memref<128x512xbf16, #tpu.memory_space<vmem>>, vector<11x32xbf16>
    tpu.vector_store %arg7[%c112_841, %c480_842], %382 {strides = array<i32>} : memref<128x512xbf16, #tpu.memory_space<vmem>>, vector<11x32xbf16>,
    %c0_843 = arith.constant 0 : index
    %c0_844 = arith.constant 0 : index
    %384 = vector.load %arg7[%c0_843, %c0_844] : memref<128x512xbf16, #tpu.memory_space<vmem>>, vector<128x512xbf16>
    %c0_845 = arith.constant 0 : index
    %c0_846 = arith.constant 0 : index
    %385 = vector.load %arg3[%c0_845, %c0_846] : memref<512x64xbf16, #tpu.memory_space<vmem>>, vector<512x64xbf16>
    %cst = arith.constant dense<0.000000e+00> : vector<128x64xf32>
    %386 = tpu.matmul %384, %385, %cst {dimension_numbers = #tpu.dot_dimension_numbers<[1], [0], [0], [1], [0, 0, 1, 1], [], []>} : vector<128x512xbf16>, vector<512x64xbf16>, vector<128x64xf32> -> vector<128x64xf32>
    %c0_847 = arith.constant 0 : index
    %c0_848 = arith.constant 0 : index
    %387 = vector.load %arg4[%c0_847, %c0_848] : memref<1x64xf32, #tpu.memory_space<vmem>>, vector<1x64xf32>
    %388 = vector.broadcast %387 : vector<1x64xf32> to vector<128x64xf32>
    %389 = arith.mulf %386, %388 : vector<128x64xf32>
    %c0_849 = arith.constant 0 : index
    %c0_850 = arith.constant 0 : index
    %390 = vector.load %arg5[%c0_849, %c0_850] : memref<1x64xf32, #tpu.memory_space<vmem>>, vector<1x64xf32>
    %391 = vector.broadcast %390 : vector<1x64xf32> to vector<128x64xf32>
    %392 = arith.addf %389, %391 : vector<128x64xf32>
    %cst_851 = arith.constant 0.000000e+00 : f32
    %393 = vector.broadcast %cst_851 : f32 to vector<128x64xf32>
    %394 = arith.cmpf oge, %392, %393 : vector<128x64xf32>
    %cst_852 = arith.constant 2.000000e-01 : f32
    %395 = vector.broadcast %cst_852 : f32 to vector<128x64xf32>
    %396 = arith.mulf %395, %392 : vector<128x64xf32>
    %397 = arith.select %394, %392, %396 : vector<128x64xi1>, vector<128x64xf32>
    %398 = arith.truncf %397 : vector<128x64xf32> to vector<128x64xbf16>
    %399 = vector.extract_strided_slice %398 {offsets = [0, 0], sizes = [11, 64], strides = [1, 1]} : vector<128x64xbf16> to vector<11x64xbf16>
    %c0_853 = arith.constant 0 : index
    %c0_854 = arith.constant 0 : index
    %c0_855 = arith.constant 0 : index
    %c0_856 = arith.constant 0 : index
    %400 = vector.load %arg6[%c0_853, %c0_854, %c0_855, %c0_856] : memref<1x8x11x64xbf16, #tpu.memory_space<vmem>>, vector<1x1x11x64xbf16>
    %401 = vector.shape_cast %400 : vector<1x1x11x64xbf16> to vector<11x64xbf16>
    %402 = vector.shape_cast %399 : vector<11x64xbf16> to vector<1x1x11x64xbf16>
    tpu.vector_store %arg6[%c0_853, %c0_854, %c0_855, %c0_856], %402 {strides = array<i32>} : memref<1x8x11x64xbf16, #tpu.memory_space<vmem>>, vector<1x1x11x64xbf16>,
    %403 = vector.extract_strided_slice %398 {offsets = [16, 0], sizes = [11, 64], strides = [1, 1]} : vector<128x64xbf16> to vector<11x64xbf16>
    %c0_857 = arith.constant 0 : index
    %c1_858 = arith.constant 1 : index
    %c0_859 = arith.constant 0 : index
    %c0_860 = arith.constant 0 : index
    %404 = vector.load %arg6[%c0_857, %c1_858, %c0_859, %c0_860] : memref<1x8x11x64xbf16, #tpu.memory_space<vmem>>, vector<1x1x11x64xbf16>
    %405 = vector.shape_cast %404 : vector<1x1x11x64xbf16> to vector<11x64xbf16>
    %406 = vector.shape_cast %403 : vector<11x64xbf16> to vector<1x1x11x64xbf16>
    tpu.vector_store %arg6[%c0_857, %c1_858, %c0_859, %c0_860], %406 {strides = array<i32>} : memref<1x8x11x64xbf16, #tpu.memory_space<vmem>>, vector<1x1x11x64xbf16>,
    %407 = vector.extract_strided_slice %398 {offsets = [32, 0], sizes = [11, 64], strides = [1, 1]} : vector<128x64xbf16> to vector<11x64xbf16>
    %c0_861 = arith.constant 0 : index
    %c2_862 = arith.constant 2 : index
    %c0_863 = arith.constant 0 : index
    %c0_864 = arith.constant 0 : index
    %408 = vector.load %arg6[%c0_861, %c2_862, %c0_863, %c0_864] : memref<1x8x11x64xbf16, #tpu.memory_space<vmem>>, vector<1x1x11x64xbf16>
    %409 = vector.shape_cast %408 : vector<1x1x11x64xbf16> to vector<11x64xbf16>
    %410 = vector.shape_cast %407 : vector<11x64xbf16> to vector<1x1x11x64xbf16>
    tpu.vector_store %arg6[%c0_861, %c2_862, %c0_863, %c0_864], %410 {strides = array<i32>} : memref<1x8x11x64xbf16, #tpu.memory_space<vmem>>, vector<1x1x11x64xbf16>,
    %411 = vector.extract_strided_slice %398 {offsets = [48, 0], sizes = [11, 64], strides = [1, 1]} : vector<128x64xbf16> to vector<11x64xbf16>
    %c0_865 = arith.constant 0 : index
    %c3_866 = arith.constant 3 : index
    %c0_867 = arith.constant 0 : index
    %c0_868 = arith.constant 0 : index
    %412 = vector.load %arg6[%c0_865, %c3_866, %c0_867, %c0_868] : memref<1x8x11x64xbf16, #tpu.memory_space<vmem>>, vector<1x1x11x64xbf16>
    %413 = vector.shape_cast %412 : vector<1x1x11x64xbf16> to vector<11x64xbf16>
    %414 = vector.shape_cast %411 : vector<11x64xbf16> to vector<1x1x11x64xbf16>
    tpu.vector_store %arg6[%c0_865, %c3_866, %c0_867, %c0_868], %414 {strides = array<i32>} : memref<1x8x11x64xbf16, #tpu.memory_space<vmem>>, vector<1x1x11x64xbf16>,
    %415 = vector.extract_strided_slice %398 {offsets = [64, 0], sizes = [11, 64], strides = [1, 1]} : vector<128x64xbf16> to vector<11x64xbf16>
    %c0_869 = arith.constant 0 : index
    %c4_870 = arith.constant 4 : index
    %c0_871 = arith.constant 0 : index
    %c0_872 = arith.constant 0 : index
    %416 = vector.load %arg6[%c0_869, %c4_870, %c0_871, %c0_872] : memref<1x8x11x64xbf16, #tpu.memory_space<vmem>>, vector<1x1x11x64xbf16>
    %417 = vector.shape_cast %416 : vector<1x1x11x64xbf16> to vector<11x64xbf16>
    %418 = vector.shape_cast %415 : vector<11x64xbf16> to vector<1x1x11x64xbf16>
    tpu.vector_store %arg6[%c0_869, %c4_870, %c0_871, %c0_872], %418 {strides = array<i32>} : memref<1x8x11x64xbf16, #tpu.memory_space<vmem>>, vector<1x1x11x64xbf16>,
    %419 = vector.extract_strided_slice %398 {offsets = [80, 0], sizes = [11, 64], strides = [1, 1]} : vector<128x64xbf16> to vector<11x64xbf16>
    %c0_873 = arith.constant 0 : index
    %c5_874 = arith.constant 5 : index
    %c0_875 = arith.constant 0 : index
    %c0_876 = arith.constant 0 : index
    %420 = vector.load %arg6[%c0_873, %c5_874, %c0_875, %c0_876] : memref<1x8x11x64xbf16, #tpu.memory_space<vmem>>, vector<1x1x11x64xbf16>
    %421 = vector.shape_cast %420 : vector<1x1x11x64xbf16> to vector<11x64xbf16>
    %422 = vector.shape_cast %419 : vector<11x64xbf16> to vector<1x1x11x64xbf16>
    tpu.vector_store %arg6[%c0_873, %c5_874, %c0_875, %c0_876], %422 {strides = array<i32>} : memref<1x8x11x64xbf16, #tpu.memory_space<vmem>>, vector<1x1x11x64xbf16>,
    %423 = vector.extract_strided_slice %398 {offsets = [96, 0], sizes = [11, 64], strides = [1, 1]} : vector<128x64xbf16> to vector<11x64xbf16>
    %c0_877 = arith.constant 0 : index
    %c6_878 = arith.constant 6 : index
    %c0_879 = arith.constant 0 : index
    %c0_880 = arith.constant 0 : index
    %424 = vector.load %arg6[%c0_877, %c6_878, %c0_879, %c0_880] : memref<1x8x11x64xbf16, #tpu.memory_space<vmem>>, vector<1x1x11x64xbf16>
    %425 = vector.shape_cast %424 : vector<1x1x11x64xbf16> to vector<11x64xbf16>
    %426 = vector.shape_cast %423 : vector<11x64xbf16> to vector<1x1x11x64xbf16>
    tpu.vector_store %arg6[%c0_877, %c6_878, %c0_879, %c0_880], %426 {strides = array<i32>} : memref<1x8x11x64xbf16, #tpu.memory_space<vmem>>, vector<1x1x11x64xbf16>,
    %427 = vector.extract_strided_slice %398 {offsets = [112, 0], sizes = [11, 64], strides = [1, 1]} : vector<128x64xbf16> to vector<11x64xbf16>
    %c0_881 = arith.constant 0 : index
    %c7_882 = arith.constant 7 : index
    %c0_883 = arith.constant 0 : index
    %c0_884 = arith.constant 0 : index
    %428 = vector.load %arg6[%c0_881, %c7_882, %c0_883, %c0_884] : memref<1x8x11x64xbf16, #tpu.memory_space<vmem>>, vector<1x1x11x64xbf16>
    %429 = vector.shape_cast %428 : vector<1x1x11x64xbf16> to vector<11x64xbf16>
    %430 = vector.shape_cast %427 : vector<11x64xbf16> to vector<1x1x11x64xbf16>
    tpu.vector_store %arg6[%c0_881, %c7_882, %c0_883, %c0_884], %430 {strides = array<i32>} : memref<1x8x11x64xbf16, #tpu.memory_space<vmem>>, vector<1x1x11x64xbf16>,
    return
  }
  func.func @transform_0(%arg0: i32, %arg1: i32) -> (i32, i32, i32, i32, i32) {
    %c0_i32 = arith.constant 0 : i32
    %c0_i32_0 = arith.constant 0 : i32
    %c0_i32_1 = arith.constant 0 : i32
    %c0_i32_2 = arith.constant 0 : i32
    return %arg0, %arg1, %c0_i32, %c0_i32_0, %c0_i32_1 : i32, i32, i32, i32, i32
  }
  func.func @transform_1(%arg0: i32, %arg1: i32) -> (i32, i32) {
    %c0_i32 = arith.constant 0 : i32
    %c0_i32_0 = arith.constant 0 : i32
    %c0_i32_1 = arith.constant 0 : i32
    return %c0_i32, %c0_i32_0 : i32, i32
  }
  func.func @transform_2(%arg0: i32, %arg1: i32) -> (i32, i32) {
    %c0_i32 = arith.constant 0 : i32
    %c0_i32_0 = arith.constant 0 : i32
    %c0_i32_1 = arith.constant 0 : i32
    return %c0_i32, %c0_i32_0 : i32, i32
  }
  func.func @transform_3(%arg0: i32, %arg1: i32) -> (i32, i32) {
    %c0_i32 = arith.constant 0 : i32
    %c0_i32_0 = arith.constant 0 : i32
    %c0_i32_1 = arith.constant 0 : i32
    return %c0_i32, %c0_i32_0 : i32, i32
  }
  func.func @transform_4(%arg0: i32, %arg1: i32) -> (i32, i32, i32, i32) {
    %c0_i32 = arith.constant 0 : i32
    %c0_i32_0 = arith.constant 0 : i32
    %c0_i32_1 = arith.constant 0 : i32
    return %arg0, %arg1, %c0_i32, %c0_i32_0 : i32, i32, i32, i32
  }
}

</mosaic_0001>

<bundles_post_ra>
// kernel: tpu_custom_call.1
= control target key start
LH: loop header
LB: loop body
LE: loop exit
PB: predicated region body
PF: predicated region fallthrough
CT: control target
= control target key end

     0   :  { %s3956_s15 = smov 0   ;;  %s3958_s16 = smov 0   ;;  %s4712_s0 = inlined_call_operand.vmem [shape: bf16[1,2,36,12,32], index: 0, kind: input, shape index: {}]   ;;  %s4713_s1 = inlined_call_operand.vmem [shape: bf16[512,64], index: 1, kind: input, shape index: {}]   ;;  %s4714_s2 = inlined_call_operand.vmem [shape: f32[1,64], index: 2, kind: input, shape index: {}]   ;;  %s4715_s3 = inlined_call_operand.vmem [shape: f32[1,64], index: 3, kind: input, shape index: {}]   ;;  %s4716_s4 = inlined_call_operand.vmem [shape: bf16[1,16,11,64], index: 4, kind: output, shape index: {}]  }
   0x1   :  { %s3960_s17 = smov 0  }
   0x2 LB: > { %s23_s18 = sadd.s32 1, %s3922_s16  ;;  %p3113_p0 = scmp.ge.s32.totalorder %s3926_s17, 1  ;;  %s3926_s17 = sphi %s3960_s17, %s14_s17   ;;  %s3922_s16 = sphi %s3958_s16, %s4728_s16   ;;  %s3918_s15 = sphi %s3956_s15, %s4727_s15  }
   0x3   : > { %p24_p1 = scmp.ge.s32.totalorder %s23_s18, 2  ;;  %p182_p2 = scmp.lt.s32.totalorder %s3926_s17, 3 }
   0x5   : > { %s4730_s18 = smov (%p24_p1, %s23_s18), 0  ;;  %p183_p3 = pnand %p3113_p0, %p182_p2 }
   0x6   : > { %p219_p4 = scmp.lt.s32.totalorder (!%p183_p3), %s3918_s15, 1  ;;  %s3928_s24 = smov (!%p183_p3), 32   ;;  %v3820_v19 = vld [vmem:[%s4713_s1 + $0x40] sm:$0xff] (!%p183_p3)   ;;  %v3828_v43 = vld [vmem:[%s4713_s1 + $0x48] sm:$0xff] (!%p183_p3)   ;;  %v3834_v63 = vld [vmem:[%s4713_s1 + $0x50] sm:$0xff] (!%p183_p3)   ;;  %vm246_vm1 = vcmask (!%p183_p3), 259072  }
   0x7   : > { %186 = sbr.rel (%p183_p3) target bundleno = 564 (0x234), region = 36  ;;  %3588 = vmatprep.subr.bf16.mxu0 (!%p183_p3), %v3820_v19  ;;  %v3821_v26 = vld [vmem:[%s4713_s1 + $0xc0] sm:$0xff] (!%p183_p3)   ;;  %s3929_s5 = smov (!%p183_p3), 64   ;;  %v3829_v50 = vld [vmem:[%s4713_s1 + $0xc8] sm:$0xff] (!%p183_p3)   ;;  %vm247_vm0 = vsmask.f32 (!%p183_p3), 5376 }
   0x8   : > { %v3824_v28 = vld [vmem:[%s4713_s1] sm:$0xff] (!%p183_p3)   ;;  %3652 = vmatprep.subr.bf16.mxu1 (!%p183_p3), %v3821_v26  ;;  %v3832_v52 = vld [vmem:[%s4713_s1 + $0x8] sm:$0xff] (!%p183_p3)   ;;  %s3930_s28 = smov (!%p183_p3), 96   ;;  %v3843_v26 = vld [vmem:[%s4713_s1 + $0xd8] sm:$0xff] (!%p183_p3)   ;;  %vm263_vm3 = vcmask (!%p183_p3), 521472   ;;  %vm285_vm5 = vcmask (!%p183_p3), 783872  }
   0x9   : > { %3589 = vmatpush3.bf16.msra.mxu0 (!%p183_p3), %v3824_v28  ;;  %v3825_v40 = vld [vmem:[%s4713_s1 + $0x80] sm:$0xff] (!%p183_p3)   ;;  %v3833_v58 = vld [vmem:[%s4713_s1 + $0x88] sm:$0xff] (!%p183_p3)   ;;  %vm4155_vm2 = vmand (!%p183_p3), %vm246_vm1, %vm247_vm0  ;;  %vm307_vm7 = vcmask (!%p183_p3), 1046272   ;;  %vm2923_vm10 = vcmask (!%p183_p3), 517120   ;;  %vm2924_vm11 = vsmask.f32 (!%p183_p3), 1280 }
   0xa   : > { %3653 = vmatpush3.bf16.msra.mxu1 (!%p183_p3), %v3825_v40  ;;  %3590 = vmatprep.subr.bf16.mxu0 (!%p183_p3), %v3828_v43  ;;  %v3848_v40 = vld [vmem:[%s4713_s1 + $0x60] sm:$0xff] (!%p183_p3)   ;;  %vm4244_vm4 = vmand (!%p183_p3), %vm263_vm3, %vm247_vm0  ;;  %vm2921_vm12 = vcmask (!%p183_p3), 519168  }
   0xb   : > { %3654 = vmatprep.subr.bf16.mxu1 (!%p183_p3), %v3829_v50  ;;  %v3849_v43 = vld [vmem:[%s4713_s1 + $0xe0] sm:$0xff] (!%p183_p3)   ;;  %vm4302_vm6 = vmand (!%p183_p3), %vm285_vm5, %vm247_vm0 }
   0xc   : > { %vm4339_vm8 = vmand (!%p183_p3), %vm307_vm7, %vm247_vm0 }
   0xd   : > { %3591 = vmatpush3.bf16.msra.mxu0 (!%p183_p3), %v3832_v52  ;;  %vm4623_vm14 = vmand (!%p183_p3), %vm2923_vm10, %vm2924_vm11 }
   0xe   : > { %s220_s19 = scalar_select %p219_p4, %s3918_s15, 1  ;;  %3655 = vmatpush3.bf16.msra.mxu1 %v3833_v58  ;;  %3592 = vmatprep.subr.bf16.mxu0 %v3834_v63 }
  0x10   : > { %s3716_s20 = smul.u32 288, %s220_s19 }
  0x12   : > { %s3981_s23 = scalar_lea.vmem %s4712_s0, %s3716_s20 }
  0x13   : > { %v3744_v0 = vld [vmem:[%s3981_s23 + $0x18] sm:$0x3f]   ;;  %v3745_v1 = vld [vmem:[%s3981_s23 + $0x8] sm:$0x3f]   ;;  %v3752_v7 = vld [vmem:[%s3981_s23 + $0x10] sm:$0x3f]  }
  0x14   : > { %332 = vrot.lane.b32.xlu0 %v3744_v0, %s3928_s24  ;;  %v3746_v2 = vld [vmem:[%s3981_s23 + $0x38] sm:$0x3f]   ;;  %260 = vrot.lane.b32.xlu1 %v3745_v1, %s3928_s24  ;;  %v3747_v3 = vld [vmem:[%s3981_s23 + $0x28] sm:$0x3f]   ;;  %v346_v10 = vshrl.u32 %v3752_v7, 16  ;;  %v348_v11 = vshll.u32 %v3752_v7, 16 }
  0x15   : > { %v3748_v4 = vld [vmem:[%s3981_s23 + $0x38] sm:$0x3f]   ;;  %v3750_v6 = vld [vmem:[%s3981_s23 + $0x28] sm:$0x3f]   ;;  %v3753_v9 = vld [vmem:[%s3981_s23 + $0x30] sm:$0x3f]  }
  0x16   : > { %v3749_v5 = vld [vmem:[%s3981_s23 + $0x58] sm:$0x3f]   ;;  %v3751_v8 = vld [vmem:[%s3981_s23 + $0x48] sm:$0x3f]   ;;  %v478_v12 = vshrl.u32 %v3753_v9, 16  ;;  %v480_v13 = vshll.u32 %v3753_v9, 16 }
  0x17   : > { %v3754_v14 = vld [vmem:[%s3981_s23] sm:$0x3f]   ;;  %v350_v15 = vrot.slane %v348_v11, 1  ;;  %v3758_v29 = vld [vmem:[%s3981_s23 + $0x30] sm:$0x3f]  }
  0x18   : > { %464 = vrot.lane.b32.xlu0 %v3746_v2, %s3928_s24  ;;  %398 = vrot.lane.b32.xlu1 %v3747_v3, %s3928_s24  ;;  %v3755_v16 = vld [vmem:[%s3981_s23 + $0x20] sm:$0x3f]   ;;  %v482_v17 = vrot.slane %v480_v13, 1  ;;  %v278_v18 = vshll.u32 %v3754_v14, 16  ;;  %v276_v21 = vshrl.u32 %v3754_v14, 16  ;;  %v608_v33 = vshll.u32 %v3758_v29, 16 }
  0x19   : > { %v351_v20 = vor.u32 %v350_v15, %v346_v10  ;;  %v412_v22 = vshrl.u32 %v3755_v16, 16  ;;  %v414_v23 = vshll.u32 %v3755_v16, 16  ;;  %v3759_v31 = vld [vmem:[%s3981_s23 + $0x50] sm:$0x3f]   ;;  %v3756_v34 = vld [vmem:[%s3981_s23 + $0x58] sm:$0x3f]  }
  0x1a   : > { %v483_v24 = vor.u32 %v482_v17, %v478_v12  ;;  %v280_v25 = vrot.slane %v278_v18, 1  ;;  %v740_v35 = vshll.u32 %v3759_v31, 16  ;;  %v3757_v36 = vld [vmem:[%s3981_s23 + $0x78] sm:$0x3f]   ;;  %v606_v37 = vshrl.u32 %v3758_v29, 16  ;;  %v3835_v1 = vld [vmem:[%s4713_s1 + $0xd0] sm:$0xff]  }
  0x1b   : > { %v416_v27 = vrot.slane %v414_v23, 1  ;;  %v610_v38 = vrot.slane %v608_v33, 1  ;;  %v738_v39 = vshrl.u32 %v3759_v31, 16  ;;  %v3762_v42 = vld [vmem:[%s3981_s23 + $0x18] sm:$0x3f]   ;;  %3656 = vmatprep.subr.bf16.mxu1 %v3835_v1  ;;  %v3838_v7 = vld [vmem:[%s4713_s1 + $0x10] sm:$0xff]  }
  0x1c   : > { %592 = vrot.lane.b32.xlu0 %v3748_v4, %s3928_s24  ;;  %724 = vrot.lane.b32.xlu1 %v3749_v5, %s3928_s24  ;;  %v281_v30 = vor.u32 %v280_v25, %v276_v21  ;;  %v742_v41 = vrot.slane %v740_v35, 1  ;;  %v3763_v44 = vld [vmem:[%s3981_s23 + $0x38] sm:$0x3f]   ;;  %v368_v45 = vshll.u32 %v3762_v42, 16  ;;  %v3764_v46 = vld [vmem:[%s3981_s23 + $0x20] sm:$0x3f]  }
  0x1d   : > { %v417_v32 = vor.u32 %v416_v27, %v412_v22  ;;  %v611_v47 = vor.u32 %v610_v38, %v606_v37  ;;  %v500_v48 = vshll.u32 %v3763_v44, 16  ;;  %v3765_v49 = vld [vmem:[%s3981_s23 + $0x40] sm:$0x3f]   ;;  %v3760_v53 = vld [vmem:[%s3981_s23 + $0x48] sm:$0x3f]   ;;  %v366_v54 = vshrl.u32 %v3762_v42, 16  ;;  %3593 = vmatpush3.bf16.msra.mxu0 %v3838_v7 }
  0x1e   : > { %v743_v51 = vor.u32 %v742_v41, %v738_v39  ;;  %v3766_v55 = vld [vmem:[%s3981_s23 + $0x8] sm:$0x3f]   ;;  %v498_v57 = vshrl.u32 %v3763_v44, 16  ;;  %v370_v59 = vrot.slane %v368_v45, 1  ;;  %v544_v61 = vshll.u32 %v3764_v46, 16  ;;  %v3839_v17 = vld [vmem:[%s4713_s1 + $0x90] sm:$0xff]  }
  0x1f   : > { %v3761_v56 = vld [vmem:[%s3981_s23 + $0x68] sm:$0x3f]   ;;  %v502_v60 = vrot.slane %v500_v48, 1  ;;  %v674_v62 = vshll.u32 %v3765_v49, 16  ;;  %v300_v2 = vshll.u32 %v3766_v55, 16  ;;  %v542_v4 = vshrl.u32 %v3764_v46, 16  ;;  %3657 = vmatpush3.bf16.msra.mxu1 %v3839_v17 }
  0x20   : > { %528 = vrot.lane.b32.xlu0 %v3750_v6, %s3928_s24  ;;  %658 = vrot.lane.b32.xlu1 %v3751_v8, %s3928_s24  ;;  %v3767_v0 = vld [vmem:[%s3981_s23 + $0x28] sm:$0x3f]   ;;  %v371_v3 = vor.u32 %v370_v59, %v366_v54  ;;  %v546_v5 = vrot.slane %v544_v61, 1  ;;  %v672_v6 = vshrl.u32 %v3765_v49, 16  ;;  %v298_v11 = vshrl.u32 %v3766_v55, 16  ;;  %v3846_v29 = vld [vmem:[%s4713_s1 + $0x18] sm:$0xff]  }
  0x21   : > { %v503_v8 = vor.u32 %v502_v60, %v498_v57  ;;  %v676_v9 = vrot.slane %v674_v62, 1  ;;  %v434_v10 = vshll.u32 %v3767_v0, 16  ;;  %v302_v12 = vrot.slane %v300_v2, 1  ;;  %v3770_v13 = vld [vmem:[%s3981_s23 + $0x50] sm:$0x3f]   ;;  %3658 = vmatprep.subr.bf16.mxu1 %v3843_v26  ;;  %v3852_v54 = vld [vmem:[%s4713_s1 + $0x20] sm:$0xff]  }
  0x22   : > { %v547_v14 = vor.u32 %v546_v5, %v542_v4  ;;  %v432_v15 = vshrl.u32 %v3767_v0, 16  ;;  %v3771_v16 = vld [vmem:[%s3981_s23 + $0x70] sm:$0x3f]   ;;  %v868_v22 = vshll.u32 %v3770_v13, 16  ;;  %v3768_v25 = vld [vmem:[%s3981_s23 + $0x78] sm:$0x3f]  }
  0x23   : > { %v677_v18 = vor.u32 %v676_v9, %v672_v6  ;;  %v436_v19 = vrot.slane %v434_v10, 1  ;;  %v303_v21 = vor.u32 %v302_v12, %v298_v11  ;;  %v3769_v27 = vld [vmem:[%s3981_s23 + $0x98] sm:$0x3f]   ;;  %v866_v28 = vshrl.u32 %v3770_v13, 16  ;;  %v3777_v39 = vld [vmem:[%s3981_s23 + $0x60] sm:$0x3f]  }
  0x24   : > { %352 = vrot.lane.b32.xlu0 %v351_v20, %s3929_s5  ;;  %484 = vrot.lane.b32.xlu1 %v483_v24, %s3929_s5  ;;  %v3842_v20 = vld [vmem:[%s4713_s1 + $0x58] sm:$0xff]   ;;  %v1000_v24 = vshll.u32 %v3771_v16, 16  ;;  %v998_v33 = vshrl.u32 %v3771_v16, 16  ;;  %v3772_v44 = vld [vmem:[%s3981_s23 + $0x68] sm:$0x3f]   ;;  %v934_v52 = vshll.u32 %v3777_v39, 16 }
  0x25   : > { %3594 = vmatprep.subr.bf16.mxu0 %v3842_v20  ;;  %v437_v23 = vor.u32 %v436_v19, %v432_v15  ;;  %v3774_v31 = vld [vmem:[%s3981_s23 + $0x38] sm:$0x3f]   ;;  %v3773_v45 = vld [vmem:[%s3981_s23 + $0x88] sm:$0x3f]   ;;  %v932_v61 = vshrl.u32 %v3777_v39, 16  ;;  %v3860_v16 = vld [vmem:[%s4713_s1 + $0x70] sm:$0xff]  }
  0x26   : > { %v3775_v35 = vld [vmem:[%s3981_s23 + $0x58] sm:$0x3f]   ;;  %3595 = vmatpush3.bf16.msra.mxu0 %v3846_v29  ;;  %v628_v38 = vshll.u32 %v3774_v31, 16  ;;  %v626_v46 = vshrl.u32 %v3774_v31, 16  ;;  %v3778_v50 = vld [vmem:[%s3981_s23 + $0x28] sm:$0x3f]  }
  0x27   : > { %v760_v42 = vshll.u32 %v3775_v35, 16  ;;  %3596 = vmatprep.subr.bf16.mxu0 %v3848_v40  ;;  %v564_v59 = vshll.u32 %v3778_v50, 16  ;;  %v936_v62 = vrot.slane %v934_v52, 1  ;;  %v3782_v0 = vld [vmem:[%s3981_s23 + $0x70] sm:$0x3f]   ;;  %v562_v1 = vshrl.u32 %v3778_v50, 16 }
  0x28   : > { %282 = vrot.lane.b32.xlu0 %v281_v30, %s3929_s5  ;;  %418 = vrot.lane.b32.xlu1 %v417_v32, %s3929_s5  ;;  %v870_v30 = vrot.slane %v868_v22, 1  ;;  %v3847_v32 = vld [vmem:[%s4713_s1 + $0x98] sm:$0xff]   ;;  %v630_v48 = vrot.slane %v628_v38, 1  ;;  %v3854_v2 = vld [vmem:[%s4713_s1 + $0x68] sm:$0xff]   ;;  %v1128_v11 = vshll.u32 %v3782_v0, 16 }
  0x29   : > { %3659 = vmatpush3.bf16.msra.mxu1 %v3847_v32  ;;  %v566_v4 = vrot.slane %v564_v59, 1  ;;  %v3855_v5 = vld [vmem:[%s4713_s1 + $0xe8] sm:$0xff]   ;;  %v937_v6 = vor.u32 %v936_v62, %v932_v61  ;;  %v3783_v9 = vld [vmem:[%s3981_s23 + $0x90] sm:$0x3f]   ;;  %v3780_v17 = vld [vmem:[%s3981_s23 + $0x98] sm:$0x3f]  }
  0x2a   : > { %v871_v37 = vor.u32 %v870_v30, %v866_v28  ;;  %3660 = vmatprep.subr.bf16.mxu1 %v3849_v43  ;;  %v631_v57 = vor.u32 %v630_v48, %v626_v46  ;;  %3597 = vmatpush3.bf16.msra.mxu0 %v3852_v54  ;;  %v3858_v10 = vld [vmem:[%s4713_s1 + $0x28] sm:$0xff]   ;;  %v1260_v15 = vshll.u32 %v3783_v9, 16  ;;  %v1130_v19 = vrot.slane %v1128_v11, 1  ;;  %v3861_v20 = vld [vmem:[%s4713_s1 + $0xf0] sm:$0xff]   ;;  %v3787_v22 = vld [vmem:[%s3981_s23 + $0x78] sm:$0x3f]  }
  0x2b   : > { %3598 = vmatprep.subr.bf16.mxu0 %v3854_v2  ;;  %v3859_v12 = vld [vmem:[%s4713_s1 + $0xa8] sm:$0xff]   ;;  %v567_v13 = vor.u32 %v566_v4, %v562_v1  ;;  %v3788_v26 = vld [vmem:[%s3981_s23 + $0x60] sm:$0x3f]   ;;  %v1020_v30 = vshll.u32 %v3787_v22, 16  ;;  %v3865_v31 = vld [vmem:[%s4713_s1 + $0xb0] sm:$0xff]  }
  0x2c   : > { %852 = vrot.lane.b32.xlu0 %v3756_v34, %s3928_s24  ;;  %984 = vrot.lane.b32.xlu1 %v3757_v36, %s3928_s24  ;;  %v1002_v34 = vrot.slane %v1000_v24, 1  ;;  %v3776_v36 = vld [vmem:[%s3981_s23 + $0x40] sm:$0x3f]   ;;  %v1258_v24 = vshrl.u32 %v3783_v9, 16  ;;  %v1064_v38 = vshll.u32 %v3788_v26, 16  ;;  %v3869_v48 = vld [vmem:[%s4713_s1 + $0xf8] sm:$0xff]  }
  0x2d   : > { %v804_v49 = vshll.u32 %v3776_v36, 16  ;;  %v802_v55 = vshrl.u32 %v3776_v36, 16  ;;  %v3785_v36 = vld [vmem:[%s3981_s23 + $0xa8] sm:$0x3f]   ;;  %v3873_v59 = vld [vmem:[%s4713_s1 + $0xb8] sm:$0xff]  }
  0x2e   : > { %v1003_v41 = vor.u32 %v1002_v34, %v998_v33  ;;  %3599 = vmatpush3.bf16.msra.mxu0 %v3858_v10  ;;  %v3789_v33 = vld [vmem:[%s3981_s23 + $0x80] sm:$0x3f]   ;;  %v3784_v34 = vld [vmem:[%s3981_s23 + $0x88] sm:$0x3f]   ;;  %v1066_v52 = vrot.slane %v1064_v38, 1 }
  0x2f   : > { %v806_v58 = vrot.slane %v804_v49, 1  ;;  %3600 = vmatprep.subr.bf16.mxu0 %v3860_v16  ;;  %v321_v39 = vld [vmem:[#allocation2 + $0x8] sm:$0x3f]  ;;  %v1062_v49 = vshrl.u32 %v3788_v26, 16  ;;  %v387_v2 = vld [vmem:[#allocation2 + $0x10] sm:$0x3f] }
  0x30   : > { %612 = vrot.lane.b32.xlu0 %v611_v47, %s3929_s5  ;;  %744 = vrot.lane.b32.xlu1 %v743_v51, %s3929_s5  ;;  %v758_v47 = vshrl.u32 %v3775_v35, 16  ;;  %v762_v51 = vrot.slane %v760_v42, 1  ;;  %v3790_v35 = vld [vmem:[%s3981_s23 + $0x48] sm:$0x3f]   ;;  %v1022_v42 = vrot.slane %v1020_v30, 1 }
  0x31   : > { %v3791_v46 = vld [vmem:[%s3981_s23 + $0x68] sm:$0x3f]   ;;  %v824_v50 = vshll.u32 %v3790_v35, 16  ;;  %v3806_v4 = vld [vmem:[%s3981_s23 + $0x30] sm:$0x3f]  }
  0x32   : > { %v763_v60 = vor.u32 %v762_v51, %v758_v47  ;;  %v249_v47 = vld [vmem:[#allocation2] sm:$0x3f]  ;;  %v3802_v51 = vld [vmem:[%s3981_s23 + $0x10] sm:$0x3f]   ;;  %v954_v62 = vshll.u32 %v3791_v46, 16 }
  0x33   : > { %v3807_v11 = vld [vmem:[%s3981_s23 + $0x20] sm:$0x3f]  }
  0x34   : > { %788 = vrot.lane.b32.xlu0 %v3760_v53, %s3928_s24  ;;  %918 = vrot.lane.b32.xlu1 %v3761_v56, %s3928_s24  ;;  %v3779_v53 = vld [vmem:[%s3981_s23 + $0x48] sm:$0x3f]   ;;  %v3853_v56 = vld [vmem:[%s4713_s1 + $0xa0] sm:$0xff]   ;;  %v956_v9 = vrot.slane %v954_v62, 1 }
  0x35   : > { %v694_v63 = vshll.u32 %v3779_v53, 16  ;;  %3661 = vmatpush3.bf16.msra.mxu1 %v3853_v56  ;;  %v692_v7 = vshrl.u32 %v3779_v53, 16  ;;  %v3872_v53 = vld [vmem:[%s4713_s1 + $0x38] sm:$0xff]   ;;  %v322_v56 = vsel %vm4155_vm2, %v3802_v51, %v321_v39  ;;  %v3801_v38 = vld [vmem:[%s3981_s23 + $0xa0] sm:$0x3f]  }
  0x36   : > { %3662 = vmatprep.subr.bf16.mxu1 %v3855_v5  ;;  %323 = vst [vmem:[#allocation2 + $0x8] sm:$0x3f] %v322_v56  ;;  %v1067_v5 = vor.u32 %v1066_v52, %v1062_v49  ;;  %v3797_v51 = vld [vmem:[%s3981_s23 + $0xc8] sm:$0x3f]  }
  0x38   : > { %372 = vrot.lane.b32.xlu0 %v371_v3, %s3930_s28  ;;  %504 = vrot.lane.b32.xlu1 %v503_v8, %s3930_s28  ;;  %v807_v3 = vor.u32 %v806_v58, %v802_v55  ;;  %v696_v8 = vrot.slane %v694_v63, 1  ;;  %v1192_v55 = vshrl.u32 %v3789_v33, 16  ;;  %v453_v58 = vld [vmem:[#allocation2 + $0x18] sm:$0x3f]  ;;  %v822_v63 = vshrl.u32 %v3790_v35, 16 }
  0x39   : > { %3663 = vmatpush3.bf16.msra.mxu1 %v3859_v12  ;;  %v454_v10 = vsel %vm4155_vm2, %v3806_v4, %v453_v58  ;;  %v582_v12 = vld [vmem:[#allocation2 + $0x28] sm:$0x3f]  ;;  %v3826_v4 = vld [vmem:[%s3981_s23 + $0x50] sm:$0x3f]  }
  0x3a   : > { %3664 = vmatprep.subr.bf16.mxu1 %v3861_v20  ;;  %455 = vst [vmem:[#allocation2 + $0x18] sm:$0x3f] %v454_v10  ;;  %v3792_v20 = vld [vmem:[%s3981_s23 + $0xb8] sm:$0x3f]  }
  0x3c   : > { %548 = vrot.lane.b32.xlu0 %v547_v14, %s3929_s5  ;;  %678 = vrot.lane.b32.xlu1 %v677_v18, %s3929_s5  ;;  %v697_v14 = vor.u32 %v696_v8, %v692_v7  ;;  %v1126_v18 = vshrl.u32 %v3782_v0, 16  ;;  %v826_v0 = vrot.slane %v824_v50, 1  ;;  %v952_v8 = vshrl.u32 %v3791_v46, 16  ;;  %v3796_v46 = vld [vmem:[%s3981_s23 + $0xa8] sm:$0x3f]  }
  0x3d   : > { %3665 = vmatpush3.bf16.msra.mxu1 %v3865_v31  ;;  %v1454_v50 = vshll.u32 %v3801_v38, 16 }
  0x3e   : > { %v1131_v28 = vor.u32 %v1130_v19, %v1126_v18  ;;  %3666 = vmatprep.subr.bf16.mxu1 %v3869_v48  ;;  %v957_v18 = vor.u32 %v956_v9, %v952_v8  ;;  %v3810_v19 = vld [vmem:[%s3981_s23 + $0x30] sm:$0x3f]   ;;  %v4233_v8 = vld [vmem:[%s3981_s23 + $0xb8] sm:$0x3f]  }
  0x40   : > { %304 = vrot.lane.b32.xlu0 %v303_v21, %s3930_s28  ;;  %438 = vrot.lane.b32.xlu1 %v437_v23, %s3930_s28  ;;  %v3786_v21 = vld [vmem:[%s3981_s23 + $0x58] sm:$0x3f]  }
  0x41   : > { %v3781_v23 = vld [vmem:[%s3981_s23 + $0xb8] sm:$0x3f]   ;;  %v888_v29 = vshll.u32 %v3786_v21, 16  ;;  %3667 = vmatpush3.bf16.msra.mxu1 %v3873_v59  ;;  %v1452_v59 = vshrl.u32 %v3801_v38, 16 }
  0x43   : > { %v890_v40 = vrot.slane %v888_v29, 1  ;;  %v3793_v29 = vld [vmem:[%s3981_s23 + $0xd8] sm:$0x3f]  }
  0x44   : > { %1112 = vrot.lane.b32.xlu0 %v3768_v25, %s3928_s24  ;;  %1244 = vrot.lane.b32.xlu1 %v3769_v27, %s3928_s24  ;;  %v1262_v25 = vrot.slane %v1260_v15, 1  ;;  %v3864_v27 = vld [vmem:[%s4713_s1 + $0x30] sm:$0xff]   ;;  %v827_v15 = vor.u32 %v826_v0, %v822_v63 }
  0x45   : > { %3601 = vmatpush3.bf16.msra.mxu0 %v3864_v27 }
  0x46   : > { %v1263_v32 = vor.u32 %v1262_v25, %v1258_v24  ;;  %v583_v24 = vsel %vm4155_vm2, %v3810_v19, %v582_v12  ;;  %v518_v25 = vld [vmem:[#allocation2 + $0x20] sm:$0x3f]  ;;  %v973_v12 = vld [vmem:[#allocation2 + $0x58] sm:$0x3f] }
  0x47   : > { %584 = vst [vmem:[#allocation2 + $0x28] sm:$0x3f] %v583_v24  ;;  %v467_v24 = vld [vmem:[#allocation2 + $0x18] sm:$0x3f] }
  0x48   : > { %872 = vrot.lane.b32.xlu0 %v871_v37, %s3929_s5  ;;  %1004 = vrot.lane.b32.xlu1 %v1003_v41, %s3929_s5  ;;  %v886_v37 = vshrl.u32 %v3786_v21, 16  ;;  %v1018_v41 = vshrl.u32 %v3787_v22, 16  ;;  %v3798_v21 = vld [vmem:[%s3981_s23 + $0x78] sm:$0x3f]   ;;  %v3811_v22 = vld [vmem:[%s3981_s23 + $0x50] sm:$0x3f]  }
  0x4a   : > { %v891_v54 = vor.u32 %v890_v40, %v886_v37  ;;  %v3815_v40 = vld [vmem:[%s3981_s23 + $0x40] sm:$0x3f]  }
  0x4c   : > { %1048 = vrot.lane.b32.xlu0 %v3772_v44, %s3928_s24  ;;  %1178 = vrot.lane.b32.xlu1 %v3773_v45, %s3928_s24  ;;  %v3868_v44 = vld [vmem:[%s4713_s1 + $0x78] sm:$0xff]   ;;  %v1194_v45 = vshll.u32 %v3789_v33, 16  ;;  %v647_v33 = vld [vmem:[#allocation2 + $0x30] sm:$0x3f] }
  0x4d   : > { %3602 = vmatprep.subr.bf16.mxu0 %v3868_v44  ;;  %v3805_v44 = vld [vmem:[%s3981_s23 + $0x88] sm:$0x3f]  }
  0x4e   : > { %v1196_v61 = vrot.slane %v1194_v45, 1  ;;  %3603 = vmatpush3.bf16.msra.mxu0 %v3872_v53  ;;  %v648_v45 = vsel %vm4155_vm2, %v3815_v40, %v647_v33  ;;  %v1212_v63 = vshrl.u32 %v3805_v44, 16 }
  0x4f   : > { %649 = vst [vmem:[#allocation2 + $0x30] sm:$0x3f] %v648_v45 }
  0x50   : > { %632 = vrot.lane.b32.xlu0 %v631_v57, %s3930_s28  ;;  %764 = vrot.lane.b32.xlu1 %v763_v60, %s3930_s28  ;;  %v3803_v57 = vld [vmem:[%s3981_s23] sm:$0x3f]   ;;  %v1023_v60 = vor.u32 %v1022_v42, %v1018_v41  ;;  %v1197_v7 = vor.u32 %v1196_v61, %v1192_v55  ;;  %v3804_v42 = vld [vmem:[%s3981_s23 + $0x68] sm:$0x3f]   ;;  %v1214_v55 = vshll.u32 %v3805_v44, 16 }
  0x51   : > { %v250_v1 = vsel %vm4155_vm2, %v3803_v57, %v249_v47  ;;  %v1146_v47 = vshrl.u32 %v3798_v21, 16  ;;  %v1082_v62 = vshrl.u32 %v3804_v42, 16 }
  0x52   : > { %251 = vst [vmem:[#allocation2] sm:$0x3f] %v250_v1  ;;  %v1216_v1 = vrot.slane %v1214_v55, 1  ;;  %v3816_v55 = vld [vmem:[%s3981_s23 + $0xc8] sm:$0x3f]  }
  0x54   : > { %808 = vrot.lane.b32.xlu0 %v807_v3, %s3929_s5  ;;  %938 = vrot.lane.b32.xlu1 %v937_v6, %s3929_s5  ;;  %v3794_v3 = vld [vmem:[%s3981_s23 + $0x90] sm:$0x3f]  }
  0x55   : > { %v3795_v6 = vld [vmem:[%s3981_s23 + $0xb0] sm:$0x3f]   ;;  %v1388_v16 = vshll.u32 %v3794_v3, 16  ;;  %v1386_v26 = vshrl.u32 %v3794_v3, 16 }
  0x56   : > { %v1518_v30 = vshrl.u32 %v3795_v6, 16  ;;  %v4225_v3 = vld [vmem:[%s3981_s23 + $0xd0] sm:$0x3f]  }
  0x57   : > { %v1390_v27 = vrot.slane %v1388_v16, 1 }
  0x58   : > { %568 = vrot.lane.b32.xlu0 %v567_v13, %s3930_s28  ;;  %698 = vrot.lane.b32.xlu1 %v697_v14, %s3930_s28  ;;  %v388_v13 = vsel %vm4155_vm2, %v3807_v11, %v387_v2  ;;  %v713_v14 = vld [vmem:[#allocation2 + $0x38] sm:$0x3f]  ;;  %v3812_v2 = vld [vmem:[%s3981_s23 + $0xb0] sm:$0x3f]  }
  0x59   : > { %389 = vst [vmem:[#allocation2 + $0x10] sm:$0x3f] %v388_v13  ;;  %v1391_v37 = vor.u32 %v1390_v27, %v1386_v26  ;;  %v3827_v11 = vld [vmem:[%s3981_s23 + $0x70] sm:$0x3f]   ;;  %v335_v13 = vld [vmem:[#allocation2 + $0x8] sm:$0x3f] }
  0x5a   : > { %v974_v16 = vsel %vm4155_vm2, %v3827_v11, %v973_v12  ;;  %v1648_v19 = vshll.u32 %v3812_v2, 16  ;;  %v1540_v27 = vshll.u32 %v4233_v8, 16 }
  0x5b   : > { %975 = vst [vmem:[#allocation2 + $0x58] sm:$0x3f] %v974_v16 }
  0x5c   : > { %1372 = vrot.lane.b32.xlu0 %v3780_v17, %s3928_s24  ;;  %1504 = vrot.lane.b32.xlu1 %v3781_v23, %s3928_s24  ;;  %v1520_v17 = vshll.u32 %v3795_v6, 16  ;;  %v3799_v23 = vld [vmem:[%s3981_s23 + $0x98] sm:$0x3f]  }
  0x5d   : > { %v1280_v35 = vshll.u32 %v3799_v23, 16  ;;  %v1278_v52 = vshrl.u32 %v3799_v23, 16 }
  0x5e   : > { %v1522_v31 = vrot.slane %v1520_v17, 1 }
  0x5f   : > { %v1282_v53 = vrot.slane %v1280_v35, 1  ;;  %v1778_v35 = vshrl.u32 %v4225_v3, 16 }
  0x60   : > { %1132 = vrot.lane.b32.xlu0 %v1131_v28, %s3929_s5  ;;  %1264 = vrot.lane.b32.xlu1 %v1263_v32, %s3929_s5  ;;  %v714_v28 = vsel %vm4155_vm2, %v3811_v22, %v713_v14  ;;  %v3814_v32 = vld [vmem:[%s3981_s23 + $0x20] sm:$0x3f]   ;;  %v1523_v41 = vor.u32 %v1522_v31, %v1518_v30  ;;  %v401_v30 = vld [vmem:[#allocation2 + $0x10] sm:$0x3f]  ;;  %v3809_v31 = vld [vmem:[%s3981_s23 + $0xf8] sm:$0x3f]  }
  0x61   : > { %715 = vst [vmem:[#allocation2 + $0x38] sm:$0x3f] %v714_v28  ;;  %v519_v39 = vsel %vm4155_vm2, %v3814_v32, %v518_v25  ;;  %v1283_v61 = vor.u32 %v1282_v53, %v1278_v52  ;;  %v265_v14 = vld [vmem:[#allocation2] sm:$0x3f]  ;;  %v3808_v25 = vld [vmem:[%s3981_s23 + $0xd8] sm:$0x3f]  }
  0x62   : > { %520 = vst [vmem:[#allocation2 + $0x20] sm:$0x3f] %v519_v39  ;;  %v4251_v22 = vld [vmem:[%s3981_s23 + $0xa0] sm:$0x3f]   ;;  %v595_v39 = vld [vmem:[#allocation2 + $0x28] sm:$0x3f] }
  0x63   : > { %v4260_v32 = vld [vmem:[%s3981_s23 + $0xc0] sm:$0x3f]  }
  0x64   : > { %1308 = vrot.lane.b32.xlu0 %v3784_v34, %s3928_s24  ;;  %1438 = vrot.lane.b32.xlu1 %v3785_v36, %s3928_s24  ;;  %v1148_v34 = vshll.u32 %v3798_v21, 16  ;;  %v3800_v36 = vld [vmem:[%s3981_s23 + $0x80] sm:$0x3f]   ;;  %v1217_v21 = vor.u32 %v1216_v1, %v1212_v63 }
  0x65   : > { %v1324_v49 = vshll.u32 %v3800_v36, 16  ;;  %v1322_v56 = vshrl.u32 %v3800_v36, 16  ;;  %v3840_v52 = vld [vmem:[%s3981_s23 + $0x40] sm:$0x3f]  }
  0x66   : > { %v1150_v48 = vrot.slane %v1148_v34, 1  ;;  %v1650_v34 = vrot.slane %v1648_v19, 1  ;;  %v3841_v63 = vld [vmem:[%s3981_s23 + $0x60] sm:$0x3f]  }
  0x67   : > { %v1326_v58 = vrot.slane %v1324_v49, 1 }
  0x68   : > { %892 = vrot.lane.b32.xlu0 %v891_v54, %s3930_s28  ;;  %1024 = vrot.lane.b32.xlu1 %v1023_v60, %s3930_s28  ;;  %v1084_v54 = vshll.u32 %v3804_v42, 16  ;;  %v1151_v57 = vor.u32 %v1150_v48, %v1146_v47  ;;  %v1456_v60 = vrot.slane %v1454_v50, 1  ;;  %v727_v45 = vld [vmem:[#allocation2 + $0x38] sm:$0x3f]  ;;  %v1584_v47 = vshll.u32 %v4251_v22, 16 }
  0x69   : > { %v1327_v6 = vor.u32 %v1326_v58, %v1322_v56  ;;  %v1714_v48 = vshll.u32 %v4260_v32, 16  ;;  %v778_v56 = vld [vmem:[#allocation2 + $0x40] sm:$0x3f] }
  0x6a   : > { %v1086_v0 = vrot.slane %v1084_v54, 1  ;;  %v1457_v9 = vor.u32 %v1456_v60, %v1452_v59  ;;  %v531_v54 = vld [vmem:[#allocation2 + $0x20] sm:$0x3f]  ;;  %v661_v59 = vld [vmem:[#allocation2 + $0x30] sm:$0x3f] }
  0x6b   : > { %v3817_v60 = vld [vmem:[%s3981_s23 + $0xe8] sm:$0x3f]  }
  0x6c   : > { %1068 = vrot.lane.b32.xlu0 %v1067_v5, %s3929_s5  ;;  %1198 = vrot.lane.b32.xlu1 %v1197_v7, %s3929_s5  ;;  %v842_v5 = vld [vmem:[#allocation2 + $0x48] sm:$0x3f]  ;;  %v4230_v7 = vld [vmem:[%s3981_s23 + $0x98] sm:$0x3f]  }
  0x6d   : > { %v843_v10 = vsel %vm4155_vm2, %v3826_v4, %v842_v5  ;;  %v1408_v26 = vshll.u32 %v4230_v7, 16  ;;  %v1582_v5 = vshrl.u32 %v4251_v22, 16 }
  0x6e   : > { %844 = vst [vmem:[#allocation2 + $0x48] sm:$0x3f] %v843_v10  ;;  %v1712_v10 = vshrl.u32 %v4260_v32, 16 }
  0x6f   : > { %v1410_v40 = vrot.slane %v1408_v26, 1  ;;  %v3845_v26 = vld [vmem:[%s3981_s23 + $0xf0] sm:$0x3f]  }
  0x70   : > { %828 = vrot.lane.b32.xlu0 %v827_v15, %s3930_s28  ;;  %958 = vrot.lane.b32.xlu1 %v957_v18, %s3930_s28  ;;  %v1646_v15 = vshrl.u32 %v3812_v2, 16  ;;  %v1087_v18 = vor.u32 %v1086_v0, %v1082_v62  ;;  %v779_v62 = vsel %vm4155_vm2, %v3840_v52, %v778_v56  ;;  %v907_v0 = vld [vmem:[#allocation2 + $0x50] sm:$0x3f]  ;;  %v3831_v2 = vld [vmem:[%s3981_s23 + $0xa8] sm:$0x3f]  }
  0x71   : > { %780 = vst [vmem:[#allocation2 + $0x40] sm:$0x3f] %v779_v62  ;;  %v1472_v19 = vshrl.u32 %v3831_v2, 16  ;;  %v3856_v56 = vld [vmem:[%s3981_s23 + $0xb8] sm:$0x3f]  }
  0x72   : > { %v1651_v50 = vor.u32 %v1650_v34, %v1646_v15  ;;  %v1474_v15 = vshll.u32 %v3831_v2, 16 }
  0x74   : > { %1632 = vrot.lane.b32.xlu0 %v3792_v20, %s3928_s24  ;;  %1764 = vrot.lane.b32.xlu1 %v3793_v29, %s3928_s24  ;;  %v1780_v20 = vshll.u32 %v4225_v3, 16  ;;  %v908_v3 = vsel %vm4155_vm2, %v3841_v63, %v907_v0 }
  0x75   : > { %909 = vst [vmem:[#allocation2 + $0x50] sm:$0x3f] %v908_v3  ;;  %v1666_v3 = vshrl.u32 %v3856_v56, 16 }
  0x76   : > { %v1782_v36 = vrot.slane %v1780_v20, 1 }
  0x78   : > { %1392 = vrot.lane.b32.xlu0 %v1391_v37, %s3929_s5  ;;  %1524 = vrot.lane.b32.xlu1 %v1523_v41, %s3929_s5  ;;  %v1406_v37 = vshrl.u32 %v4230_v7, 16  ;;  %v1538_v41 = vshrl.u32 %v4233_v8, 16  ;;  %v791_v63 = vld [vmem:[#allocation2 + $0x40] sm:$0x3f] }
  0x7a   : > { %v1411_v8 = vor.u32 %v1410_v40, %v1406_v37 }
  0x7c   : > { %1568 = vrot.lane.b32.xlu0 %v3796_v46, %s3928_s24  ;;  %1698 = vrot.lane.b32.xlu1 %v3797_v51, %s3928_s24  ;;  %v1542_v46 = vrot.slane %v1540_v27, 1  ;;  %v1783_v51 = vor.u32 %v1782_v36, %v1778_v35  ;;  %v855_v35 = vld [vmem:[#allocation2 + $0x48] sm:$0x3f] }
  0x7e   : > { %v1543_v16 = vor.u32 %v1542_v46, %v1538_v41  ;;  %v3836_v46 = vld [vmem:[%s3981_s23 + $0xf8] sm:$0x3f]  }
  0x80   : > { %1152 = vrot.lane.b32.xlu0 %v1151_v57, %s3930_s28  ;;  %1284 = vrot.lane.b32.xlu1 %v1283_v61, %s3930_s28  ;;  %v3830_v61 = vld [vmem:[%s3981_s23 + $0x88] sm:$0x3f]  }
  0x84   : > { %1328 = vrot.lane.b32.xlu0 %v1327_v6, %s3929_s5  ;;  %1458 = vrot.lane.b32.xlu1 %v1457_v9, %s3929_s5  ;;  %v1586_v9 = vrot.slane %v1584_v47, 1 }
  0x86   : > { %v333_v23 = vpop.permute.xlu0 %332  ;;  %v261_v29 = vpop.permute.xlu1 %260 }
  0x87   : > { %v336_v28 = vsel %vm4244_vm4, %v333_v23, %v335_v13  ;;  %v266_v33 = vsel %vm4244_vm4, %v261_v29, %v265_v14  ;;  %v1716_v13 = vrot.slane %v1714_v48, 1  ;;  %v1344_v14 = vshll.u32 %v3830_v61, 16 }
  0x88   : > { %337 = vst [vmem:[#allocation2 + $0x8] sm:$0x3f] %v336_v28  ;;  %1088 = vrot.lane.b32.xlu0 %v1087_v18, %s3930_s28  ;;  %267 = vst [vmem:[#allocation2] sm:$0x3f] %v266_v33  ;;  %1218 = vrot.lane.b32.xlu1 %v1217_v21, %s3930_s28  ;;  %v1342_v18 = vshrl.u32 %v3830_v61, 16  ;;  %v1587_v28 = vor.u32 %v1586_v9, %v1582_v5 }
  0x89   : > { %v1346_v29 = vrot.slane %v1344_v14, 1  ;;  %v1717_v32 = vor.u32 %v1716_v13, %v1712_v10  ;;  %v3850_v10 = vld [vmem:[%s3981_s23 + $0xe8] sm:$0x3f]  }
  0x8a   : > { %v465_v38 = vpop.permute.xlu0 %464  ;;  %v399_v44 = vpop.permute.xlu1 %398  ;;  %v3851_v14 = vld [vmem:[%s3981_s23 + $0x108] sm:$0x3f]  }
  0x8b   : > { %v468_v42 = vsel %vm4244_vm4, %v465_v38, %v467_v24  ;;  %v402_v49 = vsel %vm4244_vm4, %v399_v44, %v401_v30  ;;  %v1476_v30 = vrot.slane %v1474_v15, 1  ;;  %v1347_v41 = vor.u32 %v1346_v29, %v1342_v18  ;;  %v3862_v15 = vld [vmem:[%s3981_s23 + $0xc0] sm:$0x3f]   ;;  %v3866_v29 = vld [vmem:[%s3981_s23 + $0x70] sm:$0x3f]  }
  0x8c   : > { %469 = vst [vmem:[#allocation2 + $0x18] sm:$0x3f] %v468_v42  ;;  %1892 = vrot.lane.b32.xlu0 %v3808_v25, %s3928_s24  ;;  %403 = vst [vmem:[#allocation2 + $0x10] sm:$0x3f] %v402_v49  ;;  %2024 = vrot.lane.b32.xlu1 %v3809_v31, %s3928_s24  ;;  %v3844_v25 = vld [vmem:[%s3981_s23 + $0xd0] sm:$0x3f]  }
  0x8d   : > { %v1908_v38 = vshll.u32 %v3844_v25, 16  ;;  %v987_v42 = vld [vmem:[#allocation2 + $0x58] sm:$0x3f]  ;;  %v1477_v44 = vor.u32 %v1476_v30, %v1472_v19  ;;  %v3863_v19 = vld [vmem:[%s3981_s23 + $0xe0] sm:$0x3f]  }
  0x8e   : > { %v593_v53 = vpop.permute.xlu0 %592  ;;  %v725_v58 = vpop.permute.xlu1 %724  ;;  %v3837_v49 = vld [vmem:[%s3981_s23 + $0x118] sm:$0x3f]   ;;  %v1102_v30 = vld [vmem:[#allocation2 + $0x68] sm:$0x3f] }
  0x8f   : > { %v596_v57 = vsel %vm4244_vm4, %v593_v53, %v595_v39  ;;  %v728_v1 = vsel %vm4244_vm4, %v725_v58, %v727_v45  ;;  %v355_v21 = vld [vmem:[#allocation2 + $0x8] sm:$0x3f]  ;;  %v287_v31 = vld [vmem:[#allocation2] sm:$0x3f]  ;;  %v2040_v39 = vshll.u32 %v3845_v26, 16 }
  0x90   : > { %597 = vst [vmem:[#allocation2 + $0x28] sm:$0x3f] %v596_v57  ;;  %1652 = vrot.lane.b32.xlu0 %v1651_v50, %s3929_s5  ;;  %729 = vst [vmem:[#allocation2 + $0x38] sm:$0x3f] %v728_v1  ;;  %1784 = vrot.lane.b32.xlu1 %v1783_v51, %s3929_s5  ;;  %v1906_v50 = vshrl.u32 %v3844_v25, 16  ;;  %v2038_v51 = vshrl.u32 %v3845_v26, 16 }
  0x91   : > { %v3857_v57 = vld [vmem:[%s3981_s23 + $0xd8] sm:$0x3f]   ;;  %v921_v1 = vld [vmem:[#allocation2 + $0x50] sm:$0x3f] }
  0x92   : > { %v529_v4 = vpop.permute.xlu0 %528  ;;  %v659_v7 = vpop.permute.xlu1 %658 }
  0x93   : > { %v532_v6 = vsel %vm4244_vm4, %v529_v4, %v531_v54  ;;  %v662_v11 = vsel %vm4244_vm4, %v659_v7, %v661_v59  ;;  %v487_v23 = vld [vmem:[#allocation2 + $0x18] sm:$0x3f]  ;;  %v421_v34 = vld [vmem:[#allocation2 + $0x10] sm:$0x3f]  ;;  %v1910_v54 = vrot.slane %v1908_v38, 1  ;;  %v1668_v59 = vshll.u32 %v3856_v56, 16 }
  0x94   : > { %533 = vst [vmem:[#allocation2 + $0x20] sm:$0x3f] %v532_v6  ;;  %1828 = vrot.lane.b32.xlu0 %v3816_v55, %s3928_s24  ;;  %663 = vst [vmem:[#allocation2 + $0x30] sm:$0x3f] %v662_v11  ;;  %1958 = vrot.lane.b32.xlu1 %v3817_v60, %s3928_s24  ;;  %v2042_v55 = vrot.slane %v2040_v39, 1  ;;  %v1798_v4 = vshrl.u32 %v3857_v57, 16  ;;  %v1103_v38 = vsel %vm4155_vm2, %v3866_v29, %v1102_v30 }
  0x95   : > { %v1911_v2 = vor.u32 %v1910_v54, %v1906_v50  ;;  %v1670_v7 = vrot.slane %v1668_v59, 1  ;;  %v3867_v39 = vld [vmem:[%s3981_s23 + $0x90] sm:$0x3f]   ;;  %1104 = vst [vmem:[#allocation2 + $0x68] sm:$0x3f] %v1103_v38 }
  0x96   : > { %v353_v20 = vpop.permute.xlu0 %352  ;;  %v485_v24 = vpop.permute.xlu1 %484  ;;  %v2043_v5 = vor.u32 %v2042_v55, %v2038_v51  ;;  %v3871_v50 = vld [vmem:[%s3981_s23 + $0xc8] sm:$0x3f]  }
  0x97   : > { %v356_v22 = vsel %vm4302_vm6, %v353_v20, %v355_v21  ;;  %v488_v27 = vsel %vm4302_vm6, %v485_v24, %v487_v23  ;;  %v615_v53 = vld [vmem:[#allocation2 + $0x28] sm:$0x3f]  ;;  %v747_v61 = vld [vmem:[#allocation2 + $0x38] sm:$0x3f]  ;;  %v1974_v24 = vshll.u32 %v3863_v19, 16  ;;  %v1732_v55 = vshrl.u32 %v3871_v50, 16 }
  0x98   : > { %357 = vst [vmem:[#allocation2 + $0x8] sm:$0x3f] %v356_v22  ;;  %1412 = vrot.lane.b32.xlu0 %v1411_v8, %s3930_s28  ;;  %489 = vst [vmem:[#allocation2 + $0x18] sm:$0x3f] %v488_v27  ;;  %1544 = vrot.lane.b32.xlu1 %v1543_v16, %s3930_s28  ;;  %v1800_v8 = vshll.u32 %v3857_v57, 16  ;;  %v1844_v22 = vshll.u32 %v3862_v15, 16 }
  0x99   : > { %v1842_v27 = vshrl.u32 %v3862_v15, 16  ;;  %v1734_v56 = vshll.u32 %v3871_v50, 16  ;;  %v3881_v50 = vld [vmem:[%s3981_s23 + $0x100] sm:$0x3f]  }
  0x9a   : > { %v283_v33 = vpop.permute.xlu0 %282  ;;  %v419_v37 = vpop.permute.xlu1 %418  ;;  %v1802_v21 = vrot.slane %v1800_v8, 1 }
  0x9b   : > { %v288_v36 = vsel %vm4302_vm6, %v283_v33, %v287_v31  ;;  %v422_v40 = vsel %vm4302_vm6, %v419_v37, %v421_v34  ;;  %v1671_v33 = vor.u32 %v1670_v7, %v1666_v3  ;;  %v1846_v34 = vrot.slane %v1844_v22, 1  ;;  %v3874_v3 = vld [vmem:[%s3981_s23 + $0xf0] sm:$0x3f]  }
  0x9c   : > { %289 = vst [vmem:[#allocation2] sm:$0x3f] %v288_v36  ;;  %1588 = vrot.lane.b32.xlu0 %v1587_v28, %s3929_s5  ;;  %423 = vst [vmem:[#allocation2 + $0x10] sm:$0x3f] %v422_v40  ;;  %1718 = vrot.lane.b32.xlu1 %v1717_v32, %s3929_s5  ;;  %v1972_v28 = vshrl.u32 %v3863_v19, 16  ;;  %v1803_v37 = vor.u32 %v1802_v21, %v1798_v4 }
  0x9d   : > { %v551_v32 = vld [vmem:[#allocation2 + $0x20] sm:$0x3f]  ;;  %v681_v36 = vld [vmem:[#allocation2 + $0x30] sm:$0x3f]  ;;  %v1233_v40 = vld [vmem:[#allocation2 + $0x78] sm:$0x3f] }
  0x9e   : > { %v853_v45 = vpop.permute.xlu0 %852  ;;  %v985_v48 = vpop.permute.xlu1 %984  ;;  %v3875_v7 = vld [vmem:[%s3981_s23 + $0x110] sm:$0x3f]   ;;  %v3876_v19 = vld [vmem:[%s3981_s23 + $0x60] sm:$0x3f]  }
  0x9f   : > { %v856_v47 = vsel %vm4244_vm4, %v853_v45, %v855_v35  ;;  %v988_v52 = vsel %vm4244_vm4, %v985_v48, %v987_v42  ;;  %v375_v18 = vld [vmem:[#allocation2 + $0x8] sm:$0x3f]  ;;  %v507_v20 = vld [vmem:[#allocation2 + $0x18] sm:$0x3f]  ;;  %v1976_v35 = vrot.slane %v1974_v24, 1  ;;  %v1234_v45 = vsel %vm4155_vm2, %v3867_v39, %v1233_v40 }
  0xa0   : > { %857 = vst [vmem:[#allocation2 + $0x48] sm:$0x3f] %v856_v47  ;;  %1348 = vrot.lane.b32.xlu0 %v1347_v41, %s3930_s28  ;;  %989 = vst [vmem:[#allocation2 + $0x58] sm:$0x3f] %v988_v52  ;;  %1478 = vrot.lane.b32.xlu1 %v1477_v44, %s3930_s28 }
  0xa1   : > { %1235 = vst [vmem:[#allocation2 + $0x78] sm:$0x3f] %v1234_v45  ;;  %v1977_v51 = vor.u32 %v1976_v35, %v1972_v28  ;;  %v3880_v45 = vld [vmem:[%s3981_s23 + $0xe0] sm:$0x3f]  }
  0xa2   : > { %v613_v58 = vpop.permute.xlu0 %612  ;;  %v745_v62 = vpop.permute.xlu1 %744 }
  0xa3   : > { %v616_v60 = vsel %vm4302_vm6, %v613_v58, %v615_v53  ;;  %v748_v0 = vsel %vm4302_vm6, %v745_v62, %v747_v61  ;;  %v309_v48 = vld [vmem:[#allocation2] sm:$0x3f]  ;;  %v441_v58 = vld [vmem:[#allocation2 + $0x10] sm:$0x3f] }
  0xa4   : > { %617 = vst [vmem:[#allocation2 + $0x28] sm:$0x3f] %v616_v60  ;;  %2152 = vrot.lane.b32.xlu0 %v3836_v46, %s3928_s24  ;;  %749 = vst [vmem:[#allocation2 + $0x38] sm:$0x3f] %v748_v0  ;;  %2284 = vrot.lane.b32.xlu1 %v3837_v49, %s3928_s24  ;;  %v3870_v46 = vld [vmem:[%s3981_s23 + $0xa8] sm:$0x3f]   ;;  %v1847_v49 = vor.u32 %v1846_v34, %v1842_v27 }
  0xa5   : > { %v1602_v52 = vshrl.u32 %v3870_v46, 16  ;;  %v1604_v53 = vshll.u32 %v3870_v46, 16  ;;  %v1736_v0 = vrot.slane %v1734_v56, 1  ;;  %v1167_v27 = vld [vmem:[#allocation2 + $0x70] sm:$0x3f] }
  0xa6   : > { %v789_v9 = vpop.permute.xlu0 %788  ;;  %v919_v13 = vpop.permute.xlu1 %918 }
  0xa7   : > { %v792_v11 = vsel %vm4244_vm4, %v789_v9, %v791_v63  ;;  %v922_v16 = vsel %vm4244_vm4, %v919_v13, %v921_v1  ;;  %v1606_v61 = vrot.slane %v1604_v53, 1  ;;  %v1115_v1 = vld [vmem:[#allocation2 + $0x68] sm:$0x3f]  ;;  %v2168_v13 = vshll.u32 %v3874_v3, 16  ;;  %v1007_v21 = vld [vmem:[#allocation2 + $0x58] sm:$0x3f] }
  0xa8   : > { %793 = vst [vmem:[#allocation2 + $0x40] sm:$0x3f] %v792_v11  ;;  %1912 = vrot.lane.b32.xlu0 %v1911_v2, %s3929_s5  ;;  %923 = vst [vmem:[#allocation2 + $0x50] sm:$0x3f] %v922_v16  ;;  %2044 = vrot.lane.b32.xlu1 %v2043_v5, %s3929_s5  ;;  %v1737_v5 = vor.u32 %v1736_v0, %v1732_v55  ;;  %v1247_v9 = vld [vmem:[#allocation2 + $0x78] sm:$0x3f] }
  0xa9   : > { %v1607_v2 = vor.u32 %v1606_v61, %v1602_v52  ;;  %v2166_v11 = vshrl.u32 %v3874_v3, 16  ;;  %v875_v15 = vld [vmem:[#allocation2 + $0x48] sm:$0x3f]  ;;  %v2298_v16 = vshrl.u32 %v3875_v7, 16  ;;  %v2170_v22 = vrot.slane %v2168_v13, 1 }
  0xaa   : > { %v373_v23 = vpop.permute.xlu0 %372  ;;  %v505_v26 = vpop.permute.xlu1 %504  ;;  %v2234_v0 = vshll.u32 %v3881_v50, 16 }
  0xab   : > { %v376_v25 = vsel %vm4339_vm8, %v373_v23, %v375_v18  ;;  %v508_v31 = vsel %vm4339_vm8, %v505_v26, %v507_v20  ;;  %v2300_v18 = vshll.u32 %v3875_v7, 16  ;;  %v1038_v20 = vld [vmem:[#allocation2 + $0x60] sm:$0x3f]  ;;  %v2171_v30 = vor.u32 %v2170_v22, %v2166_v11  ;;  %v635_v53 = vld [vmem:[#allocation2 + $0x28] sm:$0x3f] }
  0xac   : > { %377 = vst [vmem:[#allocation2 + $0x8] sm:$0x3f] %v376_v25  ;;  %2088 = vrot.lane.b32.xlu0 %v3850_v10, %s3928_s24  ;;  %509 = vst [vmem:[#allocation2 + $0x18] sm:$0x3f] %v508_v31  ;;  %2218 = vrot.lane.b32.xlu1 %v3851_v14, %s3928_s24  ;;  %v1039_v25 = vsel %vm4155_vm2, %v3876_v19, %v1038_v20  ;;  %v3877_v26 = vld [vmem:[%s3981_s23 + $0x80] sm:$0x3f]  }
  0xad   : > { %v2302_v24 = vrot.slane %v2300_v18, 1  ;;  %1040 = vst [vmem:[#allocation2 + $0x60] sm:$0x3f] %v1039_v25  ;;  %v1168_v35 = vsel %vm4155_vm2, %v3877_v26, %v1167_v27  ;;  %v767_v55 = vld [vmem:[#allocation2 + $0x38] sm:$0x3f] }
  0xae   : > { %v549_v41 = vpop.permute.xlu0 %548  ;;  %v679_v44 = vpop.permute.xlu1 %678  ;;  %1169 = vst [vmem:[#allocation2 + $0x70] sm:$0x3f] %v1168_v35  ;;  %v3884_v22 = vld [vmem:[%s3981_s23 + $0xf8] sm:$0x3f]  }
  0xaf   : > { %v552_v42 = vsel %vm4302_vm6, %v549_v41, %v551_v32  ;;  %v682_v47 = vsel %vm4302_vm6, %v679_v44, %v681_v36  ;;  %v3878_v36 = vld [vmem:[%s3981_s23 + $0xd8] sm:$0x3f]   ;;  %v811_v7 = vld [vmem:[#allocation2 + $0x40] sm:$0x3f]  ;;  %v941_v13 = vld [vmem:[#allocation2 + $0x50] sm:$0x3f] }
  0xb0   : > { %553 = vst [vmem:[#allocation2 + $0x20] sm:$0x3f] %v552_v42  ;;  %1672 = vrot.lane.b32.xlu0 %v1671_v33, %s3930_s28  ;;  %683 = vst [vmem:[#allocation2 + $0x30] sm:$0x3f] %v682_v47  ;;  %1804 = vrot.lane.b32.xlu1 %v1803_v37, %s3930_s28  ;;  %v2303_v33 = vor.u32 %v2302_v24, %v2298_v16  ;;  %v3879_v37 = vld [vmem:[%s3981_s23 + $0xf8] sm:$0x3f]  }
  0xb1   : > { %v1926_v39 = vshrl.u32 %v3878_v36, 16  ;;  %v1928_v40 = vshll.u32 %v3878_v36, 16  ;;  %v2058_v42 = vshrl.u32 %v3879_v37, 16  ;;  %v2060_v44 = vshll.u32 %v3879_v37, 16 }
  0xb2   : > { %v305_v54 = vpop.permute.xlu0 %304  ;;  %v439_v59 = vpop.permute.xlu1 %438  ;;  %v2186_v27 = vshrl.u32 %v3884_v22, 16 }
  0xb3   : > { %v310_v57 = vsel %vm4339_vm8, %v305_v54, %v309_v48  ;;  %v2331_v60 = vld [vmem:[#allocation2 + $0x8] sm:$0xff]  ;;  %v442_v62 = vsel %vm4339_vm8, %v439_v59, %v441_v58  ;;  %v2333_v63 = vld [vmem:[#allocation2 + $0x18] sm:$0xff]  ;;  %v1930_v46 = vrot.slane %v1928_v40, 1  ;;  %v2062_v47 = vrot.slane %v2060_v44, 1 }
  0xb4   : > { %311 = vst [vmem:[#allocation2] sm:$0x3f] %v310_v57  ;;  %1848 = vrot.lane.b32.xlu0 %v1847_v49, %s3929_s5  ;;  %2650 = vmatprep.mubr.bf16.mxu0 %v2331_v60  ;;  %443 = vst [vmem:[#allocation2 + $0x10] sm:$0x3f] %v442_v62  ;;  %v2102_v48 = vshrl.u32 %v3880_v45, 16  ;;  %v2104_v49 = vshll.u32 %v3880_v45, 16 }
  0xb5   : > { %1978 = vrot.lane.b32.xlu1 %v1977_v51, %s3929_s5  ;;  %2747 = vmatprep.mubr.bf16.mxu1 %v2333_v63  ;;  %v1051_v51 = vld [vmem:[#allocation2 + $0x60] sm:$0x3f]  ;;  %v1931_v52 = vor.u32 %v1930_v46, %v1926_v39  ;;  %v2063_v57 = vor.u32 %v2062_v47, %v2058_v42  ;;  %v1181_v61 = vld [vmem:[#allocation2 + $0x70] sm:$0x3f]  ;;  %v2232_v63 = vshrl.u32 %v3881_v50, 16 }
  0xb6   : > { %v1113_v4 = vpop.permute.xlu0 %1112  ;;  %v1245_v10 = vpop.permute.xlu1 %1244  ;;  %v2106_v60 = vrot.slane %v2104_v49, 1  ;;  %v1362_v40 = vld [vmem:[#allocation2 + $0x88] sm:$0x3f]  ;;  %v3887_v42 = vld [vmem:[%s3981_s23 + $0xb0] sm:$0x3f]  }
  0xb7   : > { %v1116_v8 = vsel %vm4244_vm4, %v1113_v4, %v1115_v1  ;;  %v1248_v14 = vsel %vm4244_vm4, %v1245_v10, %v1247_v9  ;;  %v3882_v1 = vld [vmem:[%s3981_s23 + $0xc8] sm:$0x3f]   ;;  %v701_v24 = vld [vmem:[#allocation2 + $0x30] sm:$0x3f]  ;;  %v1493_v47 = vld [vmem:[#allocation2 + $0x98] sm:$0x3f] }
  0xb8   : > { %1117 = vst [vmem:[#allocation2 + $0x68] sm:$0x3f] %v1116_v8  ;;  %1608 = vrot.lane.b32.xlu0 %v1607_v2, %s3930_s28  ;;  %1249 = vst [vmem:[#allocation2 + $0x78] sm:$0x3f] %v1248_v14  ;;  %v2107_v3 = vor.u32 %v2106_v60, %v2102_v48  ;;  %v3883_v4 = vld [vmem:[%s3981_s23 + $0xe8] sm:$0x3f]   ;;  %v1494_v48 = vsel %vm4155_vm2, %v3887_v42, %v1493_v47 }
  0xb9   : > { %1738 = vrot.lane.b32.xlu1 %v1737_v5, %s3930_s28  ;;  %v2236_v5 = vrot.slane %v2234_v0, 1  ;;  %v1862_v9 = vshrl.u32 %v3882_v1, 16  ;;  %v1864_v10 = vshll.u32 %v3882_v1, 16  ;;  %v1994_v16 = vshll.u32 %v3883_v4, 16  ;;  %v3888_v50 = vld [vmem:[%s3981_s23 + $0xe8] sm:$0x3f]  }
  0xba   : > { %v873_v23 = vpop.permute.xlu0 %872  ;;  %v1005_v29 = vpop.permute.xlu1 %1004  ;;  %1495 = vst [vmem:[#allocation2 + $0x98] sm:$0x3f] %v1494_v48  ;;  %v3890_v60 = vld [vmem:[%s3981_s23 + $0x80] sm:$0x3f]   ;;  %v3896_v48 = vld [vmem:[%s3981_s23 + $0xd0] sm:$0x3f]  }
  0xbb   : > { %v876_v28 = vsel %vm4302_vm6, %v873_v23, %v875_v15  ;;  %v2330_v31 = vld [vmem:[#allocation2] sm:$0xff]  ;;  %v1008_v32 = vsel %vm4302_vm6, %v1005_v29, %v1007_v21  ;;  %v2332_v34 = vld [vmem:[#allocation2 + $0x10] sm:$0xff]  ;;  %v1992_v15 = vshrl.u32 %v3883_v4, 16  ;;  %v2237_v18 = vor.u32 %v2236_v5, %v2232_v63  ;;  %v3885_v29 = vld [vmem:[%s3981_s23 + $0x118] sm:$0x3f]  }
  0xbc   : > { %877 = vst [vmem:[#allocation2 + $0x48] sm:$0x3f] %v876_v28  ;;  %2651 = vmatmul.mubr.bf16.vlgmr.msra.gmra.mrb[0].mxu0 %v2330_v31  ;;  %1009 = vst [vmem:[#allocation2 + $0x58] sm:$0x3f] %v1008_v32  ;;  %2172 = vrot.lane.b32.xlu0 %v2171_v30, %s3929_s5  ;;  %v1866_v20 = vrot.slane %v1864_v10, 1  ;;  %v1996_v23 = vrot.slane %v1994_v16, 1 }
  0xbd   : > { %2748 = vmatmul.mubr.bf16.vlgmr.msra.gmra.mrb[0].mxu1 %v2332_v34  ;;  %2304 = vrot.lane.b32.xlu1 %v2303_v33, %s3929_s5  ;;  %v571_v21 = vld [vmem:[#allocation2 + $0x20] sm:$0x3f]  ;;  %v2188_v28 = vshll.u32 %v3884_v22, 16  ;;  %v3886_v34 = vld [vmem:[%s3981_s23 + $0x90] sm:$0x3f]   ;;  %v2318_v37 = vshrl.u32 %v3885_v29, 16 }
  0xbe   : > { %v1049_v38 = vpop.permute.xlu0 %1048  ;;  %v1179_v41 = vpop.permute.xlu1 %1178  ;;  %v1867_v25 = vor.u32 %v1866_v20, %v1862_v9  ;;  %v1997_v30 = vor.u32 %v1996_v23, %v1992_v15  ;;  %v1298_v1 = vld [vmem:[#allocation2 + $0x80] sm:$0x3f]  ;;  %v1427_v10 = vld [vmem:[#allocation2 + $0x90] sm:$0x3f]  ;;  %v1622_v23 = vld [vmem:[#allocation2 + $0xa8] sm:$0x3f] }
  0xbf   : > { %v1052_v56 = vsel %vm4244_vm4, %v1049_v38, %v1051_v51  ;;  %v1182_v2 = vsel %vm4244_vm4, %v1179_v41, %v1181_v61  ;;  %v2190_v36 = vrot.slane %v2188_v28, 1  ;;  %v2320_v38 = vshll.u32 %v3885_v29, 16 }
  0xc0   : > { %1053 = vst [vmem:[#allocation2 + $0x60] sm:$0x3f] %v1052_v56  ;;  %1932 = vrot.lane.b32.xlu0 %v1931_v52, %s3930_s28  ;;  %1183 = vst [vmem:[#allocation2 + $0x70] sm:$0x3f] %v1182_v2  ;;  %v1363_v41 = vsel %vm4155_vm2, %v3886_v34, %v1362_v40  ;;  %v3889_v52 = vld [vmem:[%s3981_s23 + $0x108] sm:$0x3f]   ;;  %v1299_v5 = vsel %vm4155_vm2, %v3890_v60, %v1298_v1 }
  0xc1   : > { %2064 = vrot.lane.b32.xlu1 %v2063_v57, %s3930_s28  ;;  %v2191_v44 = vor.u32 %v2190_v36, %v2186_v27  ;;  %v2322_v45 = vrot.slane %v2320_v38, 1  ;;  %1364 = vst [vmem:[#allocation2 + $0x88] sm:$0x3f] %v1363_v41  ;;  %v1267_v56 = vld [vmem:[#allocation2 + $0x78] sm:$0x3f]  ;;  %v2252_v57 = vshrl.u32 %v3889_v52, 16 }
  0xc2   : > { %v633_v54 = vpop.permute.xlu0 %632  ;;  %v765_v59 = vpop.permute.xlu1 %764  ;;  %1300 = vst [vmem:[#allocation2 + $0x80] sm:$0x3f] %v1299_v5  ;;  %v1507_v16 = vld [vmem:[#allocation2 + $0x98] sm:$0x3f]  ;;  %v1687_v38 = vld [vmem:[#allocation2 + $0xb0] sm:$0x3f] }
  0xc3   : > { %v636_v58 = vsel %vm4339_vm8, %v633_v54, %v635_v53  ;;  %v768_v62 = vsel %vm4339_vm8, %v765_v59, %v767_v55  ;;  %v2323_v51 = vor.u32 %v2322_v45, %v2318_v37  ;;  %v1135_v53 = vld [vmem:[#allocation2 + $0x68] sm:$0x3f]  ;;  %v2122_v54 = vshrl.u32 %v3888_v50, 16  ;;  %v1027_v22 = vld [vmem:[#allocation2 + $0x58] sm:$0x3f] }
  0xc4   : > { %637 = vst [vmem:[#allocation2 + $0x28] sm:$0x3f] %v636_v58  ;;  %769 = vst [vmem:[#allocation2 + $0x38] sm:$0x3f] %v768_v62  ;;  %2108 = vrot.lane.b32.xlu0 %v2107_v3, %s3929_s5  ;;  %v2124_v55 = vshll.u32 %v3888_v50, 16  ;;  %v2254_v58 = vshll.u32 %v3889_v52, 16 }
  0xc5   : > { %2238 = vrot.lane.b32.xlu1 %v2237_v18, %s3929_s5  ;;  %v895_v20 = vld [vmem:[#allocation2 + $0x48] sm:$0x3f]  ;;  %v1753_v27 = vld [vmem:[#allocation2 + $0xb8] sm:$0x3f]  ;;  %v3895_v37 = vld [vmem:[%s3981_s23 + $0xc0] sm:$0x3f]  }
  0xc6   : > { %v809_v8 = vpop.permute.xlu0 %808  ;;  %v939_v14 = vpop.permute.xlu1 %938  ;;  %v2126_v61 = vrot.slane %v2124_v55, 1  ;;  %v2256_v2 = vrot.slane %v2254_v58, 1  ;;  %v1688_v47 = vsel %vm4155_vm2, %v3895_v37, %v1687_v38  ;;  %v3899_v5 = vld [vmem:[%s3981_s23 + $0xe0] sm:$0x3f]  }
  0xc7   : > { %v812_v11 = vsel %vm4302_vm6, %v809_v8, %v811_v7  ;;  %v942_v19 = vsel %vm4302_vm6, %v939_v14, %v941_v13  ;;  %v3891_v7 = vld [vmem:[%s3981_s23 + $0xa0] sm:$0x3f]   ;;  %v1201_v42 = vld [vmem:[#allocation2 + $0x70] sm:$0x3f]  ;;  %1689 = vst [vmem:[#allocation2 + $0xb0] sm:$0x3f] %v1688_v47 }
  0xc8   : > { %813 = vst [vmem:[#allocation2 + $0x40] sm:$0x3f] %v812_v11  ;;  %943 = vst [vmem:[#allocation2 + $0x50] sm:$0x3f] %v942_v19  ;;  %1868 = vrot.lane.b32.xlu0 %v1867_v25, %s3930_s28  ;;  %v1375_v8 = vld [vmem:[#allocation2 + $0x88] sm:$0x3f]  ;;  %v2127_v9 = vor.u32 %v2126_v61, %v2122_v54  ;;  %v2257_v13 = vor.u32 %v2256_v2, %v2252_v57  ;;  %v1428_v15 = vsel %vm4155_vm2, %v3891_v7, %v1427_v10 }
  0xc9   : > { %1998 = vrot.lane.b32.xlu1 %v1997_v30, %s3930_s28  ;;  %1429 = vst [vmem:[#allocation2 + $0x90] sm:$0x3f] %v1428_v15  ;;  %v3894_v30 = vld [vmem:[%s3981_s23 + $0xa0] sm:$0x3f]   ;;  %v2013_v54 = vld [vmem:[#allocation2 + $0xd8] sm:$0x3f] }
  0xca   : > { %v569_v26 = vpop.permute.xlu0 %568  ;;  %v699_v32 = vpop.permute.xlu1 %698  ;;  %v1071_v40 = vld [vmem:[#allocation2 + $0x60] sm:$0x3f]  ;;  %v1947_v7 = vld [vmem:[#allocation2 + $0xd0] sm:$0x3f] }
  0xcb   : > { %v572_v31 = vsel %vm4339_vm8, %v569_v26, %v571_v21  ;;  %v2335_v33 = vld [vmem:[#allocation2 + $0x28] sm:$0xff]  ;;  %v702_v35 = vsel %vm4339_vm8, %v699_v32, %v701_v24  ;;  %v2337_v39 = vld [vmem:[#allocation2 + $0x38] sm:$0xff]  ;;  %v3892_v21 = vld [vmem:[%s3981_s23 + $0xb0] sm:$0x3f]  }
  0xcc   : > { %573 = vst [vmem:[#allocation2 + $0x20] sm:$0x3f] %v572_v31  ;;  %2658 = vmatprep.mubr.bf16.mxu0 %v2335_v33  ;;  %703 = vst [vmem:[#allocation2 + $0x30] sm:$0x3f] %v702_v35  ;;  %2755 = vmatprep.mubr.bf16.mxu1 %v2337_v39  ;;  %v1623_v25 = vsel %vm4155_vm2, %v3892_v21, %v1622_v23  ;;  %v3893_v26 = vld [vmem:[%s3981_s23 + $0xd0] sm:$0x3f]  }
  0xcd   : > { %2192 = vrot.lane.b32.xlu0 %v2191_v44, %s3930_s28  ;;  %2324 = vrot.lane.b32.xlu1 %v2323_v51, %s3930_s28  ;;  %1624 = vst [vmem:[#allocation2 + $0xa8] sm:$0x3f] %v1623_v25  ;;  %v1558_v31 = vld [vmem:[#allocation2 + $0xa0] sm:$0x3f]  ;;  %v1754_v34 = vsel %vm4155_vm2, %v3893_v26, %v1753_v27  ;;  %v1882_v51 = vld [vmem:[#allocation2 + $0xc8] sm:$0x3f] }
  0xce   : > { %v1373_v46 = vpop.permute.xlu0 %1372  ;;  %v1505_v49 = vpop.permute.xlu1 %1504  ;;  %v1311_v32 = vld [vmem:[#allocation2 + $0x80] sm:$0x3f]  ;;  %1755 = vst [vmem:[#allocation2 + $0xb8] sm:$0x3f] %v1754_v34  ;;  %v1559_v36 = vsel %vm4155_vm2, %v3894_v30, %v1558_v31  ;;  %v1883_v52 = vsel %vm4155_vm2, %v3896_v48, %v1882_v51  ;;  %v2273_v21 = vld [vmem:[#allocation2 + $0xf8] sm:$0x3f] }
  0xcf   : > { %v1376_v11 = vsel %vm4244_vm4, %v1373_v46, %v1375_v8  ;;  %v1508_v19 = vsel %vm4244_vm4, %v1505_v49, %v1507_v16  ;;  %1560 = vst [vmem:[#allocation2 + $0xa0] sm:$0x3f] %v1559_v36  ;;  %v831_v50 = vld [vmem:[#allocation2 + $0x40] sm:$0x3f]  ;;  %1884 = vst [vmem:[#allocation2 + $0xc8] sm:$0x3f] %v1883_v52 }
  0xd0   : > { %1377 = vst [vmem:[#allocation2 + $0x88] sm:$0x3f] %v1376_v11  ;;  %1509 = vst [vmem:[#allocation2 + $0x98] sm:$0x3f] %v1508_v19  ;;  %v1441_v39 = vld [vmem:[#allocation2 + $0x90] sm:$0x3f] }
  0xd1   : > { %2128 = vrot.lane.b32.xlu0 %v2127_v9, %s3930_s28  ;;  %2258 = vrot.lane.b32.xlu1 %v2257_v13, %s3930_s28  ;;  %v3898_v61 = vld [vmem:[%s3981_s23 + $0xc0] sm:$0x3f]   ;;  %v1948_v13 = vsel %vm4155_vm2, %v3899_v5, %v1947_v7  ;;  %v2142_v16 = vld [vmem:[#allocation2 + $0xe8] sm:$0x3f]  ;;  %v1701_v30 = vld [vmem:[#allocation2 + $0xb0] sm:$0x3f] }
  0xd2   : > { %v1133_v59 = vpop.permute.xlu0 %1132  ;;  %v1265_v63 = vpop.permute.xlu1 %1264  ;;  %1949 = vst [vmem:[#allocation2 + $0xd0] sm:$0x3f] %v1948_v13  ;;  %v2078_v31 = vld [vmem:[#allocation2 + $0xe0] sm:$0x3f] }
  0xd3   : > { %v1136_v62 = vsel %vm4302_vm6, %v1133_v59, %v1135_v53  ;;  %v2334_v0 = vld [vmem:[#allocation2 + $0x20] sm:$0xff]  ;;  %v1268_v3 = vsel %vm4302_vm6, %v1265_v63, %v1267_v56  ;;  %v2336_v4 = vld [vmem:[#allocation2 + $0x30] sm:$0xff] }
  0xd4   : > { %1137 = vst [vmem:[#allocation2 + $0x68] sm:$0x3f] %v1136_v62  ;;  %2659 = vmatmul.mubr.bf16.gmra.mrb[4].mxu0 %v2334_v0  ;;  %1269 = vst [vmem:[#allocation2 + $0x78] sm:$0x3f] %v1268_v3  ;;  %2756 = vmatmul.mubr.bf16.gmra.mrb[4].mxu1 %v2336_v4  ;;  %v3897_v53 = vld [vmem:[%s3981_s23 + $0xf0] sm:$0x3f]  }
  0xd5   : > { %v961_v56 = vld [vmem:[#allocation2 + $0x50] sm:$0x3f]  ;;  %v2014_v60 = vsel %vm4155_vm2, %v3897_v53, %v2013_v54  ;;  %v1818_v62 = vld [vmem:[#allocation2 + $0xc0] sm:$0x3f]  ;;  %v1635_v1 = vld [vmem:[#allocation2 + $0xa8] sm:$0x3f] }
  0xd6   : > { %v1309_v14 = vpop.permute.xlu0 %1308  ;;  %v1439_v18 = vpop.permute.xlu1 %1438  ;;  %2015 = vst [vmem:[#allocation2 + $0xd8] sm:$0x3f] %v2014_v60  ;;  %v1767_v2 = vld [vmem:[#allocation2 + $0xb8] sm:$0x3f]  ;;  %v1819_v3 = vsel %vm4155_vm2, %v3898_v61, %v1818_v62  ;;  %v1571_v25 = vld [vmem:[#allocation2 + $0xa0] sm:$0x3f] }
  0xd7   : > { %v1312_v35 = vsel %vm4244_vm4, %v1309_v14, %v1311_v32  ;;  %v1442_v44 = vsel %vm4244_vm4, %v1439_v18, %v1441_v39  ;;  %1820 = vst [vmem:[#allocation2 + $0xc0] sm:$0x3f] %v1819_v3  ;;  %v1395_v11 = vld [vmem:[#allocation2 + $0x88] sm:$0x3f]  ;;  %v3900_v14 = vld [vmem:[%s3981_s23 + $0xf0] sm:$0x3f]  }
  0xd8   : > { %1313 = vst [vmem:[#allocation2 + $0x80] sm:$0x3f] %v1312_v35  ;;  %1443 = vst [vmem:[#allocation2 + $0x90] sm:$0x3f] %v1442_v44  ;;  %v1527_v15 = vld [vmem:[#allocation2 + $0x98] sm:$0x3f]  ;;  %v2143_v19 = vsel %vm4155_vm2, %v3900_v14, %v2142_v16 }
  0xd9   : > { %2144 = vst [vmem:[#allocation2 + $0xe8] sm:$0x3f] %v2143_v19  ;;  %v3903_v34 = vld [vmem:[%s3981_s23 + $0x100] sm:$0x3f]   ;;  %v2207_v35 = vld [vmem:[#allocation2 + $0xf0] sm:$0x3f] }
  0xda   : > { %v893_v24 = vpop.permute.xlu0 %892  ;;  %v1025_v29 = vpop.permute.xlu1 %1024  ;;  %v2208_v39 = vsel %vm4155_vm2, %v3903_v34, %v2207_v35  ;;  %v1895_v60 = vld [vmem:[#allocation2 + $0xc8] sm:$0x3f]  ;;  %v1961_v13 = vld [vmem:[#allocation2 + $0xd0] sm:$0x3f] }
  0xdb   : > { %v896_v28 = vsel %vm4339_vm8, %v893_v24, %v895_v20  ;;  %v1028_v33 = vsel %vm4339_vm8, %v1025_v29, %v1027_v22  ;;  %v3901_v20 = vld [vmem:[%s3981_s23 + $0x110] sm:$0x3f]   ;;  %v3902_v29 = vld [vmem:[%s3981_s23 + $0xe0] sm:$0x3f]   ;;  %2209 = vst [vmem:[#allocation2 + $0xf0] sm:$0x3f] %v2208_v39 }
  0xdc   : > { %897 = vst [vmem:[#allocation2 + $0x48] sm:$0x3f] %v896_v28  ;;  %1029 = vst [vmem:[#allocation2 + $0x58] sm:$0x3f] %v1028_v33  ;;  %v2274_v28 = vsel %vm4155_vm2, %v3901_v20, %v2273_v21  ;;  %v2079_v33 = vsel %vm4155_vm2, %v3902_v29, %v2078_v31  ;;  %v1287_v44 = vld [vmem:[#allocation2 + $0x78] sm:$0x3f] }
  0xdd   : > { %2275 = vst [vmem:[#allocation2 + $0xf8] sm:$0x3f] %v2274_v28  ;;  %2080 = vst [vmem:[#allocation2 + $0xe0] sm:$0x3f] %v2079_v33  ;;  %v2027_v61 = vld [vmem:[#allocation2 + $0xd8] sm:$0x3f] }
  0xde   : > { %v1069_v41 = vpop.permute.xlu0 %1068  ;;  %v1199_v46 = vpop.permute.xlu1 %1198  ;;  %s3115_s23 = sshll.u32 %s3918_s15, 3 }
  0xdf   : > { %v1072_v45 = vsel %vm4302_vm6, %v1069_v41, %v1071_v40  ;;  %v1202_v49 = vsel %vm4302_vm6, %v1199_v46, %v1201_v42  ;;  %v1155_v40 = vld [vmem:[#allocation2 + $0x68] sm:$0x3f]  ;;  %v1331_v47 = vld [vmem:[#allocation2 + $0x80] sm:$0x3f]  ;;  %p229_p5 = scmp.lt.s32.totalorder %s3115_s23, 15 }
  0xe0   : > { %1073 = vst [vmem:[#allocation2 + $0x60] sm:$0x3f] %v1072_v45  ;;  %1203 = vst [vmem:[#allocation2 + $0x70] sm:$0x3f] %v1202_v49  ;;  %v1461_v49 = vld [vmem:[#allocation2 + $0x90] sm:$0x3f] }
  0xe1   : > { %v2155_v39 = vld [vmem:[#allocation2 + $0xe8] sm:$0x3f]  ;;  %s4732_s23 = smov (!%p229_p5, %s3115_s23), 15 }
  0xe2   : > { %v829_v55 = vpop.permute.xlu0 %828  ;;  %v959_v58 = vpop.permute.xlu1 %958  ;;  %s3571_s10 = sshll.u32 %s4732_s23, 3 }
  0xe3   : > { %v832_v57 = vsel %vm4339_vm8, %v829_v55, %v831_v50  ;;  %v2339_v59 = vld [vmem:[#allocation2 + $0x48] sm:$0xff]  ;;  %v962_v63 = vsel %vm4339_vm8, %v959_v58, %v961_v56  ;;  %v2341_v0 = vld [vmem:[#allocation2 + $0x58] sm:$0xff]  ;;  %s4621_s13 = scalar_lea.vmem %s4716_s4, %s3571_s10 }
  0xe4   : > { %833 = vst [vmem:[#allocation2 + $0x40] sm:$0x3f] %v832_v57  ;;  %2666 = vmatprep.mubr.bf16.mxu0 %v2339_v59  ;;  %963 = vst [vmem:[#allocation2 + $0x50] sm:$0x3f] %v962_v63  ;;  %2763 = vmatprep.mubr.bf16.mxu1 %v2341_v0 }
  0xe6   : > { %v1633_v4 = vpop.permute.xlu0 %1632  ;;  %v1765_v9 = vpop.permute.xlu1 %1764 }
  0xe7   : > { %v1636_v8 = vsel %vm4244_vm4, %v1633_v4, %v1635_v1  ;;  %v1768_v10 = vsel %vm4244_vm4, %v1765_v9, %v1767_v2  ;;  %v1091_v52 = vld [vmem:[#allocation2 + $0x60] sm:$0x3f]  ;;  %v1221_v55 = vld [vmem:[#allocation2 + $0x70] sm:$0x3f] }
  0xe8   : > { %1637 = vst [vmem:[#allocation2 + $0xa8] sm:$0x3f] %v1636_v8  ;;  %1769 = vst [vmem:[#allocation2 + $0xb8] sm:$0x3f] %v1768_v10 }
  0xea   : > { %v1393_v18 = vpop.permute.xlu0 %1392  ;;  %v1525_v23 = vpop.permute.xlu1 %1524 }
  0xeb   : > { %v1396_v22 = vsel %vm4302_vm6, %v1393_v18, %v1395_v11  ;;  %v2338_v24 = vld [vmem:[#allocation2 + $0x40] sm:$0xff]  ;;  %v1528_v26 = vsel %vm4302_vm6, %v1525_v23, %v1527_v15  ;;  %v2340_v27 = vld [vmem:[#allocation2 + $0x50] sm:$0xff] }
  0xec   : > { %1397 = vst [vmem:[#allocation2 + $0x88] sm:$0x3f] %v1396_v22  ;;  %2667 = vmatmul.mubr.bf16.gmra.mrb[8].mxu0 %v2338_v24  ;;  %1529 = vst [vmem:[#allocation2 + $0x98] sm:$0x3f] %v1528_v26  ;;  %2764 = vmatmul.mubr.bf16.gmra.mrb[8].mxu1 %v2340_v27  ;;  %v1831_v11 = vld [vmem:[#allocation2 + $0xc0] sm:$0x3f] }
  0xee   : > { %v1569_v32 = vpop.permute.xlu0 %1568  ;;  %v1699_v37 = vpop.permute.xlu1 %1698 }
  0xef   : > { %v1572_v36 = vsel %vm4244_vm4, %v1569_v32, %v1571_v25  ;;  %v1702_v38 = vsel %vm4244_vm4, %v1699_v37, %v1701_v30  ;;  %v1655_v2 = vld [vmem:[#allocation2 + $0xa8] sm:$0x3f]  ;;  %v1787_v5 = vld [vmem:[#allocation2 + $0xb8] sm:$0x3f] }
  0xf0   : > { %1573 = vst [vmem:[#allocation2 + $0xa0] sm:$0x3f] %v1572_v36  ;;  %1703 = vst [vmem:[#allocation2 + $0xb0] sm:$0x3f] %v1702_v38 }
  0xf2   : > { %v1153_v41 = vpop.permute.xlu0 %1152  ;;  %v1285_v45 = vpop.permute.xlu1 %1284 }
  0xf3   : > { %v1156_v42 = vsel %vm4339_vm8, %v1153_v41, %v1155_v40  ;;  %v1288_v46 = vsel %vm4339_vm8, %v1285_v45, %v1287_v44  ;;  %v1415_v19 = vld [vmem:[#allocation2 + $0x88] sm:$0x3f]  ;;  %v1547_v22 = vld [vmem:[#allocation2 + $0x98] sm:$0x3f] }
  0xf4   : > { %1157 = vst [vmem:[#allocation2 + $0x68] sm:$0x3f] %v1156_v42  ;;  %1289 = vst [vmem:[#allocation2 + $0x78] sm:$0x3f] %v1288_v46  ;;  %v2287_v40 = vld [vmem:[#allocation2 + $0xf8] sm:$0x3f] }
  0xf6   : > { %v1329_v48 = vpop.permute.xlu0 %1328  ;;  %v1459_v50 = vpop.permute.xlu1 %1458 }
  0xf7   : > { %v1332_v43 = vsel %vm4302_vm6, %v1329_v48, %v1331_v47  ;;  %v1462_v51 = vsel %vm4302_vm6, %v1459_v50, %v1461_v49  ;;  %v1591_v25 = vld [vmem:[#allocation2 + $0xa0] sm:$0x3f]  ;;  %v1721_v28 = vld [vmem:[#allocation2 + $0xb0] sm:$0x3f] }
  0xf8   : > { %1333 = vst [vmem:[#allocation2 + $0x80] sm:$0x3f] %v1332_v43  ;;  %1463 = vst [vmem:[#allocation2 + $0x90] sm:$0x3f] %v1462_v51 }
  0xfa   : > { %v1089_v53 = vpop.permute.xlu0 %1088  ;;  %v1219_v56 = vpop.permute.xlu1 %1218 }
  0xfb   : > { %v1092_v54 = vsel %vm4339_vm8, %v1089_v53, %v1091_v52  ;;  %v2343_v57 = vld [vmem:[#allocation2 + $0x68] sm:$0xff]  ;;  %v1222_v58 = vsel %vm4339_vm8, %v1219_v56, %v1221_v55  ;;  %v2345_v59 = vld [vmem:[#allocation2 + $0x78] sm:$0xff]  ;;  %v2091_v53 = vld [vmem:[#allocation2 + $0xe0] sm:$0x3f] }
  0xfc   : > { %1093 = vst [vmem:[#allocation2 + $0x60] sm:$0x3f] %v1092_v54  ;;  %2674 = vmatprep.mubr.bf16.mxu0 %v2343_v57  ;;  %1223 = vst [vmem:[#allocation2 + $0x70] sm:$0x3f] %v1222_v58  ;;  %2771 = vmatprep.mubr.bf16.mxu1 %v2345_v59  ;;  %v2221_v54 = vld [vmem:[#allocation2 + $0xf0] sm:$0x3f] }
  0xfe   : > { %v1893_v62 = vpop.permute.xlu0 %1892  ;;  %v2025_v0 = vpop.permute.xlu1 %2024 }
  0xff   : > { %v1896_v63 = vsel %vm4244_vm4, %v1893_v62, %v1895_v60  ;;  %v2028_v1 = vsel %vm4244_vm4, %v2025_v0, %v2027_v61  ;;  %v1351_v31 = vld [vmem:[#allocation2 + $0x80] sm:$0x3f]  ;;  %v1481_v34 = vld [vmem:[#allocation2 + $0x90] sm:$0x3f] }
 0x100   : > { %1897 = vst [vmem:[#allocation2 + $0xc8] sm:$0x3f] %v1896_v63  ;;  %2029 = vst [vmem:[#allocation2 + $0xd8] sm:$0x3f] %v2028_v1 }
 0x102   : > { %v1653_v3 = vpop.permute.xlu0 %1652  ;;  %v1785_v7 = vpop.permute.xlu1 %1784 }
 0x103   : > { %v1656_v4 = vsel %vm4302_vm6, %v1653_v3, %v1655_v2  ;;  %v2342_v8 = vld [vmem:[#allocation2 + $0x60] sm:$0xff]  ;;  %v1788_v9 = vsel %vm4302_vm6, %v1785_v7, %v1787_v5  ;;  %v2344_v10 = vld [vmem:[#allocation2 + $0x70] sm:$0xff] }
 0x104   : > { %1657 = vst [vmem:[#allocation2 + $0xa8] sm:$0x3f] %v1656_v4  ;;  %2675 = vmatmul.mubr.bf16.gmra.mrb[12].mxu0 %v2342_v8  ;;  %1789 = vst [vmem:[#allocation2 + $0xb8] sm:$0x3f] %v1788_v9  ;;  %2772 = vmatmul.mubr.bf16.gmra.mrb[12].mxu1 %v2344_v10 }
 0x106   : > { %v1829_v14 = vpop.permute.xlu0 %1828  ;;  %v1959_v16 = vpop.permute.xlu1 %1958 }
 0x107   : > { %v1832_v15 = vsel %vm4244_vm4, %v1829_v14, %v1831_v11  ;;  %v1962_v18 = vsel %vm4244_vm4, %v1959_v16, %v1961_v13  ;;  %v1915_v46 = vld [vmem:[#allocation2 + $0xc8] sm:$0x3f]  ;;  %v2047_v43 = vld [vmem:[#allocation2 + $0xd8] sm:$0x3f] }
 0x108   : > { %1833 = vst [vmem:[#allocation2 + $0xc0] sm:$0x3f] %v1832_v15  ;;  %1963 = vst [vmem:[#allocation2 + $0xd0] sm:$0x3f] %v1962_v18 }
 0x10a   : > { %v1413_v20 = vpop.permute.xlu0 %1412  ;;  %v1545_v23 = vpop.permute.xlu1 %1544 }
 0x10b   : > { %v1416_v21 = vsel %vm4339_vm8, %v1413_v20, %v1415_v19  ;;  %v1548_v24 = vsel %vm4339_vm8, %v1545_v23, %v1547_v22  ;;  %v1675_v59 = vld [vmem:[#allocation2 + $0xa8] sm:$0x3f]  ;;  %v1807_v62 = vld [vmem:[#allocation2 + $0xb8] sm:$0x3f] }
 0x10c   : > { %1417 = vst [vmem:[#allocation2 + $0x88] sm:$0x3f] %v1416_v21  ;;  %1549 = vst [vmem:[#allocation2 + $0x98] sm:$0x3f] %v1548_v24 }
 0x10e   : > { %v1589_v26 = vpop.permute.xlu0 %1588  ;;  %v1719_v29 = vpop.permute.xlu1 %1718 }
 0x10f   : > { %v1592_v27 = vsel %vm4302_vm6, %v1589_v26, %v1591_v25  ;;  %v1722_v30 = vsel %vm4302_vm6, %v1719_v29, %v1721_v28  ;;  %v1851_v1 = vld [vmem:[#allocation2 + $0xc0] sm:$0x3f]  ;;  %v1981_v17 = vld [vmem:[#allocation2 + $0xd0] sm:$0x3f] }
 0x110   : > { %1593 = vst [vmem:[#allocation2 + $0xa0] sm:$0x3f] %v1592_v27  ;;  %1723 = vst [vmem:[#allocation2 + $0xb0] sm:$0x3f] %v1722_v30 }
 0x112   : > { %v1349_v32 = vpop.permute.xlu0 %1348  ;;  %v1479_v35 = vpop.permute.xlu1 %1478 }
 0x113   : > { %v1352_v33 = vsel %vm4339_vm8, %v1349_v32, %v1351_v31  ;;  %v2347_v36 = vld [vmem:[#allocation2 + $0x88] sm:$0xff]  ;;  %v1482_v37 = vsel %vm4339_vm8, %v1479_v35, %v1481_v34  ;;  %v2349_v38 = vld [vmem:[#allocation2 + $0x98] sm:$0xff] }
 0x114   : > { %1353 = vst [vmem:[#allocation2 + $0x80] sm:$0x3f] %v1352_v33  ;;  %2682 = vmatprep.mubr.bf16.mxu0 %v2347_v36  ;;  %1483 = vst [vmem:[#allocation2 + $0x90] sm:$0x3f] %v1482_v37  ;;  %2779 = vmatprep.mubr.bf16.mxu1 %v2349_v38 }
 0x116   : > { %v2153_v41 = vpop.permute.xlu0 %2152  ;;  %v2285_v44 = vpop.permute.xlu1 %2284 }
 0x117   : > { %v2156_v42 = vsel %vm4244_vm4, %v2153_v41, %v2155_v39  ;;  %v2288_v45 = vsel %vm4244_vm4, %v2285_v44, %v2287_v40  ;;  %v1611_v7 = vld [vmem:[#allocation2 + $0xa0] sm:$0x3f]  ;;  %v1741_v10 = vld [vmem:[#allocation2 + $0xb0] sm:$0x3f] }
 0x118   : > { %2157 = vst [vmem:[#allocation2 + $0xe8] sm:$0x3f] %v2156_v42  ;;  %2289 = vst [vmem:[#allocation2 + $0xf8] sm:$0x3f] %v2288_v45 }
 0x11a   : > { %v1913_v47 = vpop.permute.xlu0 %1912  ;;  %v2045_v49 = vpop.permute.xlu1 %2044 }
 0x11b   : > { %v1916_v48 = vsel %vm4302_vm6, %v1913_v47, %v1915_v46  ;;  %v2346_v50 = vld [vmem:[#allocation2 + $0x80] sm:$0xff]  ;;  %v2048_v51 = vsel %vm4302_vm6, %v2045_v49, %v2047_v43  ;;  %v2348_v52 = vld [vmem:[#allocation2 + $0x90] sm:$0xff] }
 0x11c   : > { %1917 = vst [vmem:[#allocation2 + $0xc8] sm:$0x3f] %v1916_v48  ;;  %2683 = vmatmul.mubr.bf16.gmra.mrb[16].mxu0 %v2346_v50  ;;  %2049 = vst [vmem:[#allocation2 + $0xd8] sm:$0x3f] %v2048_v51  ;;  %2780 = vmatmul.mubr.bf16.gmra.mrb[16].mxu1 %v2348_v52 }
 0x11e   : > { %v2089_v55 = vpop.permute.xlu0 %2088  ;;  %v2219_v57 = vpop.permute.xlu1 %2218 }
 0x11f   : > { %v2092_v56 = vsel %vm4244_vm4, %v2089_v55, %v2091_v53  ;;  %v2222_v58 = vsel %vm4244_vm4, %v2219_v57, %v2221_v54  ;;  %v2175_v16 = vld [vmem:[#allocation2 + $0xe8] sm:$0x3f]  ;;  %v2307_v20 = vld [vmem:[#allocation2 + $0xf8] sm:$0x3f] }
 0x120   : > { %2093 = vst [vmem:[#allocation2 + $0xe0] sm:$0x3f] %v2092_v56  ;;  %2223 = vst [vmem:[#allocation2 + $0xf0] sm:$0x3f] %v2222_v58 }
 0x122   : > { %v1673_v60 = vpop.permute.xlu0 %1672  ;;  %v1805_v63 = vpop.permute.xlu1 %1804 }
 0x123   : > { %v1676_v61 = vsel %vm4339_vm8, %v1673_v60, %v1675_v59  ;;  %v1808_v0 = vsel %vm4339_vm8, %v1805_v63, %v1807_v62  ;;  %v1935_v25 = vld [vmem:[#allocation2 + $0xc8] sm:$0x3f]  ;;  %v2067_v28 = vld [vmem:[#allocation2 + $0xd8] sm:$0x3f] }
 0x124   : > { %1677 = vst [vmem:[#allocation2 + $0xa8] sm:$0x3f] %v1676_v61  ;;  %1809 = vst [vmem:[#allocation2 + $0xb8] sm:$0x3f] %v1808_v0 }
 0x126   : > { %v1849_v2 = vpop.permute.xlu0 %1848 }
 0x127   : > { %v1852_v3 = vsel %vm4302_vm6, %v1849_v2, %v1851_v1  ;;  %v1979_v4 = vpop.permute.xlu1 %1978  ;;  %v2111_v31 = vld [vmem:[#allocation2 + $0xe0] sm:$0x3f]  ;;  %v2241_v34 = vld [vmem:[#allocation2 + $0xf0] sm:$0x3f] }
 0x128   : > { %1853 = vst [vmem:[#allocation2 + $0xc0] sm:$0x3f] %v1852_v3  ;;  %v1982_v5 = vsel %vm4302_vm6, %v1979_v4, %v1981_v17 }
 0x129   : > { %1983 = vst [vmem:[#allocation2 + $0xd0] sm:$0x3f] %v1982_v5  ;;  %v4607_v5 = vld [vmem:[%s4714_s2] ss:$0 sm:$0xff] }
 0x12a   : > { %v1609_v8 = vpop.permute.xlu0 %1608 }
 0x12b   : > { %v1612_v9 = vsel %vm4339_vm8, %v1609_v8, %v1611_v7  ;;  %v1739_v11 = vpop.permute.xlu1 %1738  ;;  %v2351_v13 = vld [vmem:[#allocation2 + $0xa8] sm:$0xff]  ;;  %v2353_v15 = vld [vmem:[#allocation2 + $0xb8] sm:$0xff] }
 0x12c   : > { %1613 = vst [vmem:[#allocation2 + $0xa0] sm:$0x3f] %v1612_v9  ;;  %v1742_v14 = vsel %vm4339_vm8, %v1739_v11, %v1741_v10  ;;  %2690 = vmatprep.mubr.bf16.mxu0 %v2351_v13  ;;  %2787 = vmatprep.mubr.bf16.mxu1 %v2353_v15  ;;  %v4612_v11 = vld [vmem:[%s4715_s3] ss:$0 sm:$0xff] }
 0x12d   : > { %1743 = vst [vmem:[#allocation2 + $0xb0] sm:$0x3f] %v1742_v14 }
 0x12e   : > { %v2173_v18 = vpop.permute.xlu0 %2172 }
 0x12f   : > { %v2176_v19 = vsel %vm4302_vm6, %v2173_v18, %v2175_v16  ;;  %v2305_v21 = vpop.permute.xlu1 %2304  ;;  %v1871_v37 = vld [vmem:[#allocation2 + $0xc0] sm:$0x3f] }
 0x130   : > { %2177 = vst [vmem:[#allocation2 + $0xe8] sm:$0x3f] %v2176_v19  ;;  %v2308_v22 = vsel %vm4302_vm6, %v2305_v21, %v2307_v20  ;;  %v2001_v41 = vld [vmem:[#allocation2 + $0xd0] sm:$0x3f] }
 0x131   : > { %2309 = vst [vmem:[#allocation2 + $0xf8] sm:$0x3f] %v2308_v22 }
 0x132   : > { %v1933_v26 = vpop.permute.xlu0 %1932 }
 0x133   : > { %v2350_v23 = vld [vmem:[#allocation2 + $0xa0] sm:$0xff]  ;;  %v1936_v27 = vsel %vm4339_vm8, %v1933_v26, %v1935_v25  ;;  %v2065_v29 = vpop.permute.xlu1 %2064 }
 0x134   : > { %2691 = vmatmul.mubr.bf16.gmra.mrb[20].mxu0 %v2350_v23  ;;  %v2352_v24 = vld [vmem:[#allocation2 + $0xb0] sm:$0xff]  ;;  %1937 = vst [vmem:[#allocation2 + $0xc8] sm:$0x3f] %v1936_v27  ;;  %v2068_v30 = vsel %vm4339_vm8, %v2065_v29, %v2067_v28  ;;  %v2926_v25 = vld [vmem:[%s4621_s13 + $0x4] sm:$0x3] }
 0x135   : > { %2788 = vmatmul.mubr.bf16.gmra.mrb[20].mxu1 %v2352_v24  ;;  %2069 = vst [vmem:[#allocation2 + $0xd8] sm:$0x3f] %v2068_v30 }
 0x136   : > { %v2109_v32 = vpop.permute.xlu0 %2108 }
 0x137   : > { %v2112_v33 = vsel %vm4302_vm6, %v2109_v32, %v2111_v31  ;;  %v2239_v35 = vpop.permute.xlu1 %2238  ;;  %v2195_v46 = vld [vmem:[#allocation2 + $0xe8] sm:$0x3f] }
 0x138   : > { %2113 = vst [vmem:[#allocation2 + $0xe0] sm:$0x3f] %v2112_v33  ;;  %v2242_v36 = vsel %vm4302_vm6, %v2239_v35, %v2241_v34  ;;  %v2327_v48 = vld [vmem:[#allocation2 + $0xf8] sm:$0x3f] }
 0x139   : > { %2243 = vst [vmem:[#allocation2 + $0xf0] sm:$0x3f] %v2242_v36 }
 0x13a   : > { %v1869_v38 = vpop.permute.xlu0 %1868 }
 0x13b   : > { %v1872_v39 = vsel %vm4339_vm8, %v1869_v38, %v1871_v37  ;;  %v2355_v40 = vld [vmem:[#allocation2 + $0xc8] sm:$0xff]  ;;  %v1999_v42 = vpop.permute.xlu1 %1998 }
 0x13c   : > { %1873 = vst [vmem:[#allocation2 + $0xc0] sm:$0x3f] %v1872_v39  ;;  %2698 = vmatprep.mubr.bf16.mxu0 %v2355_v40  ;;  %v2357_v44 = vld [vmem:[#allocation2 + $0xd8] sm:$0xff]  ;;  %v2002_v45 = vsel %vm4339_vm8, %v1999_v42, %v2001_v41 }
 0x13d   : > { %2795 = vmatprep.mubr.bf16.mxu1 %v2357_v44  ;;  %2003 = vst [vmem:[#allocation2 + $0xd0] sm:$0x3f] %v2002_v45 }
 0x13f   : > { %v2193_v12 = vpop.permute.xlu0 %2192  ;;  %v2325_v43 = vpop.permute.xlu1 %2324  ;;  %v2131_v51 = vld [vmem:[#allocation2 + $0xe0] sm:$0x3f] }
 0x140   : > { %v2196_v47 = vsel %vm4339_vm8, %v2193_v12, %v2195_v46  ;;  %v2328_v49 = vsel %vm4339_vm8, %v2325_v43, %v2327_v48  ;;  %v2261_v55 = vld [vmem:[#allocation2 + $0xf0] sm:$0x3f] }
 0x141   : > { %2197 = vst [vmem:[#allocation2 + $0xe8] sm:$0x3f] %v2196_v47  ;;  %2329 = vst [vmem:[#allocation2 + $0xf8] sm:$0x3f] %v2328_v49 }
 0x143   : > { %v2354_v50 = vld [vmem:[#allocation2 + $0xc0] sm:$0xff]  ;;  %v2129_v52 = vpop.permute.xlu0 %2128  ;;  %v2259_v56 = vpop.permute.xlu1 %2258 }
 0x144   : > { %2699 = vmatmul.mubr.bf16.gmra.mrb[24].mxu0 %v2354_v50  ;;  %v2356_v53 = vld [vmem:[#allocation2 + $0xd0] sm:$0xff]  ;;  %v2132_v54 = vsel %vm4339_vm8, %v2129_v52, %v2131_v51  ;;  %v2262_v57 = vsel %vm4339_vm8, %v2259_v56, %v2261_v55  ;;  %v3537_v50 = vld [vmem:[%s4621_s13 + $0xc] sm:$0x3] }
 0x145   : > { %2796 = vmatmul.mubr.bf16.gmra.mrb[24].mxu1 %v2356_v53  ;;  %2133 = vst [vmem:[#allocation2 + $0xe0] sm:$0x3f] %v2132_v54  ;;  %2263 = vst [vmem:[#allocation2 + $0xf0] sm:$0x3f] %v2262_v57 }
 0x148   : > { %v2359_v58 = vld [vmem:[#allocation2 + $0xe8] sm:$0xff]  ;;  %v2361_v59 = vld [vmem:[#allocation2 + $0xf8] sm:$0xff] }
 0x149   : > { %2706 = vmatprep.mubr.bf16.mxu0 %v2359_v58  ;;  %2803 = vmatprep.mubr.bf16.mxu1 %v2361_v59 }
 0x14c   : > { %v2358_v60 = vld [vmem:[#allocation2 + $0xe0] sm:$0xff]  ;;  %v2360_v61 = vld [vmem:[#allocation2 + $0xf0] sm:$0xff] }
 0x14d   : > { %2707 = vmatmul.mubr.bf16.gmra.mrb[28].mxu0 %v2358_v60  ;;  %2804 = vmatmul.mubr.bf16.gmra.mrb[28].mxu1 %v2360_v61 }
 0x18f   : > { %v3604_v62 = vpop.f32.mrb[0].mxu0 }
 0x190   : > { %v3668_v63 = vpop.f32.mrb[0].mxu1  ;;  %v3605_v0 = vpop.f32.mrb[1].mxu0 }
 0x191   : > { %v3606_v1 = vadd.f32 %v3605_v0, %v3604_v62  ;;  %v3669_v2 = vpop.f32.mrb[1].mxu1  ;;  %v3607_v3 = vpop.f32.mrb[2].mxu0 }
 0x192   : > { %v3670_v17 = vadd.f32 %v3669_v2, %v3668_v63  ;;  %v3671_v6 = vpop.f32.mrb[2].mxu1  ;;  %v3608_v4 = vpop.f32.mrb[3].mxu0 }
 0x193   : > { %v3609_v7 = vadd.f32 %v3608_v4, %v3607_v3  ;;  %v3672_v8 = vpop.f32.mrb[3].mxu1 }
 0x194   : > { %v2750_v9 = vadd.f32 %v3670_v17, %v3606_v1  ;;  %v3673_v10 = vadd.f32 %v3672_v8, %v3671_v6 }
 0x196   : > { %v2819_v13 = vmul.f32 %v4607_v5, %v2750_v9  ;;  %v2753_v14 = vadd.f32 %v3673_v10, %v3609_v7 }
 0x198   : > { %v2842_v15 = vadd.f32 %v4612_v11, %v2819_v13  ;;  %v2820_v16 = vmul.f32 %v4607_v5, %v2753_v14  ;;  %v3542_v14 = vld [vmem:[%s4621_s13 + $0x14] sm:$0x3] }
 0x19a   : > { %vm2858_vm9 = vcmp.ge.f32.partialorder %v2842_v15, 0.0  ;;  %v2874_v18 = vmul.f32 0.2, %v2842_v15  ;;  %v2843_v19 = vadd.f32 %v4612_v11, %v2820_v16 }
 0x19c   : > { %v2890_v20 = vsel %vm2858_vm9, %v2842_v15, %v2874_v18  ;;  %vm2859_vm13 = vcmp.ge.f32.partialorder %v2843_v19, 0.0  ;;  %v2875_v21 = vmul.f32 0.2, %v2843_v19 }
 0x19d   : > { %v3572_v22 = vpack.c.bf16 %v2890_v20, %v2890_v20 }
 0x19e   : > { %v2891_v23 = vsel %vm2859_vm13, %v2843_v19, %v2875_v21 }
 0x19f   : > { %2922 = vst.msk [vmem:[%s4621_s13] sm:$0xf] %vm2921_vm12, %v3572_v22  ;;  %v3573_v26 = vpack.c.bf16 %v2891_v23, %v2891_v23 }
 0x1a1   : > { %v2927_v27 = vsel %vm4623_vm14, %v3573_v26, %v2926_v25 }
 0x1a2   : > { %2928 = vst [vmem:[%s4621_s13 + $0x4] sm:$0x3] %v2927_v27 }
 0x1a7   : > { %v3610_v28 = vpop.f32.mrb[4].mxu0  ;;  %v3674_v29 = vpop.f32.mrb[4].mxu1 }
 0x1a8   : > { %v3611_v30 = vpop.f32.mrb[5].mxu0  ;;  %v3675_v32 = vpop.f32.mrb[5].mxu1 }
 0x1a9   : > { %v3612_v31 = vadd.f32 %v3611_v30, %v3610_v28  ;;  %v3613_v33 = vpop.f32.mrb[6].mxu0  ;;  %v3676_v34 = vadd.f32 %v3675_v32, %v3674_v29  ;;  %v3677_v35 = vpop.f32.mrb[6].mxu1 }
 0x1aa   : > { %v3614_v36 = vpop.f32.mrb[7].mxu0  ;;  %v3678_v38 = vpop.f32.mrb[7].mxu1 }
 0x1ab   : > { %v3615_v37 = vadd.f32 %v3614_v36, %v3613_v33  ;;  %v2758_v39 = vadd.f32 %v3676_v34, %v3612_v31  ;;  %v3679_v40 = vadd.f32 %v3678_v38, %v3677_v35 }
 0x1ad   : > { %v2821_v41 = vmul.f32 %v4607_v5, %v2758_v39  ;;  %v2761_v42 = vadd.f32 %v3679_v40, %v3615_v37 }
 0x1af   : > { %v2844_v44 = vadd.f32 %v4612_v11, %v2821_v41  ;;  %v2822_v45 = vmul.f32 %v4607_v5, %v2761_v42  ;;  %v3547_v42 = vld [vmem:[%s4621_s13 + $0x1c] sm:$0x3] }
 0x1b1   : > { %vm2860_vm15 = vcmp.ge.f32.partialorder %v2844_v44, 0.0  ;;  %v2876_v46 = vmul.f32 0.2, %v2844_v44  ;;  %v2845_v12 = vadd.f32 %v4612_v11, %v2822_v45 }
 0x1b3   : > { %v2892_v47 = vsel %vm2860_vm15, %v2844_v44, %v2876_v46  ;;  %vm2861_vm0 = vcmp.ge.f32.partialorder %v2845_v12, 0.0  ;;  %v2877_v48 = vmul.f32 0.2, %v2845_v12 }
 0x1b4   : > { %v3574_v43 = vpack.c.bf16 %v2892_v47, %v2892_v47 }
 0x1b5   : > { %v2893_v49 = vsel %vm2861_vm0, %v2845_v12, %v2877_v48 }
 0x1b6   : > { %3536 = vst.msk [vmem:[%s4621_s13 + $0x8] sm:$0xf] %vm2921_vm12, %v3574_v43  ;;  %v3575_v51 = vpack.c.bf16 %v2893_v49, %v2893_v49 }
 0x1b8   : > { %v2939_v52 = vsel %vm4623_vm14, %v3575_v51, %v3537_v50 }
 0x1b9   : > { %3538 = vst [vmem:[%s4621_s13 + $0xc] sm:$0x3] %v2939_v52 }
 0x1bf   : > { %v3616_v53 = vpop.f32.mrb[8].mxu0  ;;  %v3680_v54 = vpop.f32.mrb[8].mxu1 }
 0x1c0   : > { %v3617_v55 = vpop.f32.mrb[9].mxu0  ;;  %v3681_v57 = vpop.f32.mrb[9].mxu1 }
 0x1c1   : > { %v3618_v56 = vadd.f32 %v3617_v55, %v3616_v53  ;;  %v3619_v58 = vpop.f32.mrb[10].mxu0  ;;  %v3682_v59 = vadd.f32 %v3681_v57, %v3680_v54  ;;  %v3683_v60 = vpop.f32.mrb[10].mxu1 }
 0x1c2   : > { %v3620_v61 = vpop.f32.mrb[11].mxu0  ;;  %v3684_v63 = vpop.f32.mrb[11].mxu1 }
 0x1c3   : > { %v3621_v62 = vadd.f32 %v3620_v61, %v3619_v58  ;;  %v2766_v0 = vadd.f32 %v3682_v59, %v3618_v56  ;;  %v3685_v1 = vadd.f32 %v3684_v63, %v3683_v60 }
 0x1c5   : > { %v2823_v2 = vmul.f32 %v4607_v5, %v2766_v0  ;;  %v2769_v3 = vadd.f32 %v3685_v1, %v3621_v62 }
 0x1c7   : > { %v2846_v17 = vadd.f32 %v4612_v11, %v2823_v2  ;;  %v2824_v6 = vmul.f32 %v4607_v5, %v2769_v3  ;;  %v3552_v3 = vld [vmem:[%s4621_s13 + $0x24] sm:$0x3] }
 0x1c9   : > { %vm2862_vm1 = vcmp.ge.f32.partialorder %v2846_v17, 0.0  ;;  %v2878_v4 = vmul.f32 0.2, %v2846_v17  ;;  %v2847_v7 = vadd.f32 %v4612_v11, %v2824_v6 }
 0x1cb   : > { %v2894_v8 = vsel %vm2862_vm1, %v2846_v17, %v2878_v4  ;;  %vm2863_vm2 = vcmp.ge.f32.partialorder %v2847_v7, 0.0  ;;  %v2879_v9 = vmul.f32 0.2, %v2847_v7 }
 0x1cc   : > { %v3576_v10 = vpack.c.bf16 %v2894_v8, %v2894_v8 }
 0x1cd   : > { %v2895_v13 = vsel %vm2863_vm2, %v2847_v7, %v2879_v9 }
 0x1ce   : > { %3541 = vst.msk [vmem:[%s4621_s13 + $0x10] sm:$0xf] %vm2921_vm12, %v3576_v10  ;;  %v3577_v15 = vpack.c.bf16 %v2895_v13, %v2895_v13 }
 0x1d0   : > { %v2951_v16 = vsel %vm4623_vm14, %v3577_v15, %v3542_v14 }
 0x1d1   : > { %3543 = vst [vmem:[%s4621_s13 + $0x14] sm:$0x3] %v2951_v16 }
 0x1d7   : > { %v3622_v18 = vpop.f32.mrb[12].mxu0  ;;  %v3686_v19 = vpop.f32.mrb[12].mxu1 }
 0x1d8   : > { %v3623_v20 = vpop.f32.mrb[13].mxu0  ;;  %v3687_v22 = vpop.f32.mrb[13].mxu1 }
 0x1d9   : > { %v3624_v21 = vadd.f32 %v3623_v20, %v3622_v18  ;;  %v3625_v23 = vpop.f32.mrb[14].mxu0  ;;  %v3688_v25 = vadd.f32 %v3687_v22, %v3686_v19  ;;  %v3689_v26 = vpop.f32.mrb[14].mxu1 }
 0x1da   : > { %v3626_v27 = vpop.f32.mrb[15].mxu0  ;;  %v3690_v29 = vpop.f32.mrb[15].mxu1 }
 0x1db   : > { %v3627_v28 = vadd.f32 %v3626_v27, %v3625_v23  ;;  %v2774_v30 = vadd.f32 %v3688_v25, %v3624_v21  ;;  %v3691_v31 = vadd.f32 %v3690_v29, %v3689_v26 }
 0x1dd   : > { %v2825_v32 = vmul.f32 %v4607_v5, %v2774_v30  ;;  %v2777_v33 = vadd.f32 %v3691_v31, %v3627_v28 }
 0x1df   : > { %v2848_v34 = vadd.f32 %v4612_v11, %v2825_v32  ;;  %v2826_v35 = vmul.f32 %v4607_v5, %v2777_v33  ;;  %v3557_v33 = vld [vmem:[%s4621_s13 + $0x2c] sm:$0x3] }
 0x1e1   : > { %vm2864_vm3 = vcmp.ge.f32.partialorder %v2848_v34, 0.0  ;;  %v2880_v36 = vmul.f32 0.2, %v2848_v34  ;;  %v2849_v37 = vadd.f32 %v4612_v11, %v2826_v35 }
 0x1e3   : > { %v2896_v38 = vsel %vm2864_vm3, %v2848_v34, %v2880_v36  ;;  %vm2865_vm4 = vcmp.ge.f32.partialorder %v2849_v37, 0.0  ;;  %v2881_v39 = vmul.f32 0.2, %v2849_v37 }
 0x1e4   : > { %v3578_v40 = vpack.c.bf16 %v2896_v38, %v2896_v38 }
 0x1e5   : > { %v2897_v41 = vsel %vm2865_vm4, %v2849_v37, %v2881_v39 }
 0x1e6   : > { %3546 = vst.msk [vmem:[%s4621_s13 + $0x18] sm:$0xf] %vm2921_vm12, %v3578_v40  ;;  %v3579_v44 = vpack.c.bf16 %v2897_v41, %v2897_v41 }
 0x1e8   : > { %v2963_v45 = vsel %vm4623_vm14, %v3579_v44, %v3547_v42 }
 0x1e9   : > { %3548 = vst [vmem:[%s4621_s13 + $0x1c] sm:$0x3] %v2963_v45 }
 0x1ef   : > { %v3628_v46 = vpop.f32.mrb[16].mxu0  ;;  %v3692_v12 = vpop.f32.mrb[16].mxu1 }
 0x1f0   : > { %v3629_v47 = vpop.f32.mrb[17].mxu0  ;;  %v3693_v43 = vpop.f32.mrb[17].mxu1 }
 0x1f1   : > { %v3630_v48 = vadd.f32 %v3629_v47, %v3628_v46  ;;  %v3631_v49 = vpop.f32.mrb[18].mxu0  ;;  %v3694_v50 = vadd.f32 %v3693_v43, %v3692_v12  ;;  %v3695_v51 = vpop.f32.mrb[18].mxu1 }
 0x1f2   : > { %v3632_v52 = vpop.f32.mrb[19].mxu0  ;;  %v3696_v54 = vpop.f32.mrb[19].mxu1 }
 0x1f3   : > { %v3633_v53 = vadd.f32 %v3632_v52, %v3631_v49  ;;  %v2782_v55 = vadd.f32 %v3694_v50, %v3630_v48  ;;  %v3697_v56 = vadd.f32 %v3696_v54, %v3695_v51 }
 0x1f5   : > { %v2827_v57 = vmul.f32 %v4607_v5, %v2782_v55  ;;  %v2785_v58 = vadd.f32 %v3697_v56, %v3633_v53 }
 0x1f7   : > { %v2850_v59 = vadd.f32 %v4612_v11, %v2827_v57  ;;  %v2828_v60 = vmul.f32 %v4607_v5, %v2785_v58 }
 0x1f9   : > { %vm2866_vm5 = vcmp.ge.f32.partialorder %v2850_v59, 0.0  ;;  %v2882_v61 = vmul.f32 0.2, %v2850_v59  ;;  %v2851_v62 = vadd.f32 %v4612_v11, %v2828_v60 }
 0x1fb   : > { %v2898_v63 = vsel %vm2866_vm5, %v2850_v59, %v2882_v61  ;;  %vm2867_vm6 = vcmp.ge.f32.partialorder %v2851_v62, 0.0  ;;  %v2883_v0 = vmul.f32 0.2, %v2851_v62 }
 0x1fc   : > { %v3580_v1 = vpack.c.bf16 %v2898_v63, %v2898_v63 }
 0x1fd   : > { %v2899_v2 = vsel %vm2867_vm6, %v2851_v62, %v2883_v0 }
 0x1fe   : > { %3551 = vst.msk [vmem:[%s4621_s13 + $0x20] sm:$0xf] %vm2921_vm12, %v3580_v1  ;;  %v3581_v17 = vpack.c.bf16 %v2899_v2, %v2899_v2 }
 0x200   : > { %v2975_v6 = vsel %vm4623_vm14, %v3581_v17, %v3552_v3 }
 0x201   : > { %3553 = vst [vmem:[%s4621_s13 + $0x24] sm:$0x3] %v2975_v6  ;;  %v3562_v6 = vld [vmem:[%s4621_s13 + $0x34] sm:$0x3] }
 0x207   : > { %v3634_v4 = vpop.f32.mrb[20].mxu0 }
 0x208   : > { %v3698_v7 = vpop.f32.mrb[20].mxu1  ;;  %v3635_v8 = vpop.f32.mrb[21].mxu0 }
 0x209   : > { %v3636_v9 = vadd.f32 %v3635_v8, %v3634_v4  ;;  %v3699_v10 = vpop.f32.mrb[21].mxu1  ;;  %v3637_v13 = vpop.f32.mrb[22].mxu0 }
 0x20a   : > { %v3700_v14 = vadd.f32 %v3699_v10, %v3698_v7  ;;  %v3701_v15 = vpop.f32.mrb[22].mxu1  ;;  %v3638_v16 = vpop.f32.mrb[23].mxu0 }
 0x20b   : > { %v3639_v18 = vadd.f32 %v3638_v16, %v3637_v13  ;;  %v3702_v19 = vpop.f32.mrb[23].mxu1 }
 0x20c   : > { %v2790_v20 = vadd.f32 %v3700_v14, %v3636_v9  ;;  %v3703_v21 = vadd.f32 %v3702_v19, %v3701_v15 }
 0x20e   : > { %v2829_v22 = vmul.f32 %v4607_v5, %v2790_v20  ;;  %v2793_v23 = vadd.f32 %v3703_v21, %v3639_v18 }
 0x210   : > { %v2852_v25 = vadd.f32 %v4612_v11, %v2829_v22  ;;  %v2830_v26 = vmul.f32 %v4607_v5, %v2793_v23  ;;  %v3567_v23 = vld [vmem:[%s4621_s13 + $0x3c] sm:$0x3] }
 0x212   : > { %vm2868_vm7 = vcmp.ge.f32.partialorder %v2852_v25, 0.0  ;;  %v2884_v27 = vmul.f32 0.2, %v2852_v25  ;;  %v2853_v28 = vadd.f32 %v4612_v11, %v2830_v26 }
 0x214   : > { %v2900_v29 = vsel %vm2868_vm7, %v2852_v25, %v2884_v27  ;;  %vm2869_vm8 = vcmp.ge.f32.partialorder %v2853_v28, 0.0  ;;  %v2885_v30 = vmul.f32 0.2, %v2853_v28 }
 0x215   : > { %v3582_v31 = vpack.c.bf16 %v2900_v29, %v2900_v29 }
 0x216   : > { %v2901_v32 = vsel %vm2869_vm8, %v2853_v28, %v2885_v30 }
 0x217   : > { %3556 = vst.msk [vmem:[%s4621_s13 + $0x28] sm:$0xf] %vm2921_vm12, %v3582_v31  ;;  %v3583_v34 = vpack.c.bf16 %v2901_v32, %v2901_v32  ;;  %v3640_v36 = vpop.f32.mrb[24].mxu0 }
 0x218   : > { %v3641_v37 = vpop.f32.mrb[25].mxu0  ;;  %v3704_v38 = vpop.f32.mrb[24].mxu1 }
 0x219   : > { %v2987_v35 = vsel %vm4623_vm14, %v3583_v34, %v3557_v33  ;;  %v3642_v39 = vadd.f32 %v3641_v37, %v3640_v36  ;;  %v3643_v40 = vpop.f32.mrb[26].mxu0  ;;  %v3705_v41 = vpop.f32.mrb[25].mxu1 }
 0x21a   : > { %3558 = vst [vmem:[%s4621_s13 + $0x2c] sm:$0x3] %v2987_v35  ;;  %v3644_v42 = vpop.f32.mrb[27].mxu0  ;;  %v3706_v44 = vadd.f32 %v3705_v41, %v3704_v38  ;;  %v3707_v45 = vpop.f32.mrb[26].mxu1 }
 0x21b   : > { %v3645_v46 = vadd.f32 %v3644_v42, %v3643_v40  ;;  %v3708_v12 = vpop.f32.mrb[27].mxu1 }
 0x21c   : > { %v2798_v47 = vadd.f32 %v3706_v44, %v3642_v39  ;;  %v3709_v48 = vadd.f32 %v3708_v12, %v3707_v45 }
 0x21e   : > { %v2831_v43 = vmul.f32 %v4607_v5, %v2798_v47  ;;  %v2801_v49 = vadd.f32 %v3709_v48, %v3645_v46 }
 0x220   : > { %v2854_v50 = vadd.f32 %v4612_v11, %v2831_v43  ;;  %v2832_v51 = vmul.f32 %v4607_v5, %v2801_v49  ;;  %v3646_v52 = vpop.f32.mrb[28].mxu0  ;;  %v3710_v55 = vpop.f32.mrb[28].mxu1 }
 0x221   : > { %v3647_v56 = vpop.f32.mrb[29].mxu0  ;;  %v3711_v58 = vpop.f32.mrb[29].mxu1 }
 0x222   : > { %vm2870_vm9 = vcmp.ge.f32.partialorder %v2854_v50, 0.0  ;;  %v2886_v53 = vmul.f32 0.2, %v2854_v50  ;;  %v2855_v54 = vadd.f32 %v4612_v11, %v2832_v51  ;;  %v3648_v57 = vadd.f32 %v3647_v56, %v3646_v52  ;;  %v3649_v59 = vpop.f32.mrb[30].mxu0  ;;  %v3713_v63 = vpop.f32.mrb[30].mxu1 }
 0x223   : > { %v3712_v62 = vadd.f32 %v3711_v58, %v3710_v55  ;;  %v3650_v0 = vpop.f32.mrb[31].mxu0  ;;  %v3714_v3 = vpop.f32.mrb[31].mxu1 }
 0x224   : > { %v2902_v60 = vsel %vm2870_vm9, %v2854_v50, %v2886_v53  ;;  %vm2871_vm10 = vcmp.ge.f32.partialorder %v2855_v54, 0.0  ;;  %v2887_v61 = vmul.f32 0.2, %v2855_v54  ;;  %v3651_v2 = vadd.f32 %v3650_v0, %v3649_v59 }
 0x225   : > { %v3584_v1 = vpack.c.bf16 %v2902_v60, %v2902_v60  ;;  %v2806_v4 = vadd.f32 %v3712_v62, %v3648_v57  ;;  %v3715_v7 = vadd.f32 %v3714_v3, %v3713_v63 }
 0x226   : > { %v2903_v17 = vsel %vm2871_vm10, %v2855_v54, %v2887_v61 }
 0x227   : > { %3561 = vst.msk [vmem:[%s4621_s13 + $0x30] sm:$0xf] %vm2921_vm12, %v3584_v1  ;;  %v3585_v8 = vpack.c.bf16 %v2903_v17, %v2903_v17  ;;  %v2833_v9 = vmul.f32 %v4607_v5, %v2806_v4  ;;  %v2809_v10 = vadd.f32 %v3715_v7, %v3651_v2 }
 0x229   : > { %v2999_v13 = vsel %vm4623_vm14, %v3585_v8, %v3562_v6  ;;  %v2856_v14 = vadd.f32 %v4612_v11, %v2833_v9  ;;  %v2834_v15 = vmul.f32 %v4607_v5, %v2809_v10 }
 0x22a   : > { %3563 = vst [vmem:[%s4621_s13 + $0x34] sm:$0x3] %v2999_v13 }
 0x22b   : > { %vm2872_vm11 = vcmp.ge.f32.partialorder %v2856_v14, 0.0  ;;  %v2888_v16 = vmul.f32 0.2, %v2856_v14  ;;  %v2857_v18 = vadd.f32 %v4612_v11, %v2834_v15 }
 0x22d   : > { %v2904_v19 = vsel %vm2872_vm11, %v2856_v14, %v2888_v16  ;;  %vm2873_vm13 = vcmp.ge.f32.partialorder %v2857_v18, 0.0  ;;  %v2889_v20 = vmul.f32 0.2, %v2857_v18 }
 0x22e   : > { %v3586_v21 = vpack.c.bf16 %v2904_v19, %v2904_v19 }
 0x22f   : > { %v2905_v22 = vsel %vm2873_vm13, %v2857_v18, %v2889_v20 }
 0x230   : > { %3566 = vst.msk [vmem:[%s4621_s13 + $0x38] sm:$0xf] %vm2921_vm12, %v3586_v21  ;;  %v3587_v25 = vpack.c.bf16 %v2905_v22, %v2905_v22 }
 0x232   : > { %v3011_v26 = vsel %vm4623_vm14, %v3587_v25, %v3567_v23 }
 0x233   : > { %3568 = vst [vmem:[%s4621_s13 + $0x3c] sm:$0x3] %v3011_v26 }
 0x234 PF: > { %s14_s17 = sadd.s32 1, %s3926_s17   ;;  %s4727_s15 = smov %s3922_s16 }
 0x235   : > { %p11_p6 = scmp.ge.s32.totalorder %s14_s17, 4   ;;  %s4728_s16 = smov %s4730_s18 }
 0x237   :  { %13 = sbr.rel (!%p11_p6) target bundleno = 2 (0x2), region = 108 }

</bundles_post_ra>
